<compile_context>
chip_gen: v7x
topology: tpu7x:2x2x1
jax: 0.10.0
libtpu: 0.0.40
codegen_flags: <defaults>
</compile_context>

<pallas_src>
import jax
import jax.numpy as jnp
import numpy as np
from jax.experimental import pallas as pl
from jax.experimental.pallas import tpu as pltpu

CONV_K = 3   # conv_kernel1
POOL_K = 2   # max_kernel1


def neural_network_conv1(x_nchw, w1, b1, w2, b2, wfc, bfc):
    """Forward pass of Neural_Network_Conv1 as one Pallas TPU kernel.

    x_nchw: (N, Cin, H, W)
    w1: (C1, Cin, 3, 3)  b1: (C1,)
    w2: (C2, C1, 3, 3)   b2: (C2,)
    wfc: (K, C2*H2*W2)   bfc: (K,)
    returns softmax probabilities (N, K)
    """
    N, Cin, H, W = x_nchw.shape
    C1 = w1.shape[0]
    C2 = w2.shape[0]
    K = wfc.shape[0]

    H1, W1 = H - CONV_K + 1, W - CONV_K + 1          # conv1 output (valid)
    Hp, Wp = H1 // POOL_K, W1 // POOL_K              # after 2x2 max pool (floor mode)
    H2, W2 = Hp - CONV_K + 1, Wp - CONV_K + 1        # conv2 output (valid)
    P = H2 * W2
    KC1 = CONV_K * CONV_K * Cin                      # conv1 contraction depth (36)
    KC2 = CONV_K * CONV_K * C1                       # conv2 contraction depth (288)
    KP = ((K + 127) // 128) * 128                    # lane-dense padded class dim

    # Batch tiling: whole batch when small / not 8-divisible, else 8-row blocks.
    TN = 8 if (N % 8 == 0) else N
    grid = (N // TN,)

    # ------------- wrapper-side layout plumbing (plain JAX, no hoisted compute) -------------
    xf = x_nchw.astype(jnp.float32)
    x_nhwc = jnp.transpose(xf, (0, 2, 3, 1))                              # (N,H,W,Cin)
    # im2col for conv1; column index = (kh*3 + kw)*Cin + cin
    taps = [x_nhwc[:, kh:kh + H1, kw:kw + W1, :]
            for kh in range(CONV_K) for kw in range(CONV_K)]
    x1p = jnp.concatenate(taps, axis=-1).reshape(N, H1 * W1, KC1).astype(jnp.bfloat16)

    # conv weights reordered to match the im2col column ordering
    w1k = jnp.transpose(w1, (2, 3, 1, 0)).reshape(KC1, C1).astype(jnp.bfloat16)
    w2k = jnp.transpose(w2, (2, 3, 1, 0)).reshape(KC2, C2).astype(jnp.bfloat16)

    # torch Linear consumes flatten(N, C2, H2, W2): feature index c*H2*W2 + h*W2 + w.
    # Reorder to (p = h*W2 + w)*C2 + c so the kernel contracts the flattened features
    # directly; pad the class dim to 128 lanes (zero weights, -1e30 bias -> prob 0).
    wfck = (wfc.reshape(K, C2, H2, W2).transpose(2, 3, 1, 0)
               .reshape(P * C2, K).astype(jnp.float32))
    wfck = jnp.pad(wfck, ((0, 0), (0, KP - K))).astype(jnp.bfloat16)

    b1k = b1.reshape(1, C1).astype(jnp.float32)
    b2k = b2.reshape(1, C2).astype(jnp.float32)
    bfck = jnp.pad(bfc.reshape(1, K).astype(jnp.float32),
                   ((0, 0), (0, KP - K)), constant_values=-1e30)

    # ----------------------------------- kernel -----------------------------------
    def kernel(x_ref, w1_ref, b1_ref, w2_ref, b2_ref, wfc_ref, bfc_ref,
               out_ref, p2_ref, fc_ref):
        # ---- conv1: one fused im2col matmul (contraction = 9*Cin), bf16 x bf16 -> f32 ----
        xp = x_ref[...].reshape(TN * H1 * W1, KC1)
        y1 = jnp.dot(xp, w1_ref[...], preferred_element_type=jnp.float32)
        y1 = jnp.maximum(y1 + b1_ref[...], 0.0)                     # (TN*H1*W1, C1) f32

        # ---- 2x2 max pool, stride 2 (floor mode) ----
        if (H1 != POOL_K * Hp) or (W1 != POOL_K * Wp):
            # drop the odd remainder row/column like torch MaxPool2d floor mode
            y1 = y1.reshape(TN, H1, W1, C1)[:, :POOL_K * Hp, :POOL_K * Wp, :]
        y6 = y1.reshape(TN, Hp, POOL_K, Wp, POOL_K, C1)
        pooled = jnp.max(jnp.max(y6, axis=2), axis=3)               # (TN, Hp, Wp, C1) f32

        # ---- conv2: im2col assembled in VMEM scratch, one matmul (contraction 9*C1) ----
        for kh in range(CONV_K):
            for kw in range(CONV_K):
                col = (kh * CONV_K + kw) * C1
                patch = pooled[:, kh:kh + H2, kw:kw + W2, :].reshape(TN * P, C1)
                p2_ref[:, col:col + C1] = patch
        y2 = jnp.dot(p2_ref[...].astype(jnp.bfloat16), w2_ref[...],
                     preferred_element_type=jnp.float32)
        y2 = jnp.maximum(y2 + b2_ref[...], 0.0)                     # (TN*P, C2) f32

        # ---- flatten to (TN, P*C2) in scratch, single FC matmul (contraction = P*C2) ----
        feat = y2.reshape(TN, P, C2)
        for p in range(P):
            fc_ref[:, p * C2:(p + 1) * C2] = feat[:, p, :]
        logits = jnp.dot(fc_ref[...].astype(jnp.bfloat16), wfc_ref[...],
                         preferred_element_type=jnp.float32) + bfc_ref[...]  # (TN, KP)

        # ---- softmax over (padded) class dim; padded logits are -1e30 -> prob exactly 0 ----
        m = jnp.max(logits, axis=1, keepdims=True)
        e = jnp.exp(logits - m)
        denom = jnp.sum(e, axis=1, keepdims=True)
        out_ref[...] = e * pl.reciprocal(denom, approx=True)

    out_padded = pl.pallas_call(
        kernel,
        out_shape=jax.ShapeDtypeStruct((N, KP), jnp.float32),
        grid=grid,
        in_specs=[
            pl.BlockSpec((TN, H1 * W1, KC1), lambda i: (i, 0, 0)),   # x patches: tiled on batch
            pl.BlockSpec((KC1, C1), lambda i: (0, 0)),               # weights: resident
            pl.BlockSpec((1, C1), lambda i: (0, 0)),
            pl.BlockSpec((KC2, C2), lambda i: (0, 0)),
            pl.BlockSpec((1, C2), lambda i: (0, 0)),
            pl.BlockSpec((P * C2, KP), lambda i: (0, 0)),
            pl.BlockSpec((1, KP), lambda i: (0, 0)),
        ],
        out_specs=pl.BlockSpec((TN, KP), lambda i: (i, 0)),
        scratch_shapes=[
            pltpu.VMEM((TN * P, KC2), jnp.float32),    # conv2 im2col patches
            pltpu.VMEM((TN, P * C2), jnp.float32),     # flattened FC features
        ],
        compiler_params=pltpu.CompilerParams(
            dimension_semantics=("parallel",),
            vmem_limit_bytes=32 * 1024 * 1024,
        ),
    )(x1p, w1k, b1k, w2k, b2k, wfck, bfck)

    return out_padded[:, :K]


# ----------------------------------- references -----------------------------------
def _round_bf16(a):
    return a.astype(jnp.bfloat16).astype(jnp.float32)


def reference(x, w1, b1, w2, b2, wfc, bfc, emulate_bf16=False):
    """Pure-JAX reference. With emulate_bf16=True the matmul operands are rounded to
    bf16 (f32 accumulation), matching the kernel's MXU precision."""
    hp = jax.lax.Precision.HIGHEST
    r = _round_bf16 if emulate_bf16 else (lambda a: a)
    y = jax.lax.conv_general_dilated(
        r(x.astype(jnp.float32)), r(w1.astype(jnp.float32)), (1, 1), 'VALID',
        dimension_numbers=('NCHW', 'OIHW', 'NCHW'), precision=hp)
    y = jnp.maximum(y + b1[None, :, None, None], 0.0)
    y = jax.lax.reduce_window(y, -jnp.inf, jax.lax.max,
                              (1, 1, POOL_K, POOL_K), (1, 1, POOL_K, POOL_K), 'VALID')
    y = jax.lax.conv_general_dilated(
        r(y), r(w2.astype(jnp.float32)), (1, 1), 'VALID',
        dimension_numbers=('NCHW', 'OIHW', 'NCHW'), precision=hp)
    y = jnp.maximum(y + b2[None, :, None, None], 0.0)
    y = y.reshape(y.shape[0], -1)
    logits = jnp.dot(r(y), r(wfc.astype(jnp.float32)).T, precision=hp) + bfc
    return jax.nn.softmax(logits, axis=1)


if __name__ == "__main__":
    # small shapes consistent with the module
    N, Cin, H, W = 2, 4, 16, 16
    nClasses = 10
    C1, C2 = 32, 64
    H1, W1 = H - CONV_K + 1, W - CONV_K + 1            # 14, 14
    Hp, Wp = H1 // POOL_K, W1 // POOL_K                # 7, 7
    out_h1, out_w1 = Hp - CONV_K + 1, Wp - CONV_K + 1  # 5, 5  (conv2 output)

    key = jax.random.PRNGKey(0)
    kx, k1, kb1, k2, kb2, kf, kbf = jax.random.split(key, 7)
    x = jax.random.normal(kx, (N, Cin, H, W), jnp.float32)
    w1 = 0.1 * jax.random.normal(k1, (C1, Cin, CONV_K, CONV_K), jnp.float32)
    b1 = 0.1 * jax.random.normal(kb1, (C1,), jnp.float32)
    w2 = 0.1 * jax.random.normal(k2, (C2, C1, CONV_K, CONV_K), jnp.float32)
    b2 = 0.1 * jax.random.normal(kb2, (C2,), jnp.float32)
    wfc = 0.05 * jax.random.normal(kf, (nClasses, C2 * out_h1 * out_w1), jnp.float32)
    bfc = 0.05 * jax.random.normal(kbf, (nClasses,), jnp.float32)

    probs = jax.block_until_ready(
        neural_network_conv1(x, w1, b1, w2, b2, wfc, bfc))

    # tight check vs a bf16-operand / f32-accumulate reference (matches MXU math;
    # slack covers summation order + approximate reciprocal in the softmax divide)
    ref_bf16 = jax.block_until_ready(
        reference(x, w1, b1, w2, b2, wfc, bfc, emulate_bf16=True))
    np.testing.assert_allclose(np.asarray(probs), np.asarray(ref_bf16),
                               rtol=1e-2, atol=2e-3)

    # loose check vs the full-f32 HIGHEST reference (bf16 operands shave mantissa bits)
    ref_f32 = jax.block_until_ready(
        reference(x, w1, b1, w2, b2, wfc, bfc, emulate_bf16=False))
    np.testing.assert_allclose(np.asarray(probs), np.asarray(ref_f32),
                               rtol=5e-2, atol=1e-2)

    assert probs.shape == (N, nClasses)
    print("KERNEL_OK")
</pallas_src>

<mosaic_0001>
module attributes {stable_mosaic.version = 11 : i64} {
  func.func @kernel(%arg0: i32, %arg1: memref<2x196x36xbf16, #tpu.memory_space<vmem>>, %arg2: memref<36x32xbf16, #tpu.memory_space<vmem>>, %arg3: memref<1x32xf32, #tpu.memory_space<vmem>>, %arg4: memref<288x64xbf16, #tpu.memory_space<vmem>>, %arg5: memref<1x64xf32, #tpu.memory_space<vmem>>, %arg6: memref<1600x128xbf16, #tpu.memory_space<vmem>>, %arg7: memref<1x128xf32, #tpu.memory_space<vmem>>, %arg8: memref<2x128xf32, #tpu.memory_space<vmem>>, %arg9: memref<50x288xf32, #tpu.memory_space<vmem>>, %arg10: memref<2x1600xf32, #tpu.memory_space<vmem>>) attributes {dimension_semantics = [#tpu.dimension_semantics<parallel>], iteration_bounds = array<i64: 1>, scalar_prefetch = 0 : i64, scratch_operands = 2 : i64, tpu.core_type = #tpu.core_type<tc>, window_params = [{transform_indices = @transform_0, window_bounds = array<i64: 2, 196, 36>}, {pipeline_mode = #tpu.pipeline_mode<synchronous>, transform_indices = @transform_1, window_bounds = array<i64: 36, 32>}, {pipeline_mode = #tpu.pipeline_mode<synchronous>, transform_indices = @transform_2, window_bounds = array<i64: 1, 32>}, {pipeline_mode = #tpu.pipeline_mode<synchronous>, transform_indices = @transform_3, window_bounds = array<i64: 288, 64>}, {pipeline_mode = #tpu.pipeline_mode<synchronous>, transform_indices = @transform_4, window_bounds = array<i64: 1, 64>}, {pipeline_mode = #tpu.pipeline_mode<synchronous>, transform_indices = @transform_5, window_bounds = array<i64: 1600, 128>}, {pipeline_mode = #tpu.pipeline_mode<synchronous>, transform_indices = @transform_6, window_bounds = array<i64: 1, 128>}, {transform_indices = @transform_7, window_bounds = array<i64: 2, 128>}]} {
    %c0 = arith.constant 0 : index
    %c0_0 = arith.constant 0 : index
    %c0_1 = arith.constant 0 : index
    %0 = vector.load %arg1[%c0, %c0_0, %c0_1] : memref<2x196x36xbf16, #tpu.memory_space<vmem>>, vector<2x196x36xbf16>
    %1 = vector.shape_cast %0 : vector<2x196x36xbf16> to vector<392x36xbf16>
    %c0_2 = arith.constant 0 : index
    %c0_3 = arith.constant 0 : index
    %2 = vector.load %arg2[%c0_2, %c0_3] : memref<36x32xbf16, #tpu.memory_space<vmem>>, vector<36x32xbf16>
    %cst = arith.constant dense<0.000000e+00> : vector<392x32xf32>
    %3 = tpu.matmul %1, %2, %cst {dimension_numbers = #tpu.dot_dimension_numbers<[1], [0], [0], [1], [0, 0, 1, 1], [], []>} : vector<392x36xbf16>, vector<36x32xbf16>, vector<392x32xf32> -> vector<392x32xf32>
    %c0_4 = arith.constant 0 : index
    %c0_5 = arith.constant 0 : index
    %4 = vector.load %arg3[%c0_4, %c0_5] : memref<1x32xf32, #tpu.memory_space<vmem>>, vector<1x32xf32>
    %5 = vector.broadcast %4 : vector<1x32xf32> to vector<392x32xf32>
    %6 = arith.addf %3, %5 : vector<392x32xf32>
    %cst_6 = arith.constant 0.000000e+00 : f32
    %7 = vector.broadcast %cst_6 : f32 to vector<392x32xf32>
    %8 = arith.maximumf %6, %7 : vector<392x32xf32>
    %9 = vector.shape_cast %8 : vector<392x32xf32> to vector<2x7x2x7x2x32xf32>
    %cst_7 = arith.constant dense<0xFF800000> : vector<2x7x7x2x32xf32>
    %10 = vector.multi_reduction <maximumf>, %9, %cst_7 [2] : vector<2x7x2x7x2x32xf32> to vector<2x7x7x2x32xf32>
    %cst_8 = arith.constant dense<0xFF800000> : vector<2x7x7x32xf32>
    %11 = vector.multi_reduction <maximumf>, %10, %cst_8 [3] : vector<2x7x7x2x32xf32> to vector<2x7x7x32xf32>
    %12 = vector.extract_strided_slice %11 {offsets = [0, 0, 0, 0], sizes = [2, 5, 5, 32], strides = [1, 1, 1, 1]} : vector<2x7x7x32xf32> to vector<2x5x5x32xf32>
    %13 = vector.shape_cast %12 : vector<2x5x5x32xf32> to vector<50x32xf32>
    %c0_9 = arith.constant 0 : index
    %c0_10 = arith.constant 0 : index
    %14 = vector.load %arg9[%c0_9, %c0_10] : memref<50x288xf32, #tpu.memory_space<vmem>>, vector<50x32xf32>
    tpu.vector_store %arg9[%c0_9, %c0_10], %13 {strides = array<i32>} : memref<50x288xf32, #tpu.memory_space<vmem>>, vector<50x32xf32>,
    %15 = vector.extract_strided_slice %11 {offsets = [0, 0, 1, 0], sizes = [2, 5, 5, 32], strides = [1, 1, 1, 1]} : vector<2x7x7x32xf32> to vector<2x5x5x32xf32>
    %16 = vector.shape_cast %15 : vector<2x5x5x32xf32> to vector<50x32xf32>
    %c0_11 = arith.constant 0 : index
    %c32 = arith.constant 32 : index
    %17 = vector.load %arg9[%c0_11, %c32] : memref<50x288xf32, #tpu.memory_space<vmem>>, vector<50x32xf32>
    tpu.vector_store %arg9[%c0_11, %c32], %16 {strides = array<i32>} : memref<50x288xf32, #tpu.memory_space<vmem>>, vector<50x32xf32>,
    %18 = vector.extract_strided_slice %11 {offsets = [0, 0, 2, 0], sizes = [2, 5, 5, 32], strides = [1, 1, 1, 1]} : vector<2x7x7x32xf32> to vector<2x5x5x32xf32>
    %19 = vector.shape_cast %18 : vector<2x5x5x32xf32> to vector<50x32xf32>
    %c0_12 = arith.constant 0 : index
    %c64 = arith.constant 64 : index
    %20 = vector.load %arg9[%c0_12, %c64] : memref<50x288xf32, #tpu.memory_space<vmem>>, vector<50x32xf32>
    tpu.vector_store %arg9[%c0_12, %c64], %19 {strides = array<i32>} : memref<50x288xf32, #tpu.memory_space<vmem>>, vector<50x32xf32>,
    %21 = vector.extract_strided_slice %11 {offsets = [0, 1, 0, 0], sizes = [2, 5, 5, 32], strides = [1, 1, 1, 1]} : vector<2x7x7x32xf32> to vector<2x5x5x32xf32>
    %22 = vector.shape_cast %21 : vector<2x5x5x32xf32> to vector<50x32xf32>
    %c0_13 = arith.constant 0 : index
    %c96 = arith.constant 96 : index
    %23 = vector.load %arg9[%c0_13, %c96] : memref<50x288xf32, #tpu.memory_space<vmem>>, vector<50x32xf32>
    tpu.vector_store %arg9[%c0_13, %c96], %22 {strides = array<i32>} : memref<50x288xf32, #tpu.memory_space<vmem>>, vector<50x32xf32>,
    %24 = vector.extract_strided_slice %11 {offsets = [0, 1, 1, 0], sizes = [2, 5, 5, 32], strides = [1, 1, 1, 1]} : vector<2x7x7x32xf32> to vector<2x5x5x32xf32>
    %25 = vector.shape_cast %24 : vector<2x5x5x32xf32> to vector<50x32xf32>
    %c0_14 = arith.constant 0 : index
    %c128 = arith.constant 128 : index
    %26 = vector.load %arg9[%c0_14, %c128] : memref<50x288xf32, #tpu.memory_space<vmem>>, vector<50x32xf32>
    tpu.vector_store %arg9[%c0_14, %c128], %25 {strides = array<i32>} : memref<50x288xf32, #tpu.memory_space<vmem>>, vector<50x32xf32>,
    %27 = vector.extract_strided_slice %11 {offsets = [0, 1, 2, 0], sizes = [2, 5, 5, 32], strides = [1, 1, 1, 1]} : vector<2x7x7x32xf32> to vector<2x5x5x32xf32>
    %28 = vector.shape_cast %27 : vector<2x5x5x32xf32> to vector<50x32xf32>
    %c0_15 = arith.constant 0 : index
    %c160 = arith.constant 160 : index
    %29 = vector.load %arg9[%c0_15, %c160] : memref<50x288xf32, #tpu.memory_space<vmem>>, vector<50x32xf32>
    tpu.vector_store %arg9[%c0_15, %c160], %28 {strides = array<i32>} : memref<50x288xf32, #tpu.memory_space<vmem>>, vector<50x32xf32>,
    %30 = vector.extract_strided_slice %11 {offsets = [0, 2, 0, 0], sizes = [2, 5, 5, 32], strides = [1, 1, 1, 1]} : vector<2x7x7x32xf32> to vector<2x5x5x32xf32>
    %31 = vector.shape_cast %30 : vector<2x5x5x32xf32> to vector<50x32xf32>
    %c0_16 = arith.constant 0 : index
    %c192 = arith.constant 192 : index
    %32 = vector.load %arg9[%c0_16, %c192] : memref<50x288xf32, #tpu.memory_space<vmem>>, vector<50x32xf32>
    tpu.vector_store %arg9[%c0_16, %c192], %31 {strides = array<i32>} : memref<50x288xf32, #tpu.memory_space<vmem>>, vector<50x32xf32>,
    %33 = vector.extract_strided_slice %11 {offsets = [0, 2, 1, 0], sizes = [2, 5, 5, 32], strides = [1, 1, 1, 1]} : vector<2x7x7x32xf32> to vector<2x5x5x32xf32>
    %34 = vector.shape_cast %33 : vector<2x5x5x32xf32> to vector<50x32xf32>
    %c0_17 = arith.constant 0 : index
    %c224 = arith.constant 224 : index
    %35 = vector.load %arg9[%c0_17, %c224] : memref<50x288xf32, #tpu.memory_space<vmem>>, vector<50x32xf32>
    tpu.vector_store %arg9[%c0_17, %c224], %34 {strides = array<i32>} : memref<50x288xf32, #tpu.memory_space<vmem>>, vector<50x32xf32>,
    %36 = vector.extract_strided_slice %11 {offsets = [0, 2, 2, 0], sizes = [2, 5, 5, 32], strides = [1, 1, 1, 1]} : vector<2x7x7x32xf32> to vector<2x5x5x32xf32>
    %37 = vector.shape_cast %36 : vector<2x5x5x32xf32> to vector<50x32xf32>
    %c0_18 = arith.constant 0 : index
    %c256 = arith.constant 256 : index
    %38 = vector.load %arg9[%c0_18, %c256] : memref<50x288xf32, #tpu.memory_space<vmem>>, vector<50x32xf32>
    tpu.vector_store %arg9[%c0_18, %c256], %37 {strides = array<i32>} : memref<50x288xf32, #tpu.memory_space<vmem>>, vector<50x32xf32>,
    %c0_19 = arith.constant 0 : index
    %c0_20 = arith.constant 0 : index
    %39 = vector.load %arg9[%c0_19, %c0_20] : memref<50x288xf32, #tpu.memory_space<vmem>>, vector<50x288xf32>
    %40 = arith.truncf %39 : vector<50x288xf32> to vector<50x288xbf16>
    %c0_21 = arith.constant 0 : index
    %c0_22 = arith.constant 0 : index
    %41 = vector.load %arg4[%c0_21, %c0_22] : memref<288x64xbf16, #tpu.memory_space<vmem>>, vector<288x64xbf16>
    %cst_23 = arith.constant dense<0.000000e+00> : vector<50x64xf32>
    %42 = tpu.matmul %40, %41, %cst_23 {dimension_numbers = #tpu.dot_dimension_numbers<[1], [0], [0], [1], [0, 0, 1, 1], [], []>} : vector<50x288xbf16>, vector<288x64xbf16>, vector<50x64xf32> -> vector<50x64xf32>
    %c0_24 = arith.constant 0 : index
    %c0_25 = arith.constant 0 : index
    %43 = vector.load %arg5[%c0_24, %c0_25] : memref<1x64xf32, #tpu.memory_space<vmem>>, vector<1x64xf32>
    %44 = vector.broadcast %43 : vector<1x64xf32> to vector<50x64xf32>
    %45 = arith.addf %42, %44 : vector<50x64xf32>
    %cst_26 = arith.constant 0.000000e+00 : f32
    %46 = vector.broadcast %cst_26 : f32 to vector<50x64xf32>
    %47 = arith.maximumf %45, %46 : vector<50x64xf32>
    %48 = vector.shape_cast %47 : vector<50x64xf32> to vector<2x25x64xf32>
    %49 = vector.extract_strided_slice %48 {offsets = [0, 0, 0], sizes = [2, 1, 64], strides = [1, 1, 1]} : vector<2x25x64xf32> to vector<2x1x64xf32>
    %50 = vector.shape_cast %49 : vector<2x1x64xf32> to vector<2x64xf32>
    %c0_27 = arith.constant 0 : index
    %c0_28 = arith.constant 0 : index
    %51 = vector.load %arg10[%c0_27, %c0_28] : memref<2x1600xf32, #tpu.memory_space<vmem>>, vector<2x64xf32>
    tpu.vector_store %arg10[%c0_27, %c0_28], %50 {strides = array<i32>} : memref<2x1600xf32, #tpu.memory_space<vmem>>, vector<2x64xf32>,
    %52 = vector.extract_strided_slice %48 {offsets = [0, 1, 0], sizes = [2, 1, 64], strides = [1, 1, 1]} : vector<2x25x64xf32> to vector<2x1x64xf32>
    %53 = vector.shape_cast %52 : vector<2x1x64xf32> to vector<2x64xf32>
    %c0_29 = arith.constant 0 : index
    %c64_30 = arith.constant 64 : index
    %54 = vector.load %arg10[%c0_29, %c64_30] : memref<2x1600xf32, #tpu.memory_space<vmem>>, vector<2x64xf32>
    tpu.vector_store %arg10[%c0_29, %c64_30], %53 {strides = array<i32>} : memref<2x1600xf32, #tpu.memory_space<vmem>>, vector<2x64xf32>,
    %55 = vector.extract_strided_slice %48 {offsets = [0, 2, 0], sizes = [2, 1, 64], strides = [1, 1, 1]} : vector<2x25x64xf32> to vector<2x1x64xf32>
    %56 = vector.shape_cast %55 : vector<2x1x64xf32> to vector<2x64xf32>
    %c0_31 = arith.constant 0 : index
    %c128_32 = arith.constant 128 : index
    %57 = vector.load %arg10[%c0_31, %c128_32] : memref<2x1600xf32, #tpu.memory_space<vmem>>, vector<2x64xf32>
    tpu.vector_store %arg10[%c0_31, %c128_32], %56 {strides = array<i32>} : memref<2x1600xf32, #tpu.memory_space<vmem>>, vector<2x64xf32>,
    %58 = vector.extract_strided_slice %48 {offsets = [0, 3, 0], sizes = [2, 1, 64], strides = [1, 1, 1]} : vector<2x25x64xf32> to vector<2x1x64xf32>
    %59 = vector.shape_cast %58 : vector<2x1x64xf32> to vector<2x64xf32>
    %c0_33 = arith.constant 0 : index
    %c192_34 = arith.constant 192 : index
    %60 = vector.load %arg10[%c0_33, %c192_34] : memref<2x1600xf32, #tpu.memory_space<vmem>>, vector<2x64xf32>
    tpu.vector_store %arg10[%c0_33, %c192_34], %59 {strides = array<i32>} : memref<2x1600xf32, #tpu.memory_space<vmem>>, vector<2x64xf32>,
    %61 = vector.extract_strided_slice %48 {offsets = [0, 4, 0], sizes = [2, 1, 64], strides = [1, 1, 1]} : vector<2x25x64xf32> to vector<2x1x64xf32>
    %62 = vector.shape_cast %61 : vector<2x1x64xf32> to vector<2x64xf32>
    %c0_35 = arith.constant 0 : index
    %c256_36 = arith.constant 256 : index
    %63 = vector.load %arg10[%c0_35, %c256_36] : memref<2x1600xf32, #tpu.memory_space<vmem>>, vector<2x64xf32>
    tpu.vector_store %arg10[%c0_35, %c256_36], %62 {strides = array<i32>} : memref<2x1600xf32, #tpu.memory_space<vmem>>, vector<2x64xf32>,
    %64 = vector.extract_strided_slice %48 {offsets = [0, 5, 0], sizes = [2, 1, 64], strides = [1, 1, 1]} : vector<2x25x64xf32> to vector<2x1x64xf32>
    %65 = vector.shape_cast %64 : vector<2x1x64xf32> to vector<2x64xf32>
    %c0_37 = arith.constant 0 : index
    %c320 = arith.constant 320 : index
    %66 = vector.load %arg10[%c0_37, %c320] : memref<2x1600xf32, #tpu.memory_space<vmem>>, vector<2x64xf32>
    tpu.vector_store %arg10[%c0_37, %c320], %65 {strides = array<i32>} : memref<2x1600xf32, #tpu.memory_space<vmem>>, vector<2x64xf32>,
    %67 = vector.extract_strided_slice %48 {offsets = [0, 6, 0], sizes = [2, 1, 64], strides = [1, 1, 1]} : vector<2x25x64xf32> to vector<2x1x64xf32>
    %68 = vector.shape_cast %67 : vector<2x1x64xf32> to vector<2x64xf32>
    %c0_38 = arith.constant 0 : index
    %c384 = arith.constant 384 : index
    %69 = vector.load %arg10[%c0_38, %c384] : memref<2x1600xf32, #tpu.memory_space<vmem>>, vector<2x64xf32>
    tpu.vector_store %arg10[%c0_38, %c384], %68 {strides = array<i32>} : memref<2x1600xf32, #tpu.memory_space<vmem>>, vector<2x64xf32>,
    %70 = vector.extract_strided_slice %48 {offsets = [0, 7, 0], sizes = [2, 1, 64], strides = [1, 1, 1]} : vector<2x25x64xf32> to vector<2x1x64xf32>
    %71 = vector.shape_cast %70 : vector<2x1x64xf32> to vector<2x64xf32>
    %c0_39 = arith.constant 0 : index
    %c448 = arith.constant 448 : index
    %72 = vector.load %arg10[%c0_39, %c448] : memref<2x1600xf32, #tpu.memory_space<vmem>>, vector<2x64xf32>
    tpu.vector_store %arg10[%c0_39, %c448], %71 {strides = array<i32>} : memref<2x1600xf32, #tpu.memory_space<vmem>>, vector<2x64xf32>,
    %73 = vector.extract_strided_slice %48 {offsets = [0, 8, 0], sizes = [2, 1, 64], strides = [1, 1, 1]} : vector<2x25x64xf32> to vector<2x1x64xf32>
    %74 = vector.shape_cast %73 : vector<2x1x64xf32> to vector<2x64xf32>
    %c0_40 = arith.constant 0 : index
    %c512 = arith.constant 512 : index
    %75 = vector.load %arg10[%c0_40, %c512] : memref<2x1600xf32, #tpu.memory_space<vmem>>, vector<2x64xf32>
    tpu.vector_store %arg10[%c0_40, %c512], %74 {strides = array<i32>} : memref<2x1600xf32, #tpu.memory_space<vmem>>, vector<2x64xf32>,
    %76 = vector.extract_strided_slice %48 {offsets = [0, 9, 0], sizes = [2, 1, 64], strides = [1, 1, 1]} : vector<2x25x64xf32> to vector<2x1x64xf32>
    %77 = vector.shape_cast %76 : vector<2x1x64xf32> to vector<2x64xf32>
    %c0_41 = arith.constant 0 : index
    %c576 = arith.constant 576 : index
    %78 = vector.load %arg10[%c0_41, %c576] : memref<2x1600xf32, #tpu.memory_space<vmem>>, vector<2x64xf32>
    tpu.vector_store %arg10[%c0_41, %c576], %77 {strides = array<i32>} : memref<2x1600xf32, #tpu.memory_space<vmem>>, vector<2x64xf32>,
    %79 = vector.extract_strided_slice %48 {offsets = [0, 10, 0], sizes = [2, 1, 64], strides = [1, 1, 1]} : vector<2x25x64xf32> to vector<2x1x64xf32>
    %80 = vector.shape_cast %79 : vector<2x1x64xf32> to vector<2x64xf32>
    %c0_42 = arith.constant 0 : index
    %c640 = arith.constant 640 : index
    %81 = vector.load %arg10[%c0_42, %c640] : memref<2x1600xf32, #tpu.memory_space<vmem>>, vector<2x64xf32>
    tpu.vector_store %arg10[%c0_42, %c640], %80 {strides = array<i32>} : memref<2x1600xf32, #tpu.memory_space<vmem>>, vector<2x64xf32>,
    %82 = vector.extract_strided_slice %48 {offsets = [0, 11, 0], sizes = [2, 1, 64], strides = [1, 1, 1]} : vector<2x25x64xf32> to vector<2x1x64xf32>
    %83 = vector.shape_cast %82 : vector<2x1x64xf32> to vector<2x64xf32>
    %c0_43 = arith.constant 0 : index
    %c704 = arith.constant 704 : index
    %84 = vector.load %arg10[%c0_43, %c704] : memref<2x1600xf32, #tpu.memory_space<vmem>>, vector<2x64xf32>
    tpu.vector_store %arg10[%c0_43, %c704], %83 {strides = array<i32>} : memref<2x1600xf32, #tpu.memory_space<vmem>>, vector<2x64xf32>,
    %85 = vector.extract_strided_slice %48 {offsets = [0, 12, 0], sizes = [2, 1, 64], strides = [1, 1, 1]} : vector<2x25x64xf32> to vector<2x1x64xf32>
    %86 = vector.shape_cast %85 : vector<2x1x64xf32> to vector<2x64xf32>
    %c0_44 = arith.constant 0 : index
    %c768 = arith.constant 768 : index
    %87 = vector.load %arg10[%c0_44, %c768] : memref<2x1600xf32, #tpu.memory_space<vmem>>, vector<2x64xf32>
    tpu.vector_store %arg10[%c0_44, %c768], %86 {strides = array<i32>} : memref<2x1600xf32, #tpu.memory_space<vmem>>, vector<2x64xf32>,
    %88 = vector.extract_strided_slice %48 {offsets = [0, 13, 0], sizes = [2, 1, 64], strides = [1, 1, 1]} : vector<2x25x64xf32> to vector<2x1x64xf32>
    %89 = vector.shape_cast %88 : vector<2x1x64xf32> to vector<2x64xf32>
    %c0_45 = arith.constant 0 : index
    %c832 = arith.constant 832 : index
    %90 = vector.load %arg10[%c0_45, %c832] : memref<2x1600xf32, #tpu.memory_space<vmem>>, vector<2x64xf32>
    tpu.vector_store %arg10[%c0_45, %c832], %89 {strides = array<i32>} : memref<2x1600xf32, #tpu.memory_space<vmem>>, vector<2x64xf32>,
    %91 = vector.extract_strided_slice %48 {offsets = [0, 14, 0], sizes = [2, 1, 64], strides = [1, 1, 1]} : vector<2x25x64xf32> to vector<2x1x64xf32>
    %92 = vector.shape_cast %91 : vector<2x1x64xf32> to vector<2x64xf32>
    %c0_46 = arith.constant 0 : index
    %c896 = arith.constant 896 : index
    %93 = vector.load %arg10[%c0_46, %c896] : memref<2x1600xf32, #tpu.memory_space<vmem>>, vector<2x64xf32>
    tpu.vector_store %arg10[%c0_46, %c896], %92 {strides = array<i32>} : memref<2x1600xf32, #tpu.memory_space<vmem>>, vector<2x64xf32>,
    %94 = vector.extract_strided_slice %48 {offsets = [0, 15, 0], sizes = [2, 1, 64], strides = [1, 1, 1]} : vector<2x25x64xf32> to vector<2x1x64xf32>
    %95 = vector.shape_cast %94 : vector<2x1x64xf32> to vector<2x64xf32>
    %c0_47 = arith.constant 0 : index
    %c960 = arith.constant 960 : index
    %96 = vector.load %arg10[%c0_47, %c960] : memref<2x1600xf32, #tpu.memory_space<vmem>>, vector<2x64xf32>
    tpu.vector_store %arg10[%c0_47, %c960], %95 {strides = array<i32>} : memref<2x1600xf32, #tpu.memory_space<vmem>>, vector<2x64xf32>,
    %97 = vector.extract_strided_slice %48 {offsets = [0, 16, 0], sizes = [2, 1, 64], strides = [1, 1, 1]} : vector<2x25x64xf32> to vector<2x1x64xf32>
    %98 = vector.shape_cast %97 : vector<2x1x64xf32> to vector<2x64xf32>
    %c0_48 = arith.constant 0 : index
    %c1024 = arith.constant 1024 : index
    %99 = vector.load %arg10[%c0_48, %c1024] : memref<2x1600xf32, #tpu.memory_space<vmem>>, vector<2x64xf32>
    tpu.vector_store %arg10[%c0_48, %c1024], %98 {strides = array<i32>} : memref<2x1600xf32, #tpu.memory_space<vmem>>, vector<2x64xf32>,
    %100 = vector.extract_strided_slice %48 {offsets = [0, 17, 0], sizes = [2, 1, 64], strides = [1, 1, 1]} : vector<2x25x64xf32> to vector<2x1x64xf32>
    %101 = vector.shape_cast %100 : vector<2x1x64xf32> to vector<2x64xf32>
    %c0_49 = arith.constant 0 : index
    %c1088 = arith.constant 1088 : index
    %102 = vector.load %arg10[%c0_49, %c1088] : memref<2x1600xf32, #tpu.memory_space<vmem>>, vector<2x64xf32>
    tpu.vector_store %arg10[%c0_49, %c1088], %101 {strides = array<i32>} : memref<2x1600xf32, #tpu.memory_space<vmem>>, vector<2x64xf32>,
    %103 = vector.extract_strided_slice %48 {offsets = [0, 18, 0], sizes = [2, 1, 64], strides = [1, 1, 1]} : vector<2x25x64xf32> to vector<2x1x64xf32>
    %104 = vector.shape_cast %103 : vector<2x1x64xf32> to vector<2x64xf32>
    %c0_50 = arith.constant 0 : index
    %c1152 = arith.constant 1152 : index
    %105 = vector.load %arg10[%c0_50, %c1152] : memref<2x1600xf32, #tpu.memory_space<vmem>>, vector<2x64xf32>
    tpu.vector_store %arg10[%c0_50, %c1152], %104 {strides = array<i32>} : memref<2x1600xf32, #tpu.memory_space<vmem>>, vector<2x64xf32>,
    %106 = vector.extract_strided_slice %48 {offsets = [0, 19, 0], sizes = [2, 1, 64], strides = [1, 1, 1]} : vector<2x25x64xf32> to vector<2x1x64xf32>
    %107 = vector.shape_cast %106 : vector<2x1x64xf32> to vector<2x64xf32>
    %c0_51 = arith.constant 0 : index
    %c1216 = arith.constant 1216 : index
    %108 = vector.load %arg10[%c0_51, %c1216] : memref<2x1600xf32, #tpu.memory_space<vmem>>, vector<2x64xf32>
    tpu.vector_store %arg10[%c0_51, %c1216], %107 {strides = array<i32>} : memref<2x1600xf32, #tpu.memory_space<vmem>>, vector<2x64xf32>,
    %109 = vector.extract_strided_slice %48 {offsets = [0, 20, 0], sizes = [2, 1, 64], strides = [1, 1, 1]} : vector<2x25x64xf32> to vector<2x1x64xf32>
    %110 = vector.shape_cast %109 : vector<2x1x64xf32> to vector<2x64xf32>
    %c0_52 = arith.constant 0 : index
    %c1280 = arith.constant 1280 : index
    %111 = vector.load %arg10[%c0_52, %c1280] : memref<2x1600xf32, #tpu.memory_space<vmem>>, vector<2x64xf32>
    tpu.vector_store %arg10[%c0_52, %c1280], %110 {strides = array<i32>} : memref<2x1600xf32, #tpu.memory_space<vmem>>, vector<2x64xf32>,
    %112 = vector.extract_strided_slice %48 {offsets = [0, 21, 0], sizes = [2, 1, 64], strides = [1, 1, 1]} : vector<2x25x64xf32> to vector<2x1x64xf32>
    %113 = vector.shape_cast %112 : vector<2x1x64xf32> to vector<2x64xf32>
    %c0_53 = arith.constant 0 : index
    %c1344 = arith.constant 1344 : index
    %114 = vector.load %arg10[%c0_53, %c1344] : memref<2x1600xf32, #tpu.memory_space<vmem>>, vector<2x64xf32>
    tpu.vector_store %arg10[%c0_53, %c1344], %113 {strides = array<i32>} : memref<2x1600xf32, #tpu.memory_space<vmem>>, vector<2x64xf32>,
    %115 = vector.extract_strided_slice %48 {offsets = [0, 22, 0], sizes = [2, 1, 64], strides = [1, 1, 1]} : vector<2x25x64xf32> to vector<2x1x64xf32>
    %116 = vector.shape_cast %115 : vector<2x1x64xf32> to vector<2x64xf32>
    %c0_54 = arith.constant 0 : index
    %c1408 = arith.constant 1408 : index
    %117 = vector.load %arg10[%c0_54, %c1408] : memref<2x1600xf32, #tpu.memory_space<vmem>>, vector<2x64xf32>
    tpu.vector_store %arg10[%c0_54, %c1408], %116 {strides = array<i32>} : memref<2x1600xf32, #tpu.memory_space<vmem>>, vector<2x64xf32>,
    %118 = vector.extract_strided_slice %48 {offsets = [0, 23, 0], sizes = [2, 1, 64], strides = [1, 1, 1]} : vector<2x25x64xf32> to vector<2x1x64xf32>
    %119 = vector.shape_cast %118 : vector<2x1x64xf32> to vector<2x64xf32>
    %c0_55 = arith.constant 0 : index
    %c1472 = arith.constant 1472 : index
    %120 = vector.load %arg10[%c0_55, %c1472] : memref<2x1600xf32, #tpu.memory_space<vmem>>, vector<2x64xf32>
    tpu.vector_store %arg10[%c0_55, %c1472], %119 {strides = array<i32>} : memref<2x1600xf32, #tpu.memory_space<vmem>>, vector<2x64xf32>,
    %121 = vector.extract_strided_slice %48 {offsets = [0, 24, 0], sizes = [2, 1, 64], strides = [1, 1, 1]} : vector<2x25x64xf32> to vector<2x1x64xf32>
    %122 = vector.shape_cast %121 : vector<2x1x64xf32> to vector<2x64xf32>
    %c0_56 = arith.constant 0 : index
    %c1536 = arith.constant 1536 : index
    %123 = vector.load %arg10[%c0_56, %c1536] : memref<2x1600xf32, #tpu.memory_space<vmem>>, vector<2x64xf32>
    tpu.vector_store %arg10[%c0_56, %c1536], %122 {strides = array<i32>} : memref<2x1600xf32, #tpu.memory_space<vmem>>, vector<2x64xf32>,
    %c0_57 = arith.constant 0 : index
    %c0_58 = arith.constant 0 : index
    %124 = vector.load %arg10[%c0_57, %c0_58] : memref<2x1600xf32, #tpu.memory_space<vmem>>, vector<2x1600xf32>
    %125 = arith.truncf %124 : vector<2x1600xf32> to vector<2x1600xbf16>
    %c0_59 = arith.constant 0 : index
    %c0_60 = arith.constant 0 : index
    %126 = vector.load %arg6[%c0_59, %c0_60] : memref<1600x128xbf16, #tpu.memory_space<vmem>>, vector<1600x128xbf16>
    %cst_61 = arith.constant dense<0.000000e+00> : vector<2x128xf32>
    %127 = tpu.matmul %125, %126, %cst_61 {dimension_numbers = #tpu.dot_dimension_numbers<[1], [0], [0], [1], [0, 0, 1, 1], [], []>} : vector<2x1600xbf16>, vector<1600x128xbf16>, vector<2x128xf32> -> vector<2x128xf32>
    %c0_62 = arith.constant 0 : index
    %c0_63 = arith.constant 0 : index
    %128 = vector.load %arg7[%c0_62, %c0_63] : memref<1x128xf32, #tpu.memory_space<vmem>>, vector<1x128xf32>
    %129 = vector.broadcast %128 : vector<1x128xf32> to vector<2x128xf32>
    %130 = arith.addf %127, %129 : vector<2x128xf32>
    %cst_64 = arith.constant dense<0xFF800000> : vector<2xf32>
    %131 = vector.multi_reduction <maximumf>, %130, %cst_64 [1] : vector<2x128xf32> to vector<2xf32>
    %132 = vector.shape_cast %131 : vector<2xf32> to vector<2x1xf32>
    %133 = vector.broadcast %132 : vector<2x1xf32> to vector<2x128xf32>
    %134 = arith.subf %130, %133 : vector<2x128xf32>
    %135 = math.exp %134 : vector<2x128xf32>
    %cst_65 = arith.constant dense<0.000000e+00> : vector<2xf32>
    %136 = vector.multi_reduction <add>, %135, %cst_65 [1] : vector<2x128xf32> to vector<2xf32>
    %137 = vector.shape_cast %136 : vector<2xf32> to vector<2x1xf32>
    %138 = tpu.reciprocal %137 {approx = true} : vector<2x1xf32> -> vector<2x1xf32>
    %139 = vector.broadcast %138 : vector<2x1xf32> to vector<2x128xf32>
    %140 = arith.mulf %135, %139 : vector<2x128xf32>
    %c0_66 = arith.constant 0 : index
    %c0_67 = arith.constant 0 : index
    %141 = vector.load %arg8[%c0_66, %c0_67] : memref<2x128xf32, #tpu.memory_space<vmem>>, vector<2x128xf32>
    tpu.vector_store %arg8[%c0_66, %c0_67], %140 {strides = array<i32>} : memref<2x128xf32, #tpu.memory_space<vmem>>, vector<2x128xf32>,
    return
  }
  func.func @transform_0(%arg0: i32) -> (i32, i32, i32) {
    %c0_i32 = arith.constant 0 : i32
    %c0_i32_0 = arith.constant 0 : i32
    %c0_i32_1 = arith.constant 0 : i32
    return %arg0, %c0_i32, %c0_i32_0 : i32, i32, i32
  }
  func.func @transform_1(%arg0: i32) -> (i32, i32) {
    %c0_i32 = arith.constant 0 : i32
    %c0_i32_0 = arith.constant 0 : i32
    %c0_i32_1 = arith.constant 0 : i32
    return %c0_i32, %c0_i32_0 : i32, i32
  }
  func.func @transform_2(%arg0: i32) -> (i32, i32) {
    %c0_i32 = arith.constant 0 : i32
    %c0_i32_0 = arith.constant 0 : i32
    %c0_i32_1 = arith.constant 0 : i32
    return %c0_i32, %c0_i32_0 : i32, i32
  }
  func.func @transform_3(%arg0: i32) -> (i32, i32) {
    %c0_i32 = arith.constant 0 : i32
    %c0_i32_0 = arith.constant 0 : i32
    %c0_i32_1 = arith.constant 0 : i32
    return %c0_i32, %c0_i32_0 : i32, i32
  }
  func.func @transform_4(%arg0: i32) -> (i32, i32) {
    %c0_i32 = arith.constant 0 : i32
    %c0_i32_0 = arith.constant 0 : i32
    %c0_i32_1 = arith.constant 0 : i32
    return %c0_i32, %c0_i32_0 : i32, i32
  }
  func.func @transform_5(%arg0: i32) -> (i32, i32) {
    %c0_i32 = arith.constant 0 : i32
    %c0_i32_0 = arith.constant 0 : i32
    %c0_i32_1 = arith.constant 0 : i32
    return %c0_i32, %c0_i32_0 : i32, i32
  }
  func.func @transform_6(%arg0: i32) -> (i32, i32) {
    %c0_i32 = arith.constant 0 : i32
    %c0_i32_0 = arith.constant 0 : i32
    %c0_i32_1 = arith.constant 0 : i32
    return %c0_i32, %c0_i32_0 : i32, i32
  }
  func.func @transform_7(%arg0: i32) -> (i32, i32) {
    %c0_i32 = arith.constant 0 : i32
    %c0_i32_0 = arith.constant 0 : i32
    return %arg0, %c0_i32 : i32, i32
  }
}

</mosaic_0001>

<bundles_post_ra>
// kernel: tpu_custom_call.1
= control target key start
LH: loop header
LB: loop body
LE: loop exit
PB: predicated region body
PF: predicated region fallthrough
CT: control target
= control target key end

     0   :  { %12 = vsyncpa [#allocation5], 0  ;;  %s9689_s0 = inlined_call_operand.vmem [shape: bf16[2,196,36], index: 0, kind: input, shape index: {}]   ;;  %s9690_s1 = inlined_call_operand.vmem [shape: bf16[36,32], index: 1, kind: input, shape index: {}]   ;;  %s9691_s2 = inlined_call_operand.vmem [shape: f32[1,32], index: 2, kind: input, shape index: {}]   ;;  %s9692_s3 = inlined_call_operand.vmem [shape: bf16[288,64], index: 3, kind: input, shape index: {}]   ;;  %s9693_s4 = inlined_call_operand.vmem [shape: f32[1,64], index: 4, kind: input, shape index: {}]   ;;  %s9694_s5 = inlined_call_operand.hbm [shape: bf16[1600,128], index: 5, kind: input, shape index: {}]   ;;  %s9695_s6 = inlined_call_operand.vmem [shape: f32[1,128], index: 6, kind: input, shape index: {}]   ;;  %s9696_s7 = inlined_call_operand.hbm [shape: f32[2,128], index: 7, kind: output, shape index: {}]  }
   0x1   :  { %13 = vsyncpa [#allocation6], 0  ;;  %s6990_s24 = smov [#allocation4]   ;;  %s6942_s28 = scalar_lea.hbm %s9694_s5, 12800 }
   0x2   :  { %s29_s25 = sshll.u32 %s6990_s24, 4  ;;  %p6943_p0 = scmp.ne.s32.totalorder %s9694_s5, %s6942_s28  ;;  %s30_s25 = int_to_ptr.vmem [resolvable:$true] %s29_s25 }
   0x3   :  { %p6946_p1 = scmp.lt.u32.totalorder %s6942_s28, %s9694_s5 }
   0x5   :  { %p6948_p2 = pnand %p6946_p1, %p6943_p0 }
   0x7   :  { %6951 = shalt.err (!%p6948_p2)
}
   0x8   :  { %s6952_s10 = scalar_lea.vmem %s30_s25, 12800  ;;  %p6957_p4 = scmp.lt.s32.totalorder %s30_s25, %s30_s25 }
   0x9   :  { %p6953_p3 = scmp.ne.s32.totalorder %s30_s25, %s6952_s10  ;;  %p6958_p5 = scmp.lt.s32.totalorder %s6952_s10, %s6952_s10 }
   0xb   :  { %p6959_p6 = por %p6958_p5, %p6957_p4 }
   0xd   :  { %p6960_p7 = pnand %p6959_p6, %p6953_p3 }
   0xf   :  { %6963 = shalt.err (!%p6960_p7)
}
  0x10   :  { %s6991_s11 = smov 64   ;;  %s6992_s12 = smov 4  }
  0x11   :  { %35 = dma.hbm_to_vmem [thread:$0]  %s9694_s5, 12800, %s30_s25, [#allocation5], %s6991_s11, %s6991_s11, %s6992_s12  }
  0x12   :  { %6986 = dma.done.wait [#allocation5], 12800  }
  0x13   :  { %6987 = vsyncadd [#allocation5], 4294954496  ;;  %v9697_v0 = vmov 0.0   ;;  %vm6994_vm0 = vmmov 0   ;;  %v6995_v1 = vmov 1983009808   ;;  %v557_v3 = vlaneseq }
  0x14   :  { %6671 = vmatprep.subr.bf16.mxu0 %v9697_v0  ;;  %6677 = vmatprep.mubr.msk.bf16.mxu0 %vm6994_vm0, %v9697_v0  ;;  %v555_v2 = vunpack.c.l.s4 %v6995_v1  ;;  %v6812_v4 = vld [vmem:[%s9690_s1] sm:$0xff]   ;;  %v6813_v7 = vld [vmem:[%s9690_s1 + $0x8] sm:$0xff]   ;;  %v6814_v8 = vld [vmem:[%s9690_s1 + $0x10] ss:$0 sps:$4 sm:$0x33]   ;;  %vm1059_vm1 = vcmask 1041408  }
  0x15   :  { %v7061_v6 = vshrl.u32 %v557_v3, 7  ;;  %6672 = vmatpush3.bf16.msra.mxu0 %v6812_v4  ;;  %v6249_v9 = vld.sshfl [vmem:[%s9689_s0] sm:$0x33 pattern:$0x76325410]  ;;  %v1061_v18 = vsel %vm1059_vm1, %v6814_v8, 0 }
  0x16   :  { %v556_v5 = vunpack.c.0.s8 %v555_v2  ;;  %6673 = vmatprep.subr.bf16.mxu0 %v9697_v0  ;;  %v6250_v10 = vld.sshfl [vmem:[%s9689_s0 + $0x4] sm:$0x33 pattern:$0x76325410]  ;;  %v149_v11 = vcombine.high %v6249_v9, %v6249_v9  ;;  %vm983_vm2 = vcmask 293888   ;;  %vm2422_vm3 = vcmask 254976  }
  0x17   :  { %9737 = vst [vmem:[#allocation10_spill] sm:$0xff] %v7061_v6  ;;  %v157_v13 = vcombine.high %v6250_v10, %v6250_v10  ;;  %v6251_v14 = vld.sshfl [vmem:[%s9689_s0 + $0x8] sm:$0x33 pattern:$0x76325410]  ;;  %vm3453_vm4 = vcmask 1041409  }
  0x18   :  { %v7077_v12 = vsub.s32 %v556_v5, %v7061_v6  ;;  %v552_v15 = vcombine.low %v6249_v9, %v149_v11  ;;  %v6252_v16 = vld.sshfl [vmem:[%s9689_s0 + $0xc] sm:$0x33 pattern:$0x76325410]  ;;  %v165_v17 = vcombine.high %v6251_v14, %v6251_v14  ;;  %vm3455_vm5 = vcmask 1042434   ;;  %s6997_s1 = smov 96  }
  0x19   :  { %6674 = vmatpush3.bf16.msra.mxu0 %v6813_v7  ;;  %v553_v19 = vcombine.low %v6250_v10, %v157_v13  ;;  %v173_v20 = vcombine.high %v6252_v16, %v6252_v16  ;;  %v6253_v25 = vld.sshfl [vmem:[%s9689_s0 + $0x10] sm:$0x33 pattern:$0x76325410]  ;;  %vm3457_vm6 = vcmask 1043459   ;;  %vm3459_vm7 = vcmask 1044484  }
  0x1a   :  { %9738 = vst [vmem:[#allocation11_spill] sm:$0xff] %v7077_v12  ;;  %6675 = vmatprep.subr.bf16.mxu0 %v9697_v0  ;;  %v560_v21 = vrot.slane %v552_v15, %v7077_v12  ;;  %v569_v23 = vcombine.low %v6251_v14, %v165_v17  ;;  %v6254_v26 = vld.sshfl [vmem:[%s9689_s0 + $0x14] sm:$0x33 pattern:$0x76325410]  ;;  %v181_v30 = vcombine.high %v6253_v25, %v6253_v25  ;;  %vm3461_vm8 = vcmask 1045509  }
  0x1b   :  { %v567_v22 = vrot.slane %v553_v19, %v7077_v12  ;;  %v570_v24 = vcombine.low %v6252_v16, %v173_v20  ;;  %v189_v31 = vcombine.high %v6254_v26, %v6254_v26  ;;  %v6255_v35 = vld.sshfl [vmem:[%s9689_s0 + $0x18] sm:$0x33 pattern:$0x76325410]  ;;  %vm3463_vm9 = vcmask 1046534  }
  0x1c   :  { %v577_v28 = vrot.slane %v569_v23, %v7077_v12  ;;  %v586_v33 = vcombine.low %v6253_v25, %v181_v30  ;;  %v6256_v36 = vld.sshfl [vmem:[%s9689_s0 + $0x1c] sm:$0x33 pattern:$0x76325410]  ;;  %v197_v39 = vcombine.high %v6255_v35, %v6255_v35  ;;  %vm3465_vm10 = vcmask 1047559  }
  0x1d   :  { %6676 = vmatpush3.bf16.msra.mxu0 %v1061_v18  ;;  %v568_v27 = vcombine.low %v560_v21, %v567_v22  ;;  %v584_v29 = vrot.slane %v570_v24, %v7077_v12  ;;  %v587_v34 = vcombine.low %v6254_v26, %v189_v31  ;;  %v205_v40 = vcombine.high %v6256_v36, %v6256_v36  ;;  %v6257_v44 = vld.sshfl [vmem:[%s9689_s0 + $0x20] sm:$0x33 pattern:$0x76325410] }
  0x1e   :  { %v594_v37 = vrot.slane %v586_v33, %v7077_v12  ;;  %v603_v42 = vcombine.low %v6255_v35, %v197_v39  ;;  %v6258_v45 = vld.sshfl [vmem:[%s9689_s0 + $0x24] sm:$0x33 pattern:$0x76325410]  ;;  %v213_v48 = vcombine.high %v6257_v44, %v6257_v44  ;;  %vm3510_vm11 = vcmask 261120  }
  0x1f   :  { %v585_v32 = vcombine.low %v577_v28, %v584_v29  ;;  %v601_v38 = vrot.slane %v587_v34, %v7077_v12  ;;  %v604_v43 = vcombine.low %v6256_v36, %v205_v40  ;;  %v221_v49 = vcombine.high %v6258_v45, %v6258_v45  ;;  %v6259_v53 = vld.sshfl [vmem:[%s9689_s0 + $0x28] sm:$0x33 pattern:$0x76325410] }
  0x20   :  { %6678 = vmatmul.mubr.msk.bf16.vlgmr.msra.gmra.mrb[0].mxu0 %vm983_vm2, %v568_v27  ;;  %v611_v46 = vrot.slane %v603_v42, %v7077_v12  ;;  %v620_v51 = vcombine.low %v6257_v44, %v213_v48  ;;  %v6260_v54 = vld.sshfl [vmem:[%s9689_s0 + $0x2c] sm:$0x33 pattern:$0x76325410]  ;;  %v229_v57 = vcombine.high %v6259_v53, %v6259_v53  ;;  %vm3592_vm12 = vcmask 523520  }
  0x21   :  { %6681 = vmatprep.mubr.msk.bf16.mxu0 %vm6994_vm0, %v9697_v0  ;;  %v602_v41 = vcombine.low %v594_v37, %v601_v38  ;;  %v618_v47 = vrot.slane %v604_v43, %v7077_v12  ;;  %v621_v52 = vcombine.low %v6258_v45, %v221_v49  ;;  %v237_v58 = vcombine.high %v6260_v54, %v6260_v54  ;;  %v6261_v62 = vld.sshfl [vmem:[%s9689_s0 + $0x30] sm:$0x33 pattern:$0x76325410] }
  0x22   :  { %v628_v55 = vrot.slane %v620_v51, %v7077_v12  ;;  %v637_v60 = vcombine.low %v6259_v53, %v229_v57  ;;  %v6262_v63 = vld.sshfl [vmem:[%s9689_s0 + $0x34] sm:$0x33 pattern:$0x76325410]  ;;  %v245_v3 = vcombine.high %v6261_v62, %v6261_v62  ;;  %vm3675_vm13 = vcmask 785920  }
  0x23   :  { %v619_v50 = vcombine.low %v611_v46, %v618_v47  ;;  %v635_v56 = vrot.slane %v621_v52, %v7077_v12  ;;  %v638_v61 = vcombine.low %v6260_v54, %v237_v58  ;;  %v253_v4 = vcombine.high %v6262_v63, %v6262_v63  ;;  %v6263_v5 = vld.sshfl [vmem:[%s9689_s0 + $0x38] sm:$0x33 pattern:$0x76325410] }
  0x24   :  { %v645_v1 = vrot.slane %v637_v60, %v7077_v12  ;;  %v6264_v7 = vld.sshfl [vmem:[%s9689_s0 + $0x3c] sm:$0x33 pattern:$0x76325410]  ;;  %v654_v9 = vcombine.low %v6261_v62, %v245_v3  ;;  %v261_v14 = vcombine.high %v6263_v5, %v6263_v5  ;;  %vm3758_vm14 = vcmask 1048320  }
  0x25   :  { %v636_v59 = vcombine.low %v628_v55, %v635_v56  ;;  %v652_v2 = vrot.slane %v638_v61, %v7077_v12  ;;  %v655_v10 = vcombine.low %v6262_v63, %v253_v4  ;;  %v269_v15 = vcombine.high %v6264_v7, %v6264_v7  ;;  %v6265_v16 = vld.sshfl [vmem:[%s9689_s0 + $0x40] sm:$0x33 pattern:$0x76325410] }
  0x26   :  { %v662_v11 = vrot.slane %v654_v9, %v7077_v12  ;;  %v6266_v17 = vld.sshfl [vmem:[%s9689_s0 + $0x44] sm:$0x33 pattern:$0x76325410]  ;;  %v671_v19 = vcombine.low %v6263_v5, %v261_v14  ;;  %v277_v23 = vcombine.high %v6265_v16, %v6265_v16  ;;  %vm3599_vm15 = vcmask 517376  }
  0x27   :  { %v653_v8 = vcombine.low %v645_v1, %v652_v2  ;;  %v669_v13 = vrot.slane %v655_v10, %v7077_v12  ;;  %v672_v20 = vcombine.low %v6264_v7, %v269_v15  ;;  %v285_v24 = vcombine.high %v6266_v17, %v6266_v17  ;;  %v6267_v25 = vld.sshfl [vmem:[%s9689_s0 + $0x48] sm:$0x33 pattern:$0x76325410] }
  0x28   :  { %6682 = vmatmul.mubr.msk.bf16.gmra.mrb[4].mxu0 %vm983_vm2, %v585_v32  ;;  %v679_v21 = vrot.slane %v671_v19, %v7077_v12  ;;  %v6268_v26 = vld.sshfl [vmem:[%s9689_s0 + $0x4c] sm:$0x33 pattern:$0x76325410]  ;;  %v688_v28 = vcombine.low %v6265_v16, %v277_v23  ;;  %v293_v32 = vcombine.high %v6267_v25, %v6267_v25 }
  0x29   :  { %6685 = vmatprep.mubr.msk.bf16.mxu0 %vm6994_vm0, %v9697_v0  ;;  %v670_v18 = vcombine.low %v662_v11, %v669_v13  ;;  %v686_v22 = vrot.slane %v672_v20, %v7077_v12  ;;  %v689_v29 = vcombine.low %v6266_v17, %v285_v24  ;;  %v301_v33 = vcombine.high %v6268_v26, %v6268_v26  ;;  %v6269_v34 = vld.sshfl [vmem:[%s9689_s0 + $0x50] sm:$0x33 pattern:$0x76325410] }
  0x2a   :  { %v696_v30 = vrot.slane %v688_v28, %v7077_v12  ;;  %v6270_v35 = vld.sshfl [vmem:[%s9689_s0 + $0x54] sm:$0x33 pattern:$0x76325410]  ;;  %v705_v37 = vcombine.low %v6267_v25, %v293_v32 }
  0x2b   :  { %v687_v27 = vcombine.low %v679_v21, %v686_v22  ;;  %v703_v31 = vrot.slane %v689_v29, %v7077_v12  ;;  %v706_v38 = vcombine.low %v6268_v26, %v301_v33  ;;  %v317_v42 = vcombine.high %v6270_v35, %v6270_v35  ;;  %v6271_v43 = vld.sshfl [vmem:[%s9689_s0 + $0x58] sm:$0x33 pattern:$0x76325410] }
  0x2c   :  { %v713_v39 = vrot.slane %v705_v37, %v7077_v12  ;;  %v6272_v44 = vld.sshfl [vmem:[%s9689_s0 + $0x5c] sm:$0x33 pattern:$0x76325410] }
  0x2d   :  { %v704_v36 = vcombine.low %v696_v30, %v703_v31  ;;  %v720_v40 = vrot.slane %v706_v38, %v7077_v12  ;;  %v723_v47 = vcombine.low %v6270_v35, %v317_v42  ;;  %v333_v51 = vcombine.high %v6272_v44, %v6272_v44  ;;  %v6274_v52 = vld.sshfl [vmem:[%s9689_s0 + $0x64] sm:$0x33 pattern:$0x76325410] }
  0x2e   :  { %v6273_v56 = vld.sshfl [vmem:[%s9689_s0 + $0x60] sm:$0x3 pattern:$0x76325410]  ;;  %v348_v60 = vcombine.high %v6274_v52, %v6274_v52 }
  0x2f   :  { %v721_v45 = vcombine.low %v713_v39, %v720_v40  ;;  %v737_v49 = vrot.slane %v723_v47, %v7077_v12  ;;  %v740_v55 = vcombine.low %v6272_v44, %v333_v51  ;;  %v6275_v57 = vld.sshfl [vmem:[%s9689_s0 + $0x68] sm:$0x33 pattern:$0x76325410]  ;;  %v756_v63 = vcombine.low %v6273_v56, %v6274_v52 }
  0x30   :  { %6686 = vmatmul.mubr.msk.bf16.gmra.mrb[8].mxu0 %vm983_vm2, %v602_v41  ;;  %v309_v41 = vcombine.high %v6269_v34, %v6269_v34  ;;  %v6276_v61 = vld.sshfl [vmem:[%s9689_s0 + $0x6c] sm:$0x33 pattern:$0x76325410]  ;;  %v757_v1 = vcombine.low %v348_v60, %v6275_v57  ;;  %v356_v5 = vcombine.high %v6275_v57, %v6275_v57 }
  0x31   :  { %6689 = vmatprep.mubr.msk.bf16.mxu0 %vm6994_vm0, %v9697_v0  ;;  %v6277_v2 = vld.sshfl [vmem:[%s9689_s0 + $0x70] sm:$0x33 pattern:$0x76325410]  ;;  %v764_v3 = vrot.slane %v756_v63, %v7077_v12  ;;  %v364_v7 = vcombine.high %v6276_v61, %v6276_v61 }
  0x32   :  { %v722_v46 = vcombine.low %v6269_v34, %v309_v41  ;;  %v771_v4 = vrot.slane %v757_v1, %v7077_v12  ;;  %v773_v10 = vcombine.low %v356_v5, %v6276_v61  ;;  %v6279_v13 = vld.sshfl [vmem:[%s9689_s0 + $0x78] sm:$0x33 pattern:$0x76325410]  ;;  %v372_v16 = vcombine.high %v6277_v2, %v6277_v2 }
  0x33   :  { %v774_v11 = vcombine.low %v364_v7, %v6277_v2  ;;  %v388_v24 = vcombine.high %v6279_v13, %v6279_v13  ;;  %v6281_v26 = vld.sshfl [vmem:[%s9689_s0 + $0x80] sm:$0x33 pattern:$0x76325410] }
  0x34   :  { %v730_v48 = vrot.slane %v722_v46, %v7077_v12  ;;  %v772_v9 = vcombine.low %v764_v3, %v771_v4  ;;  %v781_v14 = vrot.slane %v773_v10, %v7077_v12  ;;  %v6282_v30 = vld.sshfl [vmem:[%s9689_s0 + $0x84] sm:$0x33 pattern:$0x76325410]  ;;  %v404_v33 = vcombine.high %v6281_v26, %v6281_v26 }
  0x35   :  { %v788_v15 = vrot.slane %v774_v11, %v7077_v12  ;;  %v412_v34 = vcombine.high %v6282_v30, %v6282_v30  ;;  %v6283_v35 = vld.sshfl [vmem:[%s9689_s0 + $0x88] sm:$0x33 pattern:$0x76325410] }
  0x36   :  { %v738_v53 = vcombine.low %v730_v48, %v737_v49  ;;  %v824_v37 = vcombine.low %v404_v33, %v6282_v30  ;;  %v6284_v39 = vld.sshfl [vmem:[%s9689_s0 + $0x8c] sm:$0x33 pattern:$0x76325410]  ;;  %v420_v42 = vcombine.high %v6283_v35, %v6283_v35 }
  0x37   :  { %v789_v19 = vcombine.low %v781_v14, %v788_v15  ;;  %v825_v38 = vcombine.low %v412_v34, %v6283_v35  ;;  %v6285_v44 = vld.sshfl [vmem:[%s9689_s0 + $0x90] sm:$0x33 pattern:$0x76325410] }
  0x38   :  { %6690 = vmatmul.mubr.msk.bf16.gmra.mrb[12].mxu0 %vm983_vm2, %v619_v50  ;;  %v325_v50 = vcombine.high %v6271_v43, %v6271_v43  ;;  %v832_v40 = vrot.slane %v824_v37, %v7077_v12  ;;  %v841_v46 = vcombine.low %v420_v42, %v6284_v39  ;;  %v6286_v48 = vld.sshfl [vmem:[%s9689_s0 + $0x94] sm:$0x33 pattern:$0x76325410]  ;;  %v436_v51 = vcombine.high %v6285_v44, %v6285_v44 }
  0x39   :  { %6693 = vmatprep.mubr.msk.bf16.mxu0 %vm6994_vm0, %v9697_v0  ;;  %v839_v41 = vrot.slane %v825_v38, %v7077_v12  ;;  %v444_v52 = vcombine.high %v6286_v48, %v6286_v48  ;;  %v6288_v57 = vld.sshfl [vmem:[%s9689_s0 + $0x9c] sm:$0x33 pattern:$0x76325410] }
  0x3a   :  { %v739_v54 = vcombine.low %v6271_v43, %v325_v50  ;;  %v428_v43 = vcombine.high %v6284_v39, %v6284_v39  ;;  %v849_v49 = vrot.slane %v841_v46, %v7077_v12  ;;  %v460_v61 = vcombine.high %v6288_v57, %v6288_v57  ;;  %v6290_v3 = vld.sshfl [vmem:[%s9689_s0 + $0xa4] sm:$0x33 pattern:$0x76325410] }
  0x3b   :  { %v6292_v14 = vld.sshfl [vmem:[%s9689_s0 + $0xac] sm:$0x33 pattern:$0x76325410] }
  0x3c   :  { %v747_v58 = vrot.slane %v739_v54, %v7077_v12  ;;  %v842_v47 = vcombine.low %v428_v43, %v6285_v44  ;;  %v6297_v37 = vld.sshfl [vmem:[%s9689_s0 + $0xc0] sm:$0x33 pattern:$0x76325410] }
  0x3d   :  { %v532_v44 = vcombine.high %v6297_v37, %v6297_v37 }
  0x3e   :  { %v856_v50 = vrot.slane %v842_v47, %v7077_v12 }
  0x40   :  { %6694 = vmatmul.mubr.msk.bf16.gmra.mrb[16].mxu0 %vm983_vm2, %v636_v59  ;;  %v754_v59 = vrot.slane %v740_v55, %v7077_v12  ;;  %v857_v54 = vcombine.low %v849_v49, %v856_v50  ;;  %v858_v55 = vcombine.low %v436_v51, %v6286_v48  ;;  %v7350_v48 = vld [vmem:[%s9691_s2] ss:$0 sm:$0xff] }
  0x41   :  { %6697 = vmatprep.mubr.msk.bf16.mxu0 %vm6994_vm0, %v9697_v0 }
  0x42   :  { %v755_v62 = vcombine.low %v747_v58, %v754_v59  ;;  %v866_v58 = vrot.slane %v858_v55, %v7077_v12 }
  0x48   :  { %6698 = vmatmul.mubr.msk.bf16.gmra.mrb[20].mxu0 %vm983_vm2, %v653_v8  ;;  %v6278_v8 = vld.sshfl [vmem:[%s9689_s0 + $0x74] sm:$0x33 pattern:$0x76325410] }
  0x49   :  { %6701 = vmatprep.mubr.msk.bf16.mxu0 %vm6994_vm0, %v9697_v0  ;;  %v380_v17 = vcombine.high %v6278_v8, %v6278_v8  ;;  %v790_v20 = vcombine.low %v372_v16, %v6278_v8  ;;  %v476_v8 = vcombine.high %v6290_v3, %v6290_v3 }
  0x4b   :  { %v791_v21 = vcombine.low %v380_v17, %v6279_v13  ;;  %v798_v22 = vrot.slane %v790_v20, %v7077_v12 }
  0x4d   :  { %v805_v23 = vrot.slane %v791_v21, %v7077_v12 }
  0x50   :  { %6702 = vmatmul.mubr.msk.bf16.gmra.mrb[24].mxu0 %vm983_vm2, %v670_v18  ;;  %v6280_v18 = vld.sshfl [vmem:[%s9689_s0 + $0x7c] sm:$0x33 pattern:$0x76325410] }
  0x51   :  { %6705 = vmatprep.mubr.msk.bf16.mxu0 %vm6994_vm0, %v9697_v0  ;;  %v396_v25 = vcombine.high %v6280_v18, %v6280_v18  ;;  %v807_v28 = vcombine.low %v388_v24, %v6280_v18  ;;  %v492_v18 = vcombine.high %v6292_v14, %v6292_v14 }
  0x53   :  { %v808_v29 = vcombine.low %v396_v25, %v6281_v26  ;;  %v815_v31 = vrot.slane %v807_v28, %v7077_v12  ;;  %v6295_v28 = vld.sshfl [vmem:[%s9689_s0 + $0xb8] sm:$0x33 pattern:$0x76325410] }
  0x54   :  { %v516_v35 = vcombine.high %v6295_v28, %v6295_v28 }
  0x55   :  { %v822_v32 = vrot.slane %v808_v29, %v7077_v12 }
  0x58   :  { %6706 = vmatmul.mubr.msk.bf16.gmra.mrb[28].mxu0 %vm983_vm2, %v687_v27  ;;  %v806_v27 = vcombine.low %v798_v22, %v805_v23  ;;  %v6294_v23 = vld.sshfl [vmem:[%s9689_s0 + $0xb4] sm:$0x33 pattern:$0x76325410] }
  0x59   :  { %6709 = vmatprep.mubr.msk.bf16.mxu0 %vm6994_vm0, %v9697_v0 }
  0x60   :  { %6710 = vmatmul.mubr.msk.bf16.gmra.mrb[32].mxu0 %vm983_vm2, %v704_v36  ;;  %v823_v36 = vcombine.low %v815_v31, %v822_v32  ;;  %v6296_v32 = vld.sshfl [vmem:[%s9689_s0 + $0xbc] sm:$0x33 pattern:$0x76325410] }
  0x61   :  { %6713 = vmatprep.mubr.msk.bf16.mxu0 %vm6994_vm0, %v9697_v0  ;;  %v943_v39 = vcombine.low %v516_v35, %v6296_v32 }
  0x68   :  { %6714 = vmatmul.mubr.msk.bf16.gmra.mrb[36].mxu0 %vm983_vm2, %v721_v45  ;;  %v840_v45 = vcombine.low %v832_v40, %v839_v41  ;;  %v951_v41 = vrot.slane %v943_v39, %v7077_v12 }
  0x69   :  { %6717 = vmatprep.mubr.msk.bf16.mxu0 %vm6994_vm0, %v9697_v0 }
  0x70   :  { %6718 = vmatmul.mubr.msk.bf16.gmra.mrb[40].mxu0 %vm983_vm2, %v738_v53  ;;  %v6287_v53 = vld.sshfl [vmem:[%s9689_s0 + $0x98] sm:$0x33 pattern:$0x76325410] }
  0x71   :  { %6721 = vmatprep.mubr.msk.bf16.mxu0 %vm6994_vm0, %v9697_v0  ;;  %v859_v56 = vcombine.low %v444_v52, %v6287_v53  ;;  %v452_v60 = vcombine.high %v6287_v53, %v6287_v53 }
  0x73   :  { %v873_v59 = vrot.slane %v859_v56, %v7077_v12  ;;  %v875_v1 = vcombine.low %v452_v60, %v6288_v57 }
  0x75   :  { %v874_v63 = vcombine.low %v866_v58, %v873_v59  ;;  %v883_v4 = vrot.slane %v875_v1, %v7077_v12 }
  0x78   :  { %6722 = vmatmul.mubr.msk.bf16.gmra.mrb[44].mxu0 %vm983_vm2, %v755_v62  ;;  %v6289_v62 = vld.sshfl [vmem:[%s9689_s0 + $0xa0] sm:$0x33 pattern:$0x76325410] }
  0x79   :  { %6725 = vmatprep.mubr.msk.bf16.mxu0 %vm6994_vm0, %v9697_v0  ;;  %v876_v2 = vcombine.low %v460_v61, %v6289_v62  ;;  %v468_v7 = vcombine.high %v6289_v62, %v6289_v62 }
  0x7b   :  { %v890_v5 = vrot.slane %v876_v2, %v7077_v12  ;;  %v892_v11 = vcombine.low %v468_v7, %v6290_v3 }
  0x7d   :  { %v891_v10 = vcombine.low %v883_v4, %v890_v5  ;;  %v900_v15 = vrot.slane %v892_v11, %v7077_v12 }
  0x80   :  { %6726 = vmatmul.mubr.msk.bf16.gmra.mrb[48].mxu0 %vm983_vm2, %v772_v9  ;;  %v6291_v9 = vld.sshfl [vmem:[%s9689_s0 + $0xa8] sm:$0x33 pattern:$0x76325410] }
  0x81   :  { %6729 = vmatprep.mubr.msk.bf16.mxu0 %vm6994_vm0, %v9697_v0  ;;  %v893_v13 = vcombine.low %v476_v8, %v6291_v9  ;;  %v484_v17 = vcombine.high %v6291_v9, %v6291_v9 }
  0x83   :  { %v907_v16 = vrot.slane %v893_v13, %v7077_v12  ;;  %v909_v21 = vcombine.low %v484_v17, %v6292_v14 }
  0x85   :  { %v908_v20 = vcombine.low %v900_v15, %v907_v16  ;;  %v917_v24 = vrot.slane %v909_v21, %v7077_v12 }
  0x88   :  { %6730 = vmatmul.mubr.msk.bf16.gmra.mrb[52].mxu0 %vm983_vm2, %v789_v19  ;;  %v6293_v19 = vld.sshfl [vmem:[%s9689_s0 + $0xb0] sm:$0x33 pattern:$0x76325410] }
  0x89   :  { %6733 = vmatprep.mubr.msk.bf16.mxu0 %vm6994_vm0, %v9697_v0  ;;  %v910_v22 = vcombine.low %v492_v18, %v6293_v19  ;;  %v500_v26 = vcombine.high %v6293_v19, %v6293_v19 }
  0x8b   :  { %v924_v25 = vrot.slane %v910_v22, %v7077_v12  ;;  %v926_v30 = vcombine.low %v500_v26, %v6294_v23 }
  0x8d   :  { %v925_v29 = vcombine.low %v917_v24, %v924_v25  ;;  %v934_v33 = vrot.slane %v926_v30, %v7077_v12 }
  0x90   :  { %6734 = vmatmul.mubr.msk.bf16.gmra.mrb[56].mxu0 %vm983_vm2, %v806_v27  ;;  %v508_v27 = vcombine.high %v6294_v23, %v6294_v23 }
  0x91   :  { %6737 = vmatprep.mubr.msk.bf16.mxu0 %vm6994_vm0, %v9697_v0 }
  0x92   :  { %v927_v31 = vcombine.low %v508_v27, %v6295_v28 }
  0x94   :  { %v941_v34 = vrot.slane %v927_v31, %v7077_v12 }
  0x96   :  { %v942_v38 = vcombine.low %v934_v33, %v941_v34 }
  0x98   :  { %6738 = vmatmul.mubr.msk.bf16.gmra.mrb[60].mxu0 %vm983_vm2, %v823_v36  ;;  %v524_v36 = vcombine.high %v6296_v32, %v6296_v32 }
  0x99   :  { %6741 = vmatprep.mubr.msk.bf16.mxu0 %vm6994_vm0, %v9697_v0 }
  0x9a   :  { %v944_v40 = vcombine.low %v524_v36, %v6297_v37 }
  0x9c   :  { %v958_v42 = vrot.slane %v944_v40, %v7077_v12 }
  0x9e   :  { %v959_v43 = vcombine.low %v951_v41, %v958_v42 }
  0xa0   :  { %6742 = vmatmul.mubr.msk.bf16.gmra.mrb[64].mxu0 %vm983_vm2, %v840_v45  ;;  %v6298_v45 = vld.sshfl [vmem:[%s9689_s0 + $0xc4] sm:$0x3 pattern:$0x76325410]  ;;  %s6996_s0 = smov 32  }
  0xa1   :  { %6745 = vmatprep.mubr.msk.bf16.mxu0 %vm6994_vm0, %v9697_v0  ;;  %v960_v46 = vcombine.low %v532_v44, %v6298_v45 }
  0xa3   :  { %v967_v47 = vrot.slane %v960_v46, %v7077_v12 }
  0xa8   :  { %6746 = vmatmul.mubr.msk.bf16.gmra.mrb[68].mxu0 %vm983_vm2, %v857_v54 }
  0xa9   :  { %6749 = vmatprep.mubr.msk.bf16.mxu0 %vm6994_vm0, %v9697_v0 }
  0xb0   :  { %6750 = vmatmul.mubr.msk.bf16.gmra.mrb[72].mxu0 %vm983_vm2, %v874_v63 }
  0xb1   :  { %6753 = vmatprep.mubr.msk.bf16.mxu0 %vm6994_vm0, %v9697_v0 }
  0xb8   :  { %6754 = vmatmul.mubr.msk.bf16.gmra.mrb[76].mxu0 %vm983_vm2, %v891_v10 }
  0xb9   :  { %6757 = vmatprep.mubr.msk.bf16.mxu0 %vm6994_vm0, %v9697_v0 }
  0xc0   :  { %6758 = vmatmul.mubr.msk.bf16.gmra.mrb[80].mxu0 %vm983_vm2, %v908_v20 }
  0xc1   :  { %6761 = vmatprep.mubr.msk.bf16.mxu0 %vm6994_vm0, %v9697_v0 }
  0xc8   :  { %6762 = vmatmul.mubr.msk.bf16.gmra.mrb[84].mxu0 %vm983_vm2, %v925_v29 }
  0xc9   :  { %6765 = vmatprep.mubr.msk.bf16.mxu0 %vm6994_vm0, %v9697_v0 }
  0xd0   :  { %6766 = vmatmul.mubr.msk.bf16.gmra.mrb[88].mxu0 %vm983_vm2, %v942_v38 }
  0xd1   :  { %6769 = vmatprep.mubr.msk.bf16.mxu0 %vm6994_vm0, %v9697_v0 }
  0xd8   :  { %6770 = vmatmul.mubr.msk.bf16.gmra.mrb[92].mxu0 %vm983_vm2, %v959_v43 }
  0xd9   :  { %6773 = vmatprep.mubr.msk.bf16.mxu0 %vm6994_vm0, %v9697_v0 }
  0xe0   :  { %6774 = vmatmul.mubr.msk.bf16.gmra.mrb[96].mxu0 %vm983_vm2, %v967_v47  ;;  %vm3682_vm2 = vcmask 779776  }
  0xf3   :  { %v1097_v49 = vpop.f32.mrb[0].mxu0 }
  0xf4   :  { %v1098_v50 = vadd.f32 %v7350_v48, %v1097_v49  ;;  %v6679_v51 = vpop.f32.mrb[1].mxu0 }
  0xf5   :  { %v1100_v52 = vpop.f32.mrb[2].mxu0 }
  0xf6   :  { %v1295_v53 = vmax.f32 %v1098_v50, 0.0  ;;  %v1101_v54 = vadd.f32 %v7350_v48, %v1100_v52  ;;  %v6680_v55 = vpop.f32.mrb[3].mxu0 }
  0xf8   :  { %v1393_v56 = vcombine.high %v1295_v53, %v1295_v53  ;;  %v1400_v57 = vrot.slane %v1295_v53, %v7077_v12  ;;  %v1296_v58 = vmax.f32 %v1101_v54, 0.0 }
  0xfa   :  { %v1407_v59 = vrot.slane %v1393_v56, %v7077_v12  ;;  %v1410_v60 = vcombine.high %v1296_v58, %v1296_v58  ;;  %v1417_v61 = vrot.slane %v1296_v58, %v7077_v12  ;;  %v1408_v63 = vcombine.high %v1400_v57, %v1400_v57 }
  0xfb   :  { %v1105_v62 = vpop.f32.mrb[4].mxu0  ;;  %v2423_v11 = vsel %vm2422_vm3, %v1400_v57, -inf }
  0xfc   :  { %v1424_v1 = vrot.slane %v1410_v60, %v7077_v12  ;;  %v1106_v2 = vadd.f32 %v7350_v48, %v1105_v62  ;;  %v6683_v3 = vpop.f32.mrb[5].mxu0  ;;  %v1409_v4 = vcombine.high %v1407_v59, %v1407_v59  ;;  %v1425_v7 = vcombine.high %v1417_v61, %v1417_v61 }
  0xfd   :  { %v1108_v5 = vpop.f32.mrb[6].mxu0  ;;  %v2429_v13 = vsel %vm2422_vm3, %v1407_v59, -inf  ;;  %v2435_v14 = vsel %vm2422_vm3, %v1417_v61, -inf  ;;  %v2426_v19 = vsel %vm2422_vm3, %v1408_v63, -inf }
  0xfe   :  { %v1426_v8 = vcombine.high %v1424_v1, %v1424_v1  ;;  %v1297_v9 = vmax.f32 %v1106_v2, 0.0  ;;  %v6684_v10 = vpop.f32.mrb[7].mxu0  ;;  %v1109_v15 = vadd.f32 %v7350_v48, %v1108_v5  ;;  %v2441_v21 = vsel %vm2422_vm3, %v1424_v1, -inf }
  0xff   :  { %v2432_v22 = vsel %vm2422_vm3, %v1409_v4, -inf  ;;  %v2438_v27 = vsel %vm2422_vm3, %v1425_v7, -inf }
 0x100   :  { %v2424_v16 = vsel %vm2422_vm3, %v1426_v8, -inf  ;;  %v1427_v17 = vcombine.high %v1297_v9, %v1297_v9  ;;  %v1434_v18 = vrot.slane %v1297_v9, %v7077_v12  ;;  %v1298_v23 = vmax.f32 %v1109_v15, 0.0 }
 0x101   :  { %v2425_v20 = vmax.f32 %v2423_v11, %v2424_v16 }
 0x102   :  { %v1441_v24 = vrot.slane %v1427_v17, %v7077_v12  ;;  %v1442_v25 = vcombine.high %v1434_v18, %v1434_v18  ;;  %v2427_v26 = vsel %vm2422_vm3, %v1434_v18, -inf  ;;  %v1444_v30 = vcombine.high %v1298_v23, %v1298_v23 }
 0x103   :  { %v2717_v28 = vsel %vm2422_vm3, %v2425_v20, -inf  ;;  %v2428_v29 = vmax.f32 %v2426_v19, %v2427_v26  ;;  %v1451_v31 = vrot.slane %v1298_v23, %v7077_v12  ;;  %v1113_v32 = vpop.f32.mrb[8].mxu0 }
 0x104   :  { %v2718_v33 = vrot.slane %v2717_v28, 4  ;;  %v1443_v34 = vcombine.high %v1441_v24, %v1441_v24  ;;  %v2430_v35 = vsel %vm2422_vm3, %v1442_v25, -inf  ;;  %v2433_v36 = vsel %vm2422_vm3, %v1441_v24, -inf  ;;  %v6687_v37 = vpop.f32.mrb[9].mxu0 }
 0x105   :  { %v2431_v38 = vmax.f32 %v2429_v13, %v2430_v35  ;;  %v2434_v39 = vmax.f32 %v2432_v22, %v2433_v36  ;;  %v2724_v40 = vsel %vm2422_vm3, %v2428_v29, -inf  ;;  %v7377_v41 = vrot.slane %v1444_v30, %v7077_v12  ;;  %v7379_v42 = vpop.f32.mrb[10].mxu0 }
 0x106   :  { %v2719_v43 = vmax.f32 %v2717_v28, %v2718_v33  ;;  %v2436_v44 = vsel %vm2422_vm3, %v1443_v34, -inf  ;;  %v2725_v45 = vrot.slane %v2724_v40, 4  ;;  %v1459_v46 = vcombine.high %v1451_v31, %v1451_v31  ;;  %v6688_v47 = vpop.f32.mrb[11].mxu0 }
 0x107   :  { %v2437_v49 = vmax.f32 %v2435_v14, %v2436_v44  ;;  %v2731_v50 = vsel %vm2422_vm3, %v2431_v38, -inf  ;;  %v2738_v51 = vsel %vm2422_vm3, %v2434_v39, -inf  ;;  %v1460_v52 = vcombine.high %v7377_v41, %v7377_v41 }
 0x108   :  { %v2720_v53 = vrot.slane %v2719_v43, 2  ;;  %v2726_v54 = vmax.f32 %v2724_v40, %v2725_v45  ;;  %v2732_v55 = vrot.slane %v2731_v50, 4  ;;  %v2739_v56 = vrot.slane %v2738_v51, 4 }
 0x109   :  { %v2745_v57 = vsel %vm2422_vm3, %v2437_v49, -inf  ;;  %v2439_v58 = vsel %vm2422_vm3, %v1451_v31, -inf  ;;  %v2442_v59 = vsel %vm2422_vm3, %v1459_v46, -inf  ;;  %v7391_v60 = vsel %vm2422_vm3, %v7377_v41, -inf }
 0x10a   :  { %v2721_v61 = vmax.f32 %v2719_v43, %v2720_v53  ;;  %v2727_v62 = vrot.slane %v2726_v54, 2  ;;  %v2733_v63 = vmax.f32 %v2731_v50, %v2732_v55  ;;  %v2740_v1 = vmax.f32 %v2738_v51, %v2739_v56 }
 0x10b   :  { %v2746_v2 = vrot.slane %v2745_v57, 4  ;;  %v2440_v3 = vmax.f32 %v2438_v27, %v2439_v58  ;;  %v2443_v4 = vmax.f32 %v2441_v21, %v2442_v59  ;;  %v1114_v5 = vadd.f32 %v7350_v48, %v1113_v32  ;;  %v1121_v7 = vpop.f32.mrb[12].mxu0 }
 0x10c   :  { %v2722_v8 = vrot.slane %v2721_v61, 1  ;;  %v2728_v9 = vmax.f32 %v2726_v54, %v2727_v62  ;;  %v2734_v10 = vrot.slane %v2733_v63, 2  ;;  %v2741_v11 = vrot.slane %v2740_v1, 2  ;;  %v6691_v13 = vpop.f32.mrb[13].mxu0 }
 0x10d   :  { %v2747_v14 = vmax.f32 %v2745_v57, %v2746_v2  ;;  %v2752_v15 = vsel %vm2422_vm3, %v2440_v3, -inf  ;;  %v2759_v16 = vsel %vm2422_vm3, %v2443_v4, -inf  ;;  %v1299_v17 = vmax.f32 %v1114_v5, 0.0  ;;  %v1124_v18 = vpop.f32.mrb[14].mxu0 }
 0x10e   :  { %v2723_v19 = vmax.f32 %v2721_v61, %v2722_v8  ;;  %v2729_v20 = vrot.slane %v2728_v9, 1  ;;  %v2735_v22 = vmax.f32 %v2733_v63, %v2734_v10  ;;  %v2742_v23 = vmax.f32 %v2740_v1, %v2741_v11  ;;  %v6692_v21 = vpop.f32.mrb[15].mxu0 }
 0x10f   :  { %v2748_v24 = vrot.slane %v2747_v14, 2  ;;  %v2753_v25 = vrot.slane %v2752_v15, 4  ;;  %v2760_v26 = vrot.slane %v2759_v16, 4  ;;  %v1461_v27 = vcombine.high %v1299_v17, %v1299_v17 }
 0x110   :  { %v2730_v28 = vmax.f32 %v2728_v9, %v2729_v20  ;;  %v2736_v29 = vrot.slane %v2735_v22, 1  ;;  %v2743_v30 = vrot.slane %v2742_v23, 1  ;;  %v1468_v31 = vrot.slane %v1299_v17, %v7077_v12 }
 0x111   :  { %v2749_v32 = vmax.f32 %v2747_v14, %v2748_v24  ;;  %v2754_v33 = vmax.f32 %v2752_v15, %v2753_v25  ;;  %v7397_v34 = vmax.f32 %v2759_v16, %v2760_v26  ;;  %v1475_v35 = vrot.slane %v1461_v27, %v7077_v12 }
 0x112   :  { %v7400_v36 = vmax.f32 %v2735_v22, %v2736_v29  ;;  %v7402_v37 = vmax.f32 %v2742_v23, %v2743_v30  ;;  %v3454_v38 = vsel %vm3453_vm4, %v2730_v28, %v2723_v19  ;;  %v1476_v39 = vcombine.high %v1468_v31, %v1468_v31 }
 0x113   :  { %v2755_v40 = vrot.slane %v2754_v33, 2  ;;  %v2762_v41 = vrot.slane %v7397_v34, 2  ;;  %v1477_v43 = vcombine.high %v1475_v35, %v1475_v35  ;;  %v2450_v44 = vsel %vm2422_vm3, %v1468_v31, -inf  ;;  %v1129_v45 = vpop.f32.mrb[16].mxu0 }
 0x114   :  { %9739 = vst [vmem:[#allocation12_spill] sm:$0xff] %v7402_v37  ;;  %v7409_v46 = vsel %vm3455_vm5, %v7400_v36, %v3454_v38  ;;  %v2456_v47 = vsel %vm2422_vm3, %v1475_v35, -inf  ;;  %v1117_v49 = vadd.f32 %v7350_v48, %v7379_v42  ;;  %v2447_v50 = vsel %vm2422_vm3, %v1460_v52, -inf  ;;  %v6695_v51 = vpop.f32.mrb[17].mxu0 }
 0x115   :  { %v7415_v53 = vmax.f32 %v2754_v33, %v2755_v40  ;;  %v1122_v54 = vadd.f32 %v7350_v48, %v1121_v7  ;;  %v2453_v55 = vsel %vm2422_vm3, %v1476_v39, -inf  ;;  %v2459_v56 = vsel %vm2422_vm3, %v1477_v43, -inf  ;;  %v1132_v57 = vpop.f32.mrb[18].mxu0 }
 0x116   :  { %v1300_v58 = vmax.f32 %v1117_v49, 0.0  ;;  %v1125_v59 = vadd.f32 %v7350_v48, %v1124_v18  ;;  %v1130_v61 = vadd.f32 %v7350_v48, %v1129_v45  ;;  %v1133_v62 = vadd.f32 %v7350_v48, %v1132_v57  ;;  %v6696_v42 = vpop.f32.mrb[19].mxu0 }
 0x117   :  { %v2757_v52 = vrot.slane %v7415_v53, 1  ;;  %v1301_v63 = vmax.f32 %v1122_v54, 0.0  ;;  %v2750_v1 = vrot.slane %v2749_v32, 1  ;;  %v7426_v2 = vsel %vm3453_vm4, %v7400_v36, %v2730_v28 }
 0x118   :  { %v1478_v3 = vcombine.high %v1300_v58, %v1300_v58  ;;  %v1485_v4 = vrot.slane %v1300_v58, %v7077_v12  ;;  %v1302_v5 = vmax.f32 %v1125_v59, 0.0  ;;  %v7429_v7 = vmax.f32 %v1130_v61, 0.0 }
 0x119   :  { %v1495_v8 = vcombine.high %v1301_v63, %v1301_v63  ;;  %v1502_v9 = vrot.slane %v1301_v63, %v7077_v12  ;;  %v7432_v10 = vmax.f32 %v1133_v62, 0.0  ;;  %v7434_v11 = vmax.f32 %v2749_v32, %v2750_v1 }
 0x11a   :  { %v1492_v13 = vrot.slane %v1478_v3, %v7077_v12  ;;  %v1493_v14 = vcombine.high %v1485_v4, %v1485_v4  ;;  %v2462_v15 = vsel %vm2422_vm3, %v1485_v4, -inf  ;;  %v1512_v16 = vcombine.high %v1302_v5, %v1302_v5 }
 0x11b   :  { %9740 = vst [vmem:[#allocation13_spill] sm:$0xff] %v7434_v11  ;;  %v1509_v17 = vrot.slane %v1495_v8, %v7077_v12  ;;  %v1510_v18 = vcombine.high %v1502_v9, %v1502_v9  ;;  %v2454_v19 = vsel %vm2422_vm3, %v1502_v9, -inf  ;;  %v7441_v20 = vrot.slane %v1302_v5, %v7077_v12  ;;  %v7443_v22 = vpop.f32.mrb[20].mxu0 }
 0x11c   :  { %v1494_v23 = vcombine.high %v1492_v13, %v1492_v13  ;;  %v2445_v21 = vsel %vm2422_vm3, %v1493_v14, -inf  ;;  %v2448_v24 = vsel %vm2422_vm3, %v1492_v13, -inf  ;;  %v2455_v25 = vmax.f32 %v2453_v55, %v2454_v19  ;;  %v6699_v26 = vpop.f32.mrb[21].mxu0 }
 0x11d   :  { %v2446_v27 = vmax.f32 %v7391_v60, %v2445_v21  ;;  %v2449_v28 = vmax.f32 %v2447_v50, %v2448_v24  ;;  %v1511_v29 = vcombine.high %v1509_v17, %v1509_v17  ;;  %v2457_v30 = vsel %vm2422_vm3, %v1510_v18, -inf  ;;  %v7449_v31 = vpop.f32.mrb[22].mxu0 }
 0x11e   :  { %v2451_v32 = vsel %vm2422_vm3, %v1494_v23, -inf  ;;  %v2458_v33 = vmax.f32 %v2456_v47, %v2457_v30  ;;  %v2460_v35 = vsel %vm2422_vm3, %v1509_v17, -inf  ;;  %v2787_v38 = vsel %vm2422_vm3, %v2455_v25, -inf  ;;  %v6700_v39 = vpop.f32.mrb[23].mxu0 }
 0x11f   :  { %v2452_v40 = vmax.f32 %v2450_v44, %v2451_v32  ;;  %v2766_v43 = vsel %vm2422_vm3, %v2446_v27, -inf  ;;  %v2773_v45 = vsel %vm2422_vm3, %v2449_v28, -inf  ;;  %v2461_v60 = vmax.f32 %v2459_v56, %v2460_v35 }
 0x120   :  { %v2767_v49 = vrot.slane %v2766_v43, 4  ;;  %v2774_v50 = vrot.slane %v2773_v45, 4  ;;  %v2463_v51 = vsel %vm2422_vm3, %v1511_v29, -inf  ;;  %v2788_v54 = vrot.slane %v2787_v38, 4 }
 0x121   :  { %v2780_v55 = vsel %vm2422_vm3, %v2452_v40, -inf  ;;  %v2464_v57 = vmax.f32 %v2462_v15, %v2463_v51  ;;  %v2794_v47 = vsel %vm2422_vm3, %v2458_v33, -inf  ;;  %v2801_v58 = vsel %vm2422_vm3, %v2461_v60, -inf }
 0x122   :  { %v2768_v59 = vmax.f32 %v2766_v43, %v2767_v49  ;;  %v2775_v61 = vmax.f32 %v2773_v45, %v2774_v50  ;;  %v2781_v44 = vrot.slane %v2780_v55, 4  ;;  %v2789_v62 = vmax.f32 %v2787_v38, %v2788_v54 }
 0x123   :  { %v2795_v42 = vrot.slane %v2794_v47, 4  ;;  %v2802_v63 = vrot.slane %v2801_v58, 4  ;;  %v2808_v56 = vsel %vm2422_vm3, %v2464_v57, -inf  ;;  %v1526_v1 = vrot.slane %v1512_v16, %v7077_v12  ;;  %v7462_v3 = vpop.f32.mrb[24].mxu0 }
 0x124   :  { %v2769_v4 = vrot.slane %v2768_v59, 2  ;;  %v2776_v5 = vrot.slane %v2775_v61, 2  ;;  %v2782_v8 = vmax.f32 %v2780_v55, %v2781_v44  ;;  %v2790_v9 = vrot.slane %v2789_v62, 2  ;;  %v6703_v13 = vpop.f32.mrb[25].mxu0 }
 0x125   :  { %v2796_v14 = vmax.f32 %v2794_v47, %v2795_v42  ;;  %v2803_v15 = vmax.f32 %v2801_v58, %v2802_v63  ;;  %v2809_v17 = vrot.slane %v2808_v56, 4  ;;  %v1527_v18 = vcombine.high %v7441_v20, %v7441_v20  ;;  %v7466_v19 = vpop.f32.mrb[26].mxu0 }
 0x126   :  { %v2770_v23 = vmax.f32 %v2768_v59, %v2769_v4  ;;  %v7468_v21 = vmax.f32 %v2775_v61, %v2776_v5  ;;  %v2783_v24 = vrot.slane %v2782_v8, 2  ;;  %v2791_v16 = vmax.f32 %v2789_v62, %v2790_v9  ;;  %v6704_v25 = vpop.f32.mrb[27].mxu0 }
 0x127   :  { %v2797_v26 = vrot.slane %v2796_v14, 2  ;;  %v2804_v27 = vrot.slane %v2803_v15, 2  ;;  %v7470_v28 = vmax.f32 %v2808_v56, %v2809_v17  ;;  %v1528_v29 = vcombine.high %v1526_v1, %v1526_v1 }
 0x128   :  { %v2771_v30 = vrot.slane %v2770_v23, 1  ;;  %v2784_v32 = vmax.f32 %v2782_v8, %v2783_v24  ;;  %v2792_v33 = vrot.slane %v2791_v16, 1  ;;  %v2465_v35 = vsel %vm2422_vm3, %v7441_v20, -inf }
 0x129   :  { %v2798_v38 = vmax.f32 %v2796_v14, %v2797_v26  ;;  %v2805_v39 = vmax.f32 %v2803_v15, %v2804_v27  ;;  %v2811_v40 = vrot.slane %v7470_v28, 2  ;;  %v2471_v43 = vsel %vm2422_vm3, %v1526_v1, -inf }
 0x12a   :  { %v7476_v45 = vmax.f32 %v2770_v23, %v2771_v30  ;;  %v2785_v60 = vrot.slane %v2784_v32, 1  ;;  %v7478_v49 = vmax.f32 %v2791_v16, %v2792_v33  ;;  %v1529_v50 = vcombine.high %v7429_v7, %v7429_v7 }
 0x12b   :  { %v2799_v51 = vrot.slane %v2798_v38, 1  ;;  %v2806_v54 = vrot.slane %v2805_v39, 1  ;;  %v1536_v55 = vrot.slane %v7429_v7, %v7077_v12  ;;  %v1546_v20 = vcombine.high %v7432_v10, %v7432_v10  ;;  %v7486_v57 = vpop.f32.mrb[28].mxu0 }
 0x12c   :  { %9741 = vst [vmem:[#allocation14_spill] sm:$0xff] %v7476_v45  ;;  %9742 = vst [vmem:[#allocation15_spill] sm:$0xff] %v7478_v49  ;;  %v7488_v47 = vmax.f32 %v2784_v32, %v2785_v60  ;;  %v1543_v58 = vrot.slane %v1529_v50, %v7077_v12  ;;  %v1553_v59 = vrot.slane %v7432_v10, %v7077_v12  ;;  %v2468_v61 = vsel %vm2422_vm3, %v1527_v18, -inf  ;;  %v6707_v44 = vpop.f32.mrb[29].mxu0 }
 0x12d   :  { %v7494_v62 = vmax.f32 %v2798_v38, %v2799_v51  ;;  %v7496_v42 = vmax.f32 %v2805_v39, %v2806_v54  ;;  %v1544_v7 = vcombine.high %v1536_v55, %v1536_v55  ;;  %v2477_v63 = vsel %vm2422_vm3, %v1536_v55, -inf  ;;  %v7499_v56 = vpop.f32.mrb[30].mxu0 }
 0x12e   :  { %9743 = vst [vmem:[#allocation16_spill] sm:$0xff] %v7488_v47  ;;  %v1545_v1 = vcombine.high %v1543_v58, %v1543_v58  ;;  %v7502_v4 = vsel %vm2422_vm3, %v1543_v58, -inf  ;;  %v1560_v5 = vrot.slane %v1546_v20, %v7077_v12  ;;  %v1561_v8 = vcombine.high %v1553_v59, %v1553_v59  ;;  %v6708_v10 = vpop.f32.mrb[31].mxu0 }
 0x12f   :  { %9744 = vst [vmem:[#allocation17_spill] sm:$0xff] %v7494_v62  ;;  %9745 = vst [vmem:[#allocation18_spill] sm:$0xff] %v7496_v42  ;;  %v2469_v9 = vsel %vm2422_vm3, %v1553_v59, -inf  ;;  %v2474_v13 = vsel %vm2422_vm3, %v1528_v29, -inf  ;;  %v1138_v14 = vadd.f32 %v7350_v48, %v7443_v22  ;;  %v2480_v15 = vsel %vm2422_vm3, %v1544_v7, -inf }
 0x130   :  { %v2466_v17 = vsel %vm2422_vm3, %v1545_v1, -inf  ;;  %v1562_v18 = vcombine.high %v1560_v5, %v1560_v5  ;;  %v2470_v23 = vmax.f32 %v2468_v61, %v2469_v9  ;;  %v2472_v24 = vsel %vm2422_vm3, %v1561_v8, -inf }
 0x131   :  { %v2467_v16 = vmax.f32 %v2465_v35, %v2466_v17  ;;  %v2473_v25 = vmax.f32 %v2471_v43, %v2472_v24  ;;  %v2475_v26 = vsel %vm2422_vm3, %v1560_v5, -inf  ;;  %v1305_v27 = vmax.f32 %v1138_v14, 0.0 }
 0x132   :  { %v2476_v30 = vmax.f32 %v2474_v13, %v2475_v26  ;;  %v2478_v32 = vsel %vm2422_vm3, %v1562_v18, -inf  ;;  %v2822_v29 = vsel %vm2422_vm3, %v2470_v23, -inf  ;;  %v1141_v22 = vadd.f32 %v7350_v48, %v7449_v31 }
 0x133   :  { %v2815_v33 = vsel %vm2422_vm3, %v2467_v16, -inf  ;;  %v2479_v38 = vmax.f32 %v2477_v63, %v2478_v32  ;;  %v2823_v39 = vrot.slane %v2822_v29, 4  ;;  %v2829_v60 = vsel %vm2422_vm3, %v2473_v25, -inf  ;;  %v7519_v50 = vpop.f32.mrb[32].mxu0 }
 0x134   :  { %v2816_v35 = vrot.slane %v2815_v33, 4  ;;  %v2830_v43 = vrot.slane %v2829_v60, 4  ;;  %v2836_v51 = vsel %vm2422_vm3, %v2476_v30, -inf  ;;  %v1563_v54 = vcombine.high %v1305_v27, %v1305_v27  ;;  %v6711_v55 = vpop.f32.mrb[33].mxu0 }
 0x135   :  { %v2824_v20 = vmax.f32 %v2822_v29, %v2823_v39  ;;  %v2837_v58 = vrot.slane %v2836_v51, 4  ;;  %v2843_v59 = vsel %vm2422_vm3, %v2479_v38, -inf  ;;  %v1570_v31 = vrot.slane %v1305_v27, %v7077_v12  ;;  %v7524_v61 = vpop.f32.mrb[34].mxu0 }
 0x136   :  { %v7526_v44 = vmax.f32 %v2815_v33, %v2816_v35  ;;  %v2831_v7 = vmax.f32 %v2829_v60, %v2830_v43  ;;  %v2844_v63 = vrot.slane %v2843_v59, 4  ;;  %v1577_v1 = vrot.slane %v1563_v54, %v7077_v12  ;;  %v6712_v5 = vpop.f32.mrb[35].mxu0 }
 0x137   :  { %v2825_v8 = vrot.slane %v2824_v20, 2  ;;  %v2838_v10 = vmax.f32 %v2836_v51, %v2837_v58  ;;  %v1578_v9 = vcombine.high %v1570_v31, %v1570_v31  ;;  %v2481_v13 = vsel %vm2422_vm3, %v1570_v31, -inf }
 0x138   :  { %v2832_v14 = vrot.slane %v2831_v7, 2  ;;  %v2845_v17 = vmax.f32 %v2843_v59, %v2844_v63  ;;  %v1579_v18 = vcombine.high %v1577_v1, %v1577_v1  ;;  %v2482_v23 = vmax.f32 %v2480_v15, %v2481_v13 }
 0x139   :  { %v2826_v24 = vmax.f32 %v2824_v20, %v2825_v8  ;;  %v2839_v16 = vrot.slane %v2838_v10, 2  ;;  %v2484_v25 = vsel %vm2422_vm3, %v1578_v9, -inf  ;;  %v7532_v26 = vsel %vm2422_vm3, %v1577_v1, -inf }
 0x13a   :  { %v2833_v27 = vmax.f32 %v2831_v7, %v2832_v14  ;;  %v2846_v30 = vrot.slane %v2845_v17, 2  ;;  %v2485_v32 = vmax.f32 %v7502_v4, %v2484_v25  ;;  %v2850_v29 = vsel %vm2422_vm3, %v2482_v23, -inf }
 0x13b   :  { %v2827_v33 = vrot.slane %v2826_v24, 1  ;;  %v2840_v38 = vmax.f32 %v2838_v10, %v2839_v16  ;;  %v2851_v39 = vrot.slane %v2850_v29, 4  ;;  %v1306_v15 = vmax.f32 %v1141_v22, 0.0  ;;  %v7536_v60 = vpop.f32.mrb[36].mxu0 }
 0x13c   :  { %v2834_v35 = vrot.slane %v2833_v27, 1  ;;  %v2847_v43 = vmax.f32 %v2845_v17, %v2846_v30  ;;  %v2857_v51 = vsel %vm2422_vm3, %v2485_v32, -inf  ;;  %v2758_v54 = vmax.f32 %v7415_v53, %v2757_v52  ;;  %v6715_v55 = vpop.f32.mrb[37].mxu0 }
 0x13d   :  { %v7542_v20 = vmax.f32 %v2826_v24, %v2827_v33  ;;  %v2841_v4 = vrot.slane %v2840_v38, 1  ;;  %v2852_v58 = vmax.f32 %v2850_v29, %v2851_v39  ;;  %v2858_v59 = vrot.slane %v2857_v51, 4  ;;  %v7544_v31 = vpop.f32.mrb[38].mxu0 }
 0x13e   :  { %v7546_v22 = vmax.f32 %v2833_v27, %v2834_v35  ;;  %v2848_v7 = vrot.slane %v2847_v43, 1  ;;  %v1580_v63 = vcombine.high %v1306_v15, %v1306_v15  ;;  %v1587_v1 = vrot.slane %v1306_v15, %v7077_v12  ;;  %v6716_v5 = vpop.f32.mrb[39].mxu0 }
 0x13f   :  { %9746 = vst [vmem:[#allocation19_spill] sm:$0xff] %v7542_v20  ;;  %v7549_v8 = vmax.f32 %v2840_v38, %v2841_v4  ;;  %v2853_v10 = vrot.slane %v2852_v58, 2  ;;  %v7551_v53 = vmax.f32 %v2857_v51, %v2858_v59  ;;  %v2778_v52 = vrot.slane %v7468_v21, 1 }
 0x140   :  { %9747 = vst [vmem:[#allocation20_spill] sm:$0xff] %v7546_v22  ;;  %v7554_v9 = vmax.f32 %v2847_v43, %v2848_v7  ;;  %v1594_v13 = vrot.slane %v1580_v63, %v7077_v12  ;;  %v1595_v14 = vcombine.high %v1587_v1, %v1587_v1  ;;  %v7558_v17 = vsel %vm2422_vm3, %v1587_v1, -inf }
 0x141   :  { %9748 = vst [vmem:[#allocation21_spill] sm:$0xff] %v7549_v8  ;;  %v2854_v23 = vmax.f32 %v2852_v58, %v2853_v10  ;;  %v7561_v24 = vmax.f32 %v7468_v21, %v2778_v52  ;;  %v3529_v16 = vsel %vm3455_vm5, %v7402_v37, %v7426_v2  ;;  %v1146_v25 = vadd.f32 %v7350_v48, %v7462_v3 }
 0x142   :  { %9749 = vst [vmem:[#allocation22_spill] sm:$0xff] %v7554_v9  ;;  %v1596_v27 = vcombine.high %v1594_v13, %v1594_v13  ;;  %v7569_v30 = vsel %vm2422_vm3, %v1594_v13, -inf  ;;  %v3530_v32 = vsel %vm3457_vm6, %v7434_v11, %v3529_v16  ;;  %v2489_v29 = vsel %vm2422_vm3, %v1579_v18, -inf }
 0x143   :  { %9750 = vst [vmem:[#allocation23_spill] sm:$0xff] %v7561_v24  ;;  %v2855_v33 = vrot.slane %v2854_v23, 1  ;;  %v3531_v21 = vsel %vm3459_vm7, %v2758_v54, %v3530_v32  ;;  %v7578_v38 = vsel %vm3453_vm4, %v7488_v47, %v7561_v24  ;;  %v1307_v2 = vmax.f32 %v1146_v25, 0.0  ;;  %v7580_v39 = vpop.f32.mrb[40].mxu0 }
 0x144   :  { %9751 = vst [vmem:[#allocation24_spill] sm:$0xff] %v7578_v38  ;;  %v3532_v3 = vsel %vm3461_vm8, %v7561_v24, %v3531_v21  ;;  %v2763_v15 = vmax.f32 %v7397_v34, %v2762_v41  ;;  %v3611_v18 = vsel %vm3453_vm4, %v7402_v37, %v7400_v36  ;;  %v1149_v35 = vadd.f32 %v7350_v48, %v7466_v19  ;;  %v6719_v43 = vpop.f32.mrb[41].mxu0 }
 0x145   :  { %v7592_v51 = vmax.f32 %v2854_v23, %v2855_v33  ;;  %v3533_v55 = vsel %vm3463_vm9, %v7488_v47, %v3532_v3  ;;  %v1597_v4 = vcombine.high %v1307_v2, %v1307_v2  ;;  %v1604_v58 = vrot.slane %v1307_v2, %v7077_v12  ;;  %v7597_v59 = vpop.f32.mrb[42].mxu0 }
 0x146   :  { %v3534_v34 = vsel %vm3465_vm10, %v7478_v49, %v3533_v55  ;;  %v2764_v41 = vrot.slane %v2763_v15, 1  ;;  %v3612_v36 = vsel %vm3455_vm5, %v7434_v11, %v3611_v18  ;;  %v1308_v7 = vmax.f32 %v1149_v35, 0.0  ;;  %v6720_v19 = vpop.f32.mrb[43].mxu0 }
 0x147   :  { %9752 = vst [vmem:[#allocation25_spill] sm:$0xff] %v7592_v51  ;;  %3571 = vrot.lane.b32.xlu1 %v3534_v34, %s6996_s0  ;;  %v1611_v63 = vrot.slane %v1597_v4, %v7077_v12  ;;  %v1612_v1 = vcombine.high %v1604_v58, %v1604_v58  ;;  %v2504_v5 = vsel %vm2422_vm3, %v1604_v58, -inf  ;;  %v3613_v10 = vsel %vm3457_vm6, %v2758_v54, %v3612_v36 }
 0x148   :  { %v2765_v52 = vmax.f32 %v2763_v15, %v2764_v41  ;;  %v1614_v13 = vcombine.high %v1308_v7, %v1308_v7  ;;  %v1621_v23 = vrot.slane %v1308_v7, %v7077_v12  ;;  %v2495_v16 = vsel %vm2422_vm3, %v1595_v14, -inf }
 0x149   :  { %v1613_v25 = vcombine.high %v1611_v63, %v1611_v63  ;;  %v2487_v32 = vsel %vm2422_vm3, %v1612_v1, -inf  ;;  %v2490_v33 = vsel %vm2422_vm3, %v1611_v63, -inf  ;;  %v2501_v21 = vsel %vm2422_vm3, %v1596_v27, -inf }
 0x14a   :  { %v2488_v2 = vmax.f32 %v7532_v26, %v2487_v32  ;;  %v2491_v3 = vmax.f32 %v2489_v29, %v2490_v33  ;;  %v3614_v18 = vsel %vm3459_vm7, %v2765_v52, %v3613_v10  ;;  %v1628_v54 = vrot.slane %v1614_v13, %v7077_v12 }
 0x14b   :  { %v2493_v15 = vsel %vm2422_vm3, %v1613_v25, -inf  ;;  %v3615_v35 = vsel %vm3461_vm8, %v7488_v47, %v3614_v18  ;;  %v1629_v14 = vcombine.high %v1621_v23, %v1621_v23  ;;  %v2496_v43 = vsel %vm2422_vm3, %v1621_v23, -inf  ;;  %v7619_v55 = vpop.f32.mrb[44].mxu0 }
 0x14c   :  { %v2494_v4 = vmax.f32 %v7558_v17, %v2493_v15  ;;  %v2864_v27 = vsel %vm2422_vm3, %v2488_v2, -inf  ;;  %v2871_v26 = vsel %vm2422_vm3, %v2491_v3, -inf  ;;  %v3616_v29 = vsel %vm3463_vm9, %v7478_v49, %v3615_v35  ;;  %v6723_v58 = vpop.f32.mrb[45].mxu0 }
 0x14d   :  { %v2865_v34 = vrot.slane %v2864_v27, 4  ;;  %v2872_v41 = vrot.slane %v2871_v26, 4  ;;  %v3617_v36 = vsel %vm3465_vm10, %v7494_v62, %v3616_v29  ;;  %v1630_v7 = vcombine.high %v1628_v54, %v1628_v54  ;;  %v7628_v19 = vpop.f32.mrb[46].mxu0 }
 0x14e   :  { %v2878_v63 = vsel %vm2422_vm3, %v2494_v4, -inf  ;;  %3654 = vrot.lane.b32.xlu0 %v3617_v36, %s6991_s11  ;;  %v2497_v17 = vmax.f32 %v2495_v16, %v2496_v43  ;;  %v2499_v1 = vsel %vm2422_vm3, %v1629_v14, -inf  ;;  %v2502_v10 = vsel %vm2422_vm3, %v1628_v54, -inf  ;;  %v6724_v52 = vpop.f32.mrb[47].mxu0 }
 0x14f   :  { %v7634_v13 = vmax.f32 %v2864_v27, %v2865_v34  ;;  %v2873_v23 = vmax.f32 %v2871_v26, %v2872_v41  ;;  %v2879_v25 = vrot.slane %v2878_v63, 4  ;;  %v2500_v32 = vmax.f32 %v7569_v30, %v2499_v1 }
 0x150   :  { %v2503_v33 = vmax.f32 %v2501_v21, %v2502_v10  ;;  %v2505_v2 = vsel %vm2422_vm3, %v1630_v7, -inf  ;;  %v2885_v3 = vsel %vm2422_vm3, %v2497_v17, -inf  ;;  %v1154_v18 = vadd.f32 %v7350_v48, %v7486_v57 }
 0x151   :  { %v2874_v15 = vrot.slane %v2873_v23, 2  ;;  %v2880_v35 = vmax.f32 %v2878_v63, %v2879_v25  ;;  %v2506_v54 = vmax.f32 %v2504_v5, %v2505_v2  ;;  %v2886_v14 = vrot.slane %v2885_v3, 4 }
 0x152   :  { %v2892_v43 = vsel %vm2422_vm3, %v2500_v32, -inf  ;;  %v2899_v4 = vsel %vm2422_vm3, %v2503_v33, -inf  ;;  %v1309_v27 = vmax.f32 %v1154_v18, 0.0 }
 0x153   :  { %v2875_v30 = vmax.f32 %v2873_v23, %v2874_v15  ;;  %v2881_v21 = vrot.slane %v2880_v35, 2  ;;  %v2893_v26 = vrot.slane %v2892_v43, 4  ;;  %v2900_v29 = vrot.slane %v2899_v4, 4  ;;  %v7644_v58 = vpop.f32.mrb[48].mxu0 }
 0x154   :  { %v2887_v34 = vmax.f32 %v2885_v3, %v2886_v14  ;;  %v7647_v57 = vsel %vm2422_vm3, %v2506_v54, -inf  ;;  %v1631_v41 = vcombine.high %v1309_v27, %v1309_v27  ;;  %v1638_v36 = vrot.slane %v1309_v27, %v7077_v12  ;;  %v6727_v5 = vpop.f32.mrb[49].mxu0 }
 0x155   :  { %v2876_v7 = vrot.slane %v2875_v30, 1  ;;  %v2882_v63 = vmax.f32 %v2880_v35, %v2881_v21  ;;  %v2894_v17 = vmax.f32 %v2892_v43, %v2893_v26  ;;  %v2901_v1 = vmax.f32 %v2899_v4, %v2900_v29  ;;  %v7650_v10 = vpop.f32.mrb[50].mxu0 }
 0x156   :  { %v2888_v52 = vrot.slane %v2887_v34, 2  ;;  %v1645_v25 = vrot.slane %v1631_v41, %v7077_v12  ;;  %v1646_v32 = vcombine.high %v1638_v36, %v1638_v36  ;;  %v6728_v33 = vpop.f32.mrb[51].mxu0  ;;  %v7657_v35 = vsel %vm2422_vm3, %v1638_v36, -inf }
 0x157   :  { %v7654_v2 = vmax.f32 %v2875_v30, %v2876_v7  ;;  %v2883_v3 = vrot.slane %v2882_v63, 1  ;;  %v2895_v18 = vrot.slane %v2894_v17, 2  ;;  %v2902_v15 = vrot.slane %v2901_v1, 2 }
 0x158   :  { %v2889_v54 = vmax.f32 %v2887_v34, %v2888_v52  ;;  %v1647_v14 = vcombine.high %v1645_v25, %v1645_v25  ;;  %v2513_v43 = vsel %vm2422_vm3, %v1645_v25, -inf  ;;  %v1157_v26 = vadd.f32 %v7350_v48, %v7499_v56 }
 0x159   :  { %9753 = vst [vmem:[#allocation26_spill] sm:$0xff] %v7654_v2  ;;  %v7660_v4 = vmax.f32 %v2882_v63, %v2883_v3  ;;  %v2896_v27 = vmax.f32 %v2894_v17, %v2895_v18  ;;  %v2903_v21 = vmax.f32 %v2901_v1, %v2902_v15  ;;  %v2812_v30 = vmax.f32 %v7470_v28, %v2811_v40 }
 0x15a   :  { %v2890_v29 = vrot.slane %v2889_v54, 1  ;;  %v3828_v34 = vsel %vm3453_vm4, %v7478_v49, %v7488_v47  ;;  %v1162_v41 = vadd.f32 %v7350_v48, %v7519_v50  ;;  %v1310_v7 = vmax.f32 %v1157_v26, 0.0 }
 0x15b   :  { %9754 = vst [vmem:[#allocation27_spill] sm:$0xff] %v7660_v4  ;;  %v2897_v36 = vrot.slane %v2896_v27, 1  ;;  %v2904_v5 = vrot.slane %v2903_v21, 1  ;;  %v3829_v63 = vsel %vm3455_vm5, %v7494_v62, %v3828_v34  ;;  %v7674_v17 = vpop.f32.mrb[52].mxu0  ;;  %v2813_v1 = vrot.slane %v2812_v30, 1 }
 0x15c   :  { %v7676_v56 = vmax.f32 %v2889_v54, %v2890_v29  ;;  %v3830_v28 = vsel %vm3457_vm6, %v7496_v42, %v3829_v63  ;;  %v1311_v40 = vmax.f32 %v1162_v41, 0.0  ;;  %v6731_v52 = vpop.f32.mrb[53].mxu0  ;;  %v1648_v50 = vcombine.high %v1310_v7, %v1310_v7 }
 0x15d   :  { %v7680_v25 = vmax.f32 %v2896_v27, %v2897_v36  ;;  %v7682_v33 = vmax.f32 %v2903_v21, %v2904_v5  ;;  %v1655_v3 = vrot.slane %v1310_v7, %v7077_v12  ;;  %v7685_v18 = vpop.f32.mrb[54].mxu0  ;;  %v7687_v15 = vmax.f32 %v2812_v30, %v2813_v1 }
 0x15e   :  { %9755 = vst [vmem:[#allocation28_spill] sm:$0xff] %v7676_v56  ;;  %v1665_v26 = vcombine.high %v1311_v40, %v1311_v40  ;;  %v1672_v54 = vrot.slane %v1311_v40, %v7077_v12  ;;  %v2510_v29 = vsel %vm2422_vm3, %v1646_v32, -inf  ;;  %v6732_v34 = vpop.f32.mrb[55].mxu0  ;;  %v1662_v41 = vrot.slane %v1648_v50, %v7077_v12 }
 0x15f   :  { %9756 = vst [vmem:[#allocation29_spill] sm:$0xff] %v7680_v25  ;;  %9757 = vst [vmem:[#allocation30_spill] sm:$0xff] %v7682_v33  ;;  %v1663_v63 = vcombine.high %v1655_v3, %v1655_v3  ;;  %v2519_v27 = vsel %vm2422_vm3, %v1655_v3, -inf  ;;  %v2516_v21 = vsel %vm2422_vm3, %v1647_v14, -inf  ;;  %v3831_v36 = vsel %vm3459_vm7, %v7687_v15, %v3830_v28 }
 0x160   :  { %v1679_v5 = vrot.slane %v1665_v26, %v7077_v12  ;;  %v1680_v30 = vcombine.high %v1672_v54, %v1672_v54  ;;  %v2511_v7 = vsel %vm2422_vm3, %v1672_v54, -inf  ;;  %v1664_v1 = vcombine.high %v1662_v41, %v1662_v41 }
 0x161   :  { %v7699_v40 = vsel %vm2422_vm3, %v1662_v41, -inf  ;;  %v3832_v32 = vsel %vm3461_vm8, %v7546_v22, %v3831_v36  ;;  %v2512_v52 = vmax.f32 %v2510_v29, %v2511_v7 }
 0x162   :  { %v3833_v50 = vsel %vm3463_vm9, %v7549_v8, %v3832_v32  ;;  %v1681_v14 = vcombine.high %v1679_v5, %v1679_v5  ;;  %v2514_v3 = vsel %vm2422_vm3, %v1680_v30, -inf  ;;  %v2517_v28 = vsel %vm2422_vm3, %v1679_v5, -inf }
 0x163   :  { %v7708_v26 = vsel %vm2422_vm3, %v1664_v1, -inf  ;;  %v3834_v54 = vsel %vm3465_vm10, %v7554_v9, %v3833_v50  ;;  %v2515_v34 = vmax.f32 %v2513_v43, %v2514_v3  ;;  %v2518_v41 = vmax.f32 %v2516_v21, %v2517_v28  ;;  %v7712_v0 = vpop.f32.mrb[56].mxu0 }
 0x164   :  { %3871 = vrot.lane.b32.xlu0 %v3834_v54, %s6996_s0  ;;  %v2520_v36 = vsel %vm2422_vm3, %v1681_v14, -inf  ;;  %v2920_v30 = vsel %vm2422_vm3, %v2512_v52, -inf  ;;  %v2818_v5 = vrot.slane %v7526_v44, 2  ;;  %v6735_v7 = vpop.f32.mrb[57].mxu0  ;;  %v3467_v14 = vsel %vm3453_vm4, %v7494_v62, %v7478_v49 }
 0x165   :  { %v2521_v1 = vmax.f32 %v2519_v27, %v2520_v36  ;;  %v2921_v32 = vrot.slane %v2920_v30, 4  ;;  %v2927_v50 = vsel %vm2422_vm3, %v2515_v34, -inf  ;;  %v2934_v43 = vsel %vm2422_vm3, %v2518_v41, -inf  ;;  %v7722_v21 = vpop.f32.mrb[58].mxu0 }
 0x166   :  { %v2928_v3 = vrot.slane %v2927_v50, 4  ;;  %v2935_v28 = vrot.slane %v2934_v43, 4  ;;  %v2819_v23 = vmax.f32 %v7526_v44, %v2818_v5  ;;  %v6736_v52 = vpop.f32.mrb[59].mxu0  ;;  %v3694_v27 = vsel %vm3453_vm4, %v7561_v24, %v7476_v45 }
 0x167   :  { %v2922_v54 = vmax.f32 %v2920_v30, %v2921_v32  ;;  %v2941_v7 = vsel %vm2422_vm3, %v2521_v1, -inf  ;;  %v1165_v34 = vadd.f32 %v7350_v48, %v7524_v61  ;;  %v3695_v5 = vsel %vm3455_vm5, %v7488_v47, %v3694_v27 }
 0x168   :  { %v2929_v41 = vmax.f32 %v2927_v50, %v2928_v3  ;;  %v2936_v36 = vmax.f32 %v2934_v43, %v2935_v28  ;;  %v2942_v29 = vrot.slane %v2941_v7, 4  ;;  %v2820_v16 = vrot.slane %v2819_v23, 1 }
 0x169   :  { %v2923_v44 = vrot.slane %v2922_v54, 2  ;;  %v1312_v6 = vmax.f32 %v1165_v34, 0.0  ;;  %v2522_v30 = vsel %vm2422_vm3, %v1663_v63, -inf  ;;  %v3696_v24 = vsel %vm3457_vm6, %v7478_v49, %v3695_v5 }
 0x16a   :  { %v2930_v32 = vrot.slane %v2929_v41, 2  ;;  %v2937_v1 = vrot.slane %v2936_v36, 2  ;;  %v2943_v52 = vmax.f32 %v2941_v7, %v2942_v29  ;;  %v2821_v38 = vmax.f32 %v2819_v23, %v2820_v16 }
 0x16b   :  { %v2924_v11 = vmax.f32 %v2922_v54, %v2923_v44  ;;  %v1682_v48 = vcombine.high %v1312_v6, %v1312_v6  ;;  %v1689_v61 = vrot.slane %v1312_v6, %v7077_v12  ;;  %v7740_v50 = vpop.f32.mrb[60].mxu0  ;;  %v3697_v16 = vsel %vm3459_vm7, %v7494_v62, %v3696_v24 }
 0x16c   :  { %v2931_v43 = vmax.f32 %v2929_v41, %v2930_v32  ;;  %v2938_v3 = vmax.f32 %v2936_v36, %v2937_v1  ;;  %v2944_v28 = vrot.slane %v2943_v52, 2  ;;  %v3468_v27 = vsel %vm3455_vm5, %v2821_v38, %v3467_v14  ;;  %v6739_v34 = vpop.f32.mrb[61].mxu0 }
 0x16d   :  { %v2925_v63 = vrot.slane %v2924_v11, 1  ;;  %v7745_v29 = vsel %vm3457_vm6, %v7542_v20, %v3468_v27  ;;  %v1696_v23 = vrot.slane %v1682_v48, %v7077_v12  ;;  %v3698_v41 = vsel %vm3461_vm8, %v2821_v38, %v3697_v16 }
 0x16e   :  { %9758 = vst [vmem:[#allocation31_spill] sm:$0xff] %v7745_v29  ;;  %v2932_v54 = vrot.slane %v2931_v43, 1  ;;  %v2939_v6 = vrot.slane %v2938_v3, 1  ;;  %v2945_v7 = vmax.f32 %v2943_v52, %v2944_v28  ;;  %v3699_v14 = vsel %vm3463_vm9, %v7542_v20, %v3698_v41 }
 0x16f   :  { %v7751_v36 = vmax.f32 %v2924_v11, %v2925_v63  ;;  %v1697_v44 = vcombine.high %v1689_v61, %v1689_v61  ;;  %v1698_v5 = vcombine.high %v1696_v23, %v1696_v23  ;;  %v3700_v24 = vsel %vm3465_vm10, %v7546_v22, %v3699_v14 }
 0x170   :  { %v7755_v32 = vmax.f32 %v2931_v43, %v2932_v54  ;;  %v7757_v1 = vmax.f32 %v2938_v3, %v2939_v6  ;;  %v2946_v27 = vrot.slane %v2945_v7, 1  ;;  %3737 = vrot.lane.b32.xlu0 %v3700_v24, %s6997_s1  ;;  %v2523_v52 = vsel %vm2422_vm3, %v1689_v61, -inf  ;;  %v7770_v43 = vld [vmem:[%s9691_s2] ss:$0 sm:$0xff] }
 0x171   :  { %9759 = vst [vmem:[#allocation32_spill] sm:$0xff] %v7751_v36  ;;  %v2526_v11 = vsel %vm2422_vm3, %v1697_v44, -inf  ;;  %v7765_v48 = vsel %vm2422_vm3, %v1696_v23, -inf  ;;  %v1170_v3 = vadd.f32 %v7770_v43, %v7536_v60  ;;  %v2524_v34 = vmax.f32 %v2522_v30, %v2523_v52 }
 0x172   :  { %9760 = vst [vmem:[#allocation33_spill] sm:$0xff] %v7755_v32  ;;  %9761 = vst [vmem:[#allocation34_spill] sm:$0xff] %v7757_v1  ;;  %v7774_v28 = vmax.f32 %v2945_v7, %v2946_v27  ;;  %v2527_v63 = vmax.f32 %v7699_v40, %v2526_v11  ;;  %v3535_v61 = vsel %vm3453_vm4, %v7496_v42, %v7494_v62  ;;  %v2531_v6 = vsel %vm2422_vm3, %v1698_v5, -inf }
 0x173   :  { %v1313_v16 = vmax.f32 %v1170_v3, 0.0  ;;  %v3536_v23 = vsel %vm3455_vm5, %v7542_v20, %v3535_v61  ;;  %v1173_v54 = vadd.f32 %v7770_v43, %v7544_v31  ;;  %v2948_v60 = vsel %vm2422_vm3, %v2524_v34, -inf  ;;  %v7795_v31 = vpop.f32.mrb[62].mxu0 }
 0x174   :  { %9762 = vst [vmem:[#allocation35_spill] sm:$0xff] %v7774_v28  ;;  %v2955_v7 = vsel %vm2422_vm3, %v2527_v63, -inf  ;;  %v3537_v40 = vsel %vm3457_vm6, %v7546_v22, %v3536_v23  ;;  %v9763_v30 = vrot.slane %v7634_v13, 2  ;;  %v2949_v14 = vrot.slane %v2948_v60, 4  ;;  %v6740_v34 = vpop.f32.mrb[63].mxu0 }
 0x175   :  { %v2956_v44 = vrot.slane %v2955_v7, 4  ;;  %v1699_v27 = vcombine.high %v1313_v16, %v1313_v16  ;;  %v7793_v24 = vrot.slane %v1313_v16, %v7077_v12  ;;  %v3538_v5 = vsel %vm3459_vm7, %v7549_v8, %v3537_v40 }
 0x176   :  { %v2868_v41 = vmax.f32 %v7634_v13, %v9763_v30  ;;  %v1314_v52 = vmax.f32 %v1173_v54, 0.0  ;;  %v3909_v3 = vsel %vm3453_vm4, %v7542_v20, %v2821_v38  ;;  %v2950_v63 = vmax.f32 %v2948_v60, %v2949_v14 }
 0x177   :  { %v2957_v61 = vmax.f32 %v2955_v7, %v2956_v44  ;;  %v7802_v13 = vrot.slane %v1699_v27, %v7077_v12  ;;  %v2534_v23 = vsel %vm2422_vm3, %v7793_v24, -inf  ;;  %v3539_v40 = vsel %vm3461_vm8, %v7554_v9, %v3538_v5 }
 0x178   :  { %v2869_v11 = vrot.slane %v2868_v41, 1  ;;  %v1716_v54 = vcombine.high %v1314_v52, %v1314_v52  ;;  %v1723_v30 = vrot.slane %v1314_v52, %v7077_v12  ;;  %v2951_v29 = vrot.slane %v2950_v63, 2 }
 0x179   :  { %v2958_v38 = vrot.slane %v2957_v61, 2  ;;  %v7815_v7 = vsel %vm2422_vm3, %v7802_v13, -inf  ;;  %v3540_v14 = vsel %vm3463_vm9, %v7592_v51, %v3539_v40 }
 0x17a   :  { %v1730_v44 = vrot.slane %v1716_v54, %v7077_v12  ;;  %v1731_v27 = vcombine.high %v1723_v30, %v1723_v30  ;;  %v7821_v5 = vsel %vm2422_vm3, %v1723_v30, -inf  ;;  %v2952_v34 = vmax.f32 %v2950_v63, %v2951_v29 }
 0x17b   :  { %v2959_v52 = vmax.f32 %v2957_v61, %v2958_v38  ;;  %v3541_v16 = vsel %vm3465_vm10, %v7654_v2, %v3540_v14  ;;  %v7825_v62 = vmax.f32 %v2868_v41, %v2869_v11  ;;  %v3910_v54 = vsel %vm3455_vm5, %v7546_v22, %v3909_v3  ;;  %v7836_v61 = vpop.f32.mrb[64].mxu0 }
 0x17c   :  { %3573 = vrot.lane.b32.xlu1 %v3541_v16, %s6996_s0  ;;  %v1732_v60 = vcombine.high %v1730_v44, %v1730_v44  ;;  %v7829_v49 = vsel %vm2422_vm3, %v1731_v27, -inf  ;;  %v2532_v40 = vsel %vm2422_vm3, %v1730_v44, -inf  ;;  %v2953_v30 = vrot.slane %v2952_v34, 1  ;;  %v6743_v3 = vpop.f32.mrb[65].mxu0 }
 0x17d   :  { %9764 = vst [vmem:[#allocation36_spill] sm:$0xff] %v7825_v62  ;;  %v2960_v47 = vrot.slane %v2959_v52, 1  ;;  %v2533_v63 = vmax.f32 %v2531_v6, %v2532_v40  ;;  %v3911_v11 = vsel %vm3457_vm6, %v7549_v8, %v3910_v54  ;;  %v2860_v16 = vrot.slane %v7551_v53, 2  ;;  %v7850_v40 = vpop.f32.mrb[66].mxu0 }
 0x17e   :  { %v2535_v41 = vsel %vm2422_vm3, %v1732_v60, -inf  ;;  %v3618_v38 = vsel %vm3453_vm4, %v7687_v15, %v7496_v42  ;;  %v7845_v14 = vmax.f32 %v2952_v34, %v2953_v30  ;;  %v3912_v54 = vsel %vm3459_vm7, %v7554_v9, %v3911_v11  ;;  %v6744_v15 = vpop.f32.mrb[67].mxu0 }
 0x17f   :  { %v7847_v44 = vmax.f32 %v2959_v52, %v2960_v47  ;;  %v2536_v27 = vmax.f32 %v2534_v23, %v2535_v41  ;;  %v2969_v6 = vsel %vm2422_vm3, %v2533_v63, -inf  ;;  %v2861_v29 = vmax.f32 %v7551_v53, %v2860_v16 }
 0x180   :  { %v2970_v60 = vrot.slane %v2969_v6, 4  ;;  %v3619_v45 = vsel %vm3455_vm5, %v7546_v22, %v3618_v38  ;;  %v3913_v47 = vsel %vm3461_vm8, %v7825_v62, %v3912_v54  ;;  %v4052_v52 = vsel %vm3453_vm4, %v7549_v8, %v7546_v22 }
 0x181   :  { %v2976_v34 = vsel %vm2422_vm3, %v2536_v27, -inf  ;;  %v3620_v23 = vsel %vm3457_vm6, %v7549_v8, %v3619_v45  ;;  %v3914_v63 = vsel %vm3463_vm9, %v7654_v2, %v3913_v47  ;;  %v2862_v41 = vrot.slane %v2861_v29, 1 }
 0x182   :  { %v7865_v30 = vmax.f32 %v2969_v6, %v2970_v60  ;;  %v2977_v53 = vrot.slane %v2976_v34, 4  ;;  %v3915_v11 = vsel %vm3465_vm10, %v7660_v4, %v3914_v63  ;;  %v3621_v16 = vsel %vm3459_vm7, %v7554_v9, %v3620_v23 }
 0x183   :  { %v4053_v45 = vsel %vm3455_vm5, %v7554_v9, %v4052_v52  ;;  %v3979_v38 = vsel %vm3453_vm4, %v7546_v22, %v7542_v20  ;;  %3949 = vrot.lane.b32.xlu0 %v3915_v11, %s6991_s11  ;;  %v2863_v6 = vmax.f32 %v2861_v29, %v2862_v41  ;;  %v3622_v60 = vsel %vm3461_vm8, %v7592_v51, %v3621_v16  ;;  %v7898_v41 = vpop.f32.mrb[68].mxu0 }
 0x184   :  { %v2978_v27 = vmax.f32 %v2976_v34, %v2977_v53  ;;  %v4054_v54 = vsel %vm3457_vm6, %v7592_v51, %v4053_v45  ;;  %v3980_v15 = vsel %vm3455_vm5, %v7549_v8, %v3979_v38  ;;  %v1178_v47 = vadd.f32 %v7770_v43, %v7580_v39  ;;  %v6747_v45 = vpop.f32.mrb[69].mxu0 }
 0x185   :  { %v9765_v23 = vcombine.high %v7793_v24, %v7793_v24  ;;  %v3623_v29 = vsel %vm3463_vm9, %v2863_v6, %v3622_v60  ;;  %v7895_v53 = vsel %vm3453_vm4, %v2863_v6, %v7592_v51  ;;  %v4055_v63 = vsel %vm3459_vm7, %v2863_v6, %v4054_v54 }
 0x186   :  { %v2979_v52 = vrot.slane %v2978_v27, 2  ;;  %v3624_v11 = vsel %vm3465_vm10, %v7660_v4, %v3623_v29  ;;  %v4056_v39 = vsel %vm3461_vm8, %v7660_v4, %v4055_v63  ;;  %v3981_v24 = vsel %vm3457_vm6, %v7554_v9, %v3980_v15  ;;  %v7915_v29 = vpop.f32.mrb[70].mxu0 }
 0x187   :  { %v2537_v34 = vsel %vm2422_vm3, %v9765_v23, -inf  ;;  %v1315_v16 = vmax.f32 %v1178_v47, 0.0  ;;  %3656 = vrot.lane.b32.xlu1 %v3624_v11, %s6991_s11  ;;  %v4057_v60 = vsel %vm3463_vm9, %v7676_v56, %v4056_v39  ;;  %v3982_v6 = vsel %vm3459_vm7, %v7592_v51, %v3981_v24  ;;  %v6748_v63 = vpop.f32.mrb[71].mxu0 }
 0x188   :  { %v2980_v38 = vmax.f32 %v2978_v27, %v2979_v52  ;;  %v9766_v54 = vcombine.high %v7802_v13, %v7802_v13  ;;  %v4058_v15 = vsel %vm3465_vm10, %v7680_v25, %v4057_v60  ;;  %v3983_v27 = vsel %vm3461_vm8, %v7654_v2, %v3982_v6 }
 0x189   :  { %v1733_v47 = vcombine.high %v1315_v16, %v1315_v16  ;;  %v1740_v52 = vrot.slane %v1315_v16, %v7077_v12  ;;  %4102 = vst.msk [vmem:[#allocation2 + $0x10] sm:$0xff] %vm3510_vm11, %v4058_v15  ;;  %v3984_v13 = vsel %vm3463_vm9, %v7660_v4, %v3983_v27  ;;  %v1181_v39 = vadd.f32 %v7770_v43, %v7597_v59 }
 0x18a   :  { %v2543_v23 = vsel %vm2422_vm3, %v9766_v54, -inf  ;;  %v2981_v11 = vrot.slane %v2980_v38, 1  ;;  %v9767_v24 = vmax.f32 %v7657_v35, %v7708_v26  ;;  %v3985_v60 = vsel %vm3465_vm10, %v7676_v56, %v3984_v13 }
 0x18b   :  { %v1747_v16 = vrot.slane %v1733_v47, %v7077_v12  ;;  %v1748_v6 = vcombine.high %v1740_v52, %v1740_v52  ;;  %v2538_v54 = vsel %vm2422_vm3, %v1740_v52, -inf  ;;  %4022 = vrot.lane.b32.xlu0 %v3985_v60, %s6997_s1  ;;  %v1316_v63 = vmax.f32 %v1181_v39, 0.0 }
 0x18c   :  { %v2913_v45 = vsel %vm2422_vm3, %v9767_v24, -inf  ;;  %v7935_v15 = vmax.f32 %v2980_v38, %v2981_v11  ;;  %v2539_v27 = vmax.f32 %v2537_v34, %v2538_v54  ;;  %v3474_v13 = vsel %vm3453_vm4, %v7660_v4, %v7654_v2  ;;  %v7945_v11 = vpop.f32.mrb[72].mxu0 }
 0x18d   :  { %v2914_v59 = vrot.slane %v2913_v45, 4  ;;  %v1749_v3 = vcombine.high %v1747_v16, %v1747_v16  ;;  %v2541_v35 = vsel %vm2422_vm3, %v1748_v6, -inf  ;;  %v2544_v26 = vsel %vm2422_vm3, %v1747_v16, -inf  ;;  %v6751_v16 = vpop.f32.mrb[73].mxu0 }
 0x18e   :  { %9768 = vst [vmem:[#allocation37_spill] sm:$0xff] %v7935_v15  ;;  %v2542_v47 = vmax.f32 %v7815_v7, %v2541_v35  ;;  %v2545_v24 = vmax.f32 %v2543_v23, %v2544_v26  ;;  %v2983_v38 = vsel %vm2422_vm3, %v2539_v27, -inf  ;;  %v1750_v52 = vcombine.high %v1316_v63, %v1316_v63 }
 0x18f   :  { %v2547_v34 = vsel %vm2422_vm3, %v1749_v3, -inf  ;;  %v2984_v39 = vrot.slane %v2983_v38, 4  ;;  %v7949_v60 = vrot.slane %v1316_v63, %v7077_v12  ;;  %v2915_v6 = vmax.f32 %v2913_v45, %v2914_v59 }
 0x190   :  { %v2548_v54 = vmax.f32 %v7821_v5, %v2547_v34  ;;  %v2990_v51 = vsel %vm2422_vm3, %v2542_v47, -inf  ;;  %v2997_v7 = vsel %vm2422_vm3, %v2545_v24, -inf  ;;  %v7955_v23 = vrot.slane %v1750_v52, %v7077_v12 }
 0x191   :  { %v2985_v27 = vmax.f32 %v2983_v38, %v2984_v39  ;;  %v2991_v35 = vrot.slane %v2990_v51, 4  ;;  %v2998_v26 = vrot.slane %v2997_v7, 4  ;;  %v1765_v3 = vcombine.high %v7949_v60, %v7949_v60 }
 0x192   :  { %v3004_v63 = vsel %vm2422_vm3, %v2548_v54, -inf  ;;  %v1766_v45 = vcombine.high %v7955_v23, %v7955_v23  ;;  %v7964_v5 = vsel %vm2422_vm3, %v7949_v60, -inf  ;;  %v7968_v59 = vsel %vm2422_vm3, %v7955_v23, -inf }
 0x193   :  { %v2986_v47 = vrot.slane %v2985_v27, 2  ;;  %v2992_v24 = vmax.f32 %v2990_v51, %v2991_v35  ;;  %v7970_v38 = vmax.f32 %v2997_v7, %v2998_v26  ;;  %v3005_v52 = vrot.slane %v3004_v63, 4  ;;  %v7981_v7 = vpop.f32.mrb[74].mxu0 }
 0x194   :  { %v2916_v34 = vrot.slane %v2915_v6, 2  ;;  %v3475_v39 = vsel %vm3455_vm5, %v7676_v56, %v3474_v13  ;;  %v3625_v16 = vsel %vm3453_vm4, %v7680_v25, %v7676_v56  ;;  %v3701_v60 = vsel %vm3453_vm4, %v7554_v9, %v7549_v8  ;;  %v6752_v42 = vpop.f32.mrb[75].mxu0 }
 0x195   :  { %v2987_v54 = vmax.f32 %v2985_v27, %v2986_v47  ;;  %v2993_v23 = vrot.slane %v2992_v24, 2  ;;  %v3006_v51 = vmax.f32 %v3004_v63, %v3005_v52  ;;  %v3476_v26 = vsel %vm3457_vm6, %v7680_v25, %v3475_v39 }
 0x196   :  { %v2917_v35 = vmax.f32 %v2915_v6, %v2916_v34  ;;  %v3702_v13 = vsel %vm3455_vm5, %v7825_v62, %v3701_v60  ;;  %v1186_v20 = vadd.f32 %v7770_v43, %v7619_v55  ;;  %v9769_v34 = vrot.slane %v7647_v57, 4 }
 0x197   :  { %v2988_v37 = vrot.slane %v2987_v54, 1  ;;  %v2994_v9 = vmax.f32 %v2992_v24, %v2993_v23  ;;  %v3007_v27 = vrot.slane %v3006_v51, 2  ;;  %v3703_v47 = vsel %vm3457_vm6, %v7654_v2, %v3702_v13 }
 0x198   :  { %v2918_v63 = vrot.slane %v2917_v35, 1  ;;  %v3704_v6 = vsel %vm3459_vm7, %v7660_v4, %v3703_v47  ;;  %v1317_v52 = vmax.f32 %v1186_v20, 0.0  ;;  %v2908_v39 = vmax.f32 %v7647_v57, %v9769_v34 }
 0x199   :  { %v7996_v60 = vmax.f32 %v2987_v54, %v2988_v37  ;;  %v2995_v22 = vrot.slane %v2994_v9, 1  ;;  %v3008_v55 = vmax.f32 %v3006_v51, %v3007_v27  ;;  %v3705_v42 = vsel %vm3461_vm8, %v7676_v56, %v3704_v6 }
 0x19a   :  { %v2919_v24 = vmax.f32 %v2917_v35, %v2918_v63  ;;  %v3706_v23 = vsel %vm3463_vm9, %v7680_v25, %v3705_v42  ;;  %v1767_v13 = vcombine.high %v1317_v52, %v1317_v52  ;;  %v1774_v2 = vrot.slane %v1317_v52, %v7077_v12 }
 0x19b   :  { %9770 = vst [vmem:[#allocation38_spill] sm:$0xff] %v7996_v60  ;;  %v8003_v47 = vmax.f32 %v2994_v9, %v2995_v22  ;;  %v3009_v20 = vrot.slane %v3008_v55, 1  ;;  %v2909_v62 = vrot.slane %v2908_v39, 2  ;;  %v3836_v37 = vsel %vm3455_vm5, %v7660_v4, %v7895_v53 }
 0x19c   :  { %v3707_v57 = vsel %vm3465_vm10, %v2919_v24, %v3706_v23  ;;  %v8010_v54 = vsel %vm3455_vm5, %v2919_v24, %v3625_v16  ;;  %v3477_v51 = vsel %vm3459_vm7, %v2919_v24, %v3476_v26  ;;  %v1781_v35 = vrot.slane %v1767_v13, %v7077_v12 }
 0x19d   :  { %v8014_v27 = vmax.f32 %v3008_v55, %v3009_v20  ;;  %3739 = vrot.lane.b32.xlu1 %v3707_v57, %s6997_s1  ;;  %v8019_v22 = vsel %vm3461_vm8, %v7751_v36, %v3477_v51  ;;  %v1782_v9 = vcombine.high %v1774_v2, %v1774_v2  ;;  %v8022_v53 = vsel %vm2422_vm3, %v1774_v2, -inf }
 0x19e   :  { %9771 = vst [vmem:[#allocation39_spill] sm:$0xff] %v8019_v22  ;;  %v1783_v63 = vcombine.high %v1781_v35, %v1781_v35  ;;  %v8025_v6 = vsel %vm2422_vm3, %v1781_v35, -inf  ;;  %v2910_v52 = vmax.f32 %v2908_v39, %v2909_v62  ;;  %v3837_v26 = vsel %vm3457_vm6, %v7676_v56, %v3836_v37 }
 0x19f   :  { %v3838_v34 = vsel %vm3459_vm7, %v7680_v25, %v3837_v26  ;;  %v1189_v55 = vadd.f32 %v7770_v43, %v7628_v19  ;;  %v2552_v42 = vsel %vm2422_vm3, %v1765_v3, -inf  ;;  %v2558_v24 = vsel %vm2422_vm3, %v1766_v45, -inf }
 0x1a0   :  { %v2550_v2 = vsel %vm2422_vm3, %v1783_v63, -inf  ;;  %v2911_v23 = vrot.slane %v2910_v52, 1  ;;  %v3839_v13 = vsel %vm3461_vm8, %v7682_v33, %v3838_v34  ;;  %v3542_v62 = vsel %vm3453_vm4, %v7676_v56, %v7660_v4 }
 0x1a1   :  { %v2551_v39 = vmax.f32 %v7964_v5, %v2550_v2  ;;  %v1318_v20 = vmax.f32 %v1189_v55, 0.0  ;;  %v3543_v19 = vsel %vm3455_vm5, %v7680_v25, %v3542_v62  ;;  %v1194_v3 = vadd.f32 %v7770_v43, %v7644_v58 }
 0x1a2   :  { %v2912_v45 = vmax.f32 %v2910_v52, %v2911_v23  ;;  %v3544_v37 = vsel %vm3457_vm6, %v7682_v33, %v3543_v19  ;;  %v8049_v57 = vsel %vm2422_vm3, %v1782_v9, -inf  ;;  %v3626_v51 = vsel %vm3455_vm5, %v7682_v33, %v3625_v16  ;;  %v8075_v19 = vpop.f32.mrb[76].mxu0 }
 0x1a3   :  { %v3011_v35 = vsel %vm2422_vm3, %v2551_v39, -inf  ;;  %v1784_v5 = vcombine.high %v1318_v20, %v1318_v20  ;;  %v1791_v63 = vrot.slane %v1318_v20, %v7077_v12  ;;  %v3545_v26 = vsel %vm3459_vm7, %v7751_v36, %v3544_v37 }
 0x1a4   :  { %v3012_v34 = vrot.slane %v3011_v35, 4  ;;  %v3840_v58 = vsel %vm3463_vm9, %v2912_v45, %v3839_v13  ;;  %v4059_v52 = vsel %vm3453_vm4, %v2912_v45, %v7682_v33  ;;  %v3546_v9 = vsel %vm3461_vm8, %v7755_v32, %v3545_v26 }
 0x1a5   :  { %v3841_v16 = vsel %vm3465_vm10, %v7755_v32, %v3840_v58  ;;  %v4060_v55 = vsel %vm3455_vm5, %v7755_v32, %v4059_v52  ;;  %v1798_v2 = vrot.slane %v1784_v5, %v7077_v12  ;;  %v1799_v23 = vcombine.high %v1791_v63, %v1791_v63 }
 0x1a6   :  { %v8067_v62 = vmax.f32 %v3011_v35, %v3012_v34  ;;  %3873 = vrot.lane.b32.xlu0 %v3841_v16, %s6996_s0  ;;  %v4061_v13 = vsel %vm3457_vm6, %v7757_v1, %v4060_v55  ;;  %v2553_v39 = vsel %vm2422_vm3, %v1791_v63, -inf  ;;  %v3547_v20 = vsel %vm3463_vm9, %v7757_v1, %v3546_v9  ;;  %v6755_v34 = vpop.f32.mrb[77].mxu0 }
 0x1a7   :  { %v4062_v37 = vsel %vm3459_vm7, %v7774_v28, %v4061_v13  ;;  %v1800_v26 = vcombine.high %v1798_v2, %v1798_v2  ;;  %v2554_v5 = vmax.f32 %v2552_v42, %v2553_v39  ;;  %v2556_v35 = vsel %vm2422_vm3, %v1799_v23, -inf }
 0x1a8   :  { %v4063_v52 = vsel %vm3461_vm8, %v7845_v14, %v4062_v37  ;;  %v2557_v63 = vmax.f32 %v7968_v59, %v2556_v35  ;;  %v2559_v16 = vsel %vm2422_vm3, %v1798_v2, -inf }
 0x1a9   :  { %v4064_v9 = vsel %vm3463_vm9, %v7847_v44, %v4063_v52  ;;  %v2560_v55 = vmax.f32 %v2558_v24, %v2559_v16  ;;  %v8088_v13 = vsel %vm2422_vm3, %v1800_v26, -inf  ;;  %v3018_v42 = vsel %vm2422_vm3, %v2554_v5, -inf }
 0x1aa   :  { %v4065_v23 = vsel %vm3465_vm10, %v7935_v15, %v4064_v9  ;;  %v3019_v37 = vrot.slane %v3018_v42, 4  ;;  %v3025_v59 = vsel %vm2422_vm3, %v2557_v63, -inf  ;;  %v3548_v24 = vsel %vm3465_vm10, %v7774_v28, %v3547_v20  ;;  %v8104_v9 = vpop.f32.mrb[78].mxu0 }
 0x1ab   :  { %4103 = vst.msk [vmem:[#allocation2 + $0x28] sm:$0xff] %vm3510_vm11, %v4065_v23  ;;  %v3026_v2 = vrot.slane %v3025_v59, 4  ;;  %v3032_v35 = vsel %vm2422_vm3, %v2560_v55, -inf  ;;  %v1319_v26 = vmax.f32 %v1194_v3, 0.0  ;;  %3575 = vrot.lane.b32.xlu0 %v3548_v24, %s6996_s0  ;;  %v3627_v52 = vsel %vm3457_vm6, %v2912_v45, %v3626_v51  ;;  %v6756_v3 = vpop.f32.mrb[79].mxu0 }
 0x1ac   :  { %v3020_v34 = vmax.f32 %v3018_v42, %v3019_v37  ;;  %v3033_v5 = vrot.slane %v3032_v35, 4  ;;  %v1197_v16 = vadd.f32 %v7770_v43, %v7650_v10  ;;  %v3628_v20 = vsel %vm3459_vm7, %v7755_v32, %v3627_v52  ;;  %v8115_v24 = vpop.f32.mrb[80].mxu0 }
 0x1ad   :  { %v8106_v63 = vmax.f32 %v3025_v59, %v3026_v2  ;;  %v1801_v23 = vcombine.high %v1319_v26, %v1319_v26  ;;  %v1808_v55 = vrot.slane %v1319_v26, %v7077_v12  ;;  %v3629_v45 = vsel %vm3461_vm8, %v7757_v1, %v3628_v20  ;;  %v6759_v58 = vpop.f32.mrb[81].mxu0 }
 0x1ae   :  { %v3021_v42 = vrot.slane %v3020_v34, 2  ;;  %v8111_v37 = vmax.f32 %v3032_v35, %v3033_v5  ;;  %v1320_v51 = vmax.f32 %v1197_v16, 0.0  ;;  %v3630_v35 = vsel %vm3463_vm9, %v7774_v28, %v3629_v45 }
 0x1af   :  { %v1815_v59 = vrot.slane %v1801_v23, %v7077_v12  ;;  %v1816_v2 = vcombine.high %v1808_v55, %v1808_v55  ;;  %v2565_v26 = vsel %vm2422_vm3, %v1808_v55, -inf  ;;  %v3631_v23 = vsel %vm3465_vm10, %v7845_v14, %v3630_v35 }
 0x1b0   :  { %v8120_v39 = vmax.f32 %v3020_v34, %v3021_v42  ;;  %v2566_v52 = vmax.f32 %v8049_v57, %v2565_v26  ;;  %v1818_v5 = vcombine.high %v1320_v51, %v1320_v51  ;;  %3658 = vrot.lane.b32.xlu0 %v3631_v23, %s6991_s11  ;;  %v1825_v57 = vrot.slane %v1320_v51, %v7077_v12 }
 0x1b1   :  { %v1817_v20 = vcombine.high %v1815_v59, %v1815_v59  ;;  %v2568_v16 = vsel %vm2422_vm3, %v1816_v2, -inf  ;;  %v8127_v3 = vsel %vm2422_vm3, %v1815_v59, -inf  ;;  %v9772_v59 = vmax.f32 %v7765_v48, %v7829_v49 }
 0x1b2   :  { %v2569_v58 = vmax.f32 %v8025_v6, %v2568_v16  ;;  %v3046_v34 = vsel %vm2422_vm3, %v2566_v52, -inf  ;;  %v1832_v45 = vrot.slane %v1818_v5, %v7077_v12  ;;  %v3917_v26 = vsel %vm3457_vm6, %v7751_v36, %v8010_v54 }
 0x1b3   :  { %v3047_v42 = vrot.slane %v3046_v34, 4  ;;  %v2962_v2 = vsel %vm2422_vm3, %v9772_v59, -inf  ;;  %v1833_v35 = vcombine.high %v1825_v57, %v1825_v57  ;;  %v8146_v52 = vsel %vm2422_vm3, %v1825_v57, -inf }
 0x1b4   :  { %v3053_v6 = vsel %vm2422_vm3, %v2569_v58, -inf  ;;  %v2963_v16 = vrot.slane %v2962_v2, 4  ;;  %v1834_v10 = vcombine.high %v1832_v45, %v1832_v45  ;;  %v8149_v5 = vsel %vm2422_vm3, %v1832_v45, -inf }
 0x1b5   :  { %v3048_v51 = vmax.f32 %v3046_v34, %v3047_v42  ;;  %v3054_v23 = vrot.slane %v3053_v6, 4  ;;  %v3918_v48 = vsel %vm3459_vm7, %v7755_v32, %v3917_v26  ;;  %v9773_v59 = vrot.slane %v7865_v30, 2 }
 0x1b6   :  { %v2964_v49 = vmax.f32 %v2962_v2, %v2963_v16  ;;  %v3986_v58 = vsel %vm3453_vm4, %v7682_v33, %v7680_v25  ;;  %v3919_v34 = vsel %vm3461_vm8, %v7757_v1, %v3918_v48 }
 0x1b7   :  { %v2973_v54 = vmax.f32 %v7865_v30, %v9773_v59  ;;  %v3049_v57 = vrot.slane %v3048_v51, 2  ;;  %v3055_v55 = vmax.f32 %v3053_v6, %v3054_v23  ;;  %v3987_v42 = vsel %vm3455_vm5, %v7751_v36, %v3986_v58 }
 0x1b8   :  { %v2965_v45 = vrot.slane %v2964_v49, 2  ;;  %v3920_v2 = vsel %vm3463_vm9, %v7774_v28, %v3919_v34  ;;  %v3988_v30 = vsel %vm3457_vm6, %v7755_v32, %v3987_v42  ;;  %v3708_v6 = vsel %vm3453_vm4, %v7755_v32, %v7751_v36 }
 0x1b9   :  { %v2974_v26 = vrot.slane %v2973_v54, 1  ;;  %v3050_v16 = vmax.f32 %v3048_v51, %v3049_v57  ;;  %v3056_v59 = vrot.slane %v3055_v55, 2  ;;  %v3989_v22 = vsel %vm3459_vm7, %v7757_v1, %v3988_v30 }
 0x1ba   :  { %v2966_v23 = vmax.f32 %v2964_v49, %v2965_v45  ;;  %v3990_v58 = vsel %vm3461_vm8, %v7774_v28, %v3989_v22  ;;  %v3709_v34 = vsel %vm3455_vm5, %v7757_v1, %v3708_v6  ;;  %v2573_v22 = vsel %vm2422_vm3, %v1817_v20, -inf }
 0x1bb   :  { %v8172_v48 = vmax.f32 %v2973_v54, %v2974_v26  ;;  %v3051_v33 = vrot.slane %v3050_v16, 1  ;;  %v3057_v42 = vmax.f32 %v3055_v55, %v3056_v59  ;;  %v3991_v51 = vsel %vm3463_vm9, %v7845_v14, %v3990_v58 }
 0x1bc   :  { %v3710_v57 = vsel %vm3457_vm6, %v7774_v28, %v3709_v34  ;;  %v2967_v30 = vrot.slane %v2966_v23, 1  ;;  %v1202_v54 = vadd.f32 %v7770_v43, %v7674_v17  ;;  %v1205_v55 = vadd.f32 %v7770_v43, %v7685_v18 }
 0x1bd   :  { %9774 = vst [vmem:[#allocation40_spill] sm:$0xff] %v8172_v48  ;;  %v3992_v49 = vsel %vm3465_vm10, %v8172_v48, %v3991_v51  ;;  %v8187_v45 = vmax.f32 %v3050_v16, %v3051_v33  ;;  %v3058_v26 = vrot.slane %v3057_v42, 1  ;;  %v2579_v59 = vsel %vm2422_vm3, %v1833_v35, -inf }
 0x1be   :  { %v2968_v6 = vmax.f32 %v2966_v23, %v2967_v30  ;;  %v1321_v58 = vmax.f32 %v1202_v54, 0.0  ;;  %v2585_v34 = vsel %vm2422_vm3, %v1834_v10, -inf  ;;  %v9775_v32 = vrot.slane %v7970_v38, 2  ;;  %v8215_v30 = vpop.f32.mrb[82].mxu0 }
 0x1bf   :  { %v8196_v36 = vmax.f32 %v3057_v42, %v3058_v26  ;;  %v1322_v17 = vmax.f32 %v1205_v55, 0.0  ;;  %v8201_v33 = vsel %vm3453_vm4, %v7774_v28, %v7757_v1  ;;  %v8206_v18 = vsel %vm3453_vm4, %v8003_v47, %v7996_v60  ;;  %v6760_v55 = vpop.f32.mrb[83].mxu0 }
 0x1c0   :  { %v3001_v51 = vmax.f32 %v7970_v38, %v9775_v32  ;;  %v3921_v20 = vsel %vm3465_vm10, %v2968_v6, %v3920_v2  ;;  %v3711_v10 = vsel %vm3459_vm7, %v2968_v6, %v3710_v57  ;;  %v1835_v35 = vcombine.high %v1321_v58, %v1321_v58 }
 0x1c1   :  { %v1842_v32 = vrot.slane %v1321_v58, %v7077_v12  ;;  %3951 = vrot.lane.b32.xlu1 %v3921_v20, %s6991_s11  ;;  %v3712_v38 = vsel %vm3461_vm8, %v8172_v48, %v3711_v10  ;;  %v1852_v16 = vcombine.high %v1322_v17, %v1322_v17  ;;  %v1859_v23 = vrot.slane %v1322_v17, %v7077_v12 }
 0x1c2   :  { %v3002_v42 = vrot.slane %v3001_v51, 1  ;;  %v3713_v54 = vsel %vm3463_vm9, %v7935_v15, %v3712_v38  ;;  %v1849_v2 = vrot.slane %v1835_v35, %v7077_v12 }
 0x1c3   :  { %v1850_v57 = vcombine.high %v1842_v32, %v1842_v32  ;;  %v2588_v26 = vsel %vm2422_vm3, %v1842_v32, -inf  ;;  %v3714_v6 = vsel %vm3465_vm10, %v7996_v60, %v3713_v54  ;;  %v1866_v58 = vrot.slane %v1852_v16, %v7077_v12 }
 0x1c4   :  { %v1867_v20 = vcombine.high %v1859_v23, %v1859_v23  ;;  %v2580_v17 = vsel %vm2422_vm3, %v1859_v23, -inf  ;;  %3741 = vrot.lane.b32.xlu0 %v3714_v6, %s6997_s1  ;;  %v1851_v10 = vcombine.high %v1849_v2, %v1849_v2  ;;  %v2574_v38 = vsel %vm2422_vm3, %v1849_v2, -inf }
 0x1c5   :  { %v2571_v1 = vsel %vm2422_vm3, %v1850_v57, -inf  ;;  %v2581_v35 = vmax.f32 %v2579_v59, %v2580_v17  ;;  %4024 = vrot.lane.b32.xlu1 %v3992_v49, %s6997_s1  ;;  %v2575_v55 = vmax.f32 %v2573_v22, %v2574_v38  ;;  %v1868_v25 = vcombine.high %v1866_v58, %v1866_v58 }
 0x1c6   :  { %v2572_v32 = vmax.f32 %v8127_v3, %v2571_v1  ;;  %v2583_v54 = vsel %vm2422_vm3, %v1867_v20, -inf  ;;  %v2577_v16 = vsel %vm2422_vm3, %v1851_v10, -inf  ;;  %v2586_v6 = vsel %vm2422_vm3, %v1866_v58, -inf }
 0x1c7   :  { %v2584_v23 = vmax.f32 %v8149_v5, %v2583_v54  ;;  %v3081_v56 = vsel %vm2422_vm3, %v2581_v35, -inf  ;;  %v2578_v57 = vmax.f32 %v8146_v52, %v2577_v16  ;;  %v3067_v49 = vsel %vm2422_vm3, %v2575_v55, -inf }
 0x1c8   :  { %v3060_v59 = vsel %vm2422_vm3, %v2572_v32, -inf  ;;  %v2587_v2 = vmax.f32 %v2585_v34, %v2586_v6  ;;  %v3068_v3 = vrot.slane %v3067_v49, 4  ;;  %v2589_v22 = vsel %vm2422_vm3, %v1868_v25, -inf }
 0x1c9   :  { %v3061_v1 = vrot.slane %v3060_v59, 4  ;;  %v3082_v20 = vrot.slane %v3081_v56, 4  ;;  %v3074_v17 = vsel %vm2422_vm3, %v2578_v57, -inf  ;;  %v2590_v10 = vmax.f32 %v2588_v26, %v2589_v22 }
 0x1ca   :  { %v3088_v5 = vsel %vm2422_vm3, %v2584_v23, -inf  ;;  %v3095_v58 = vsel %vm2422_vm3, %v2587_v2, -inf  ;;  %v3069_v35 = vmax.f32 %v3067_v49, %v3068_v3  ;;  %v3075_v52 = vrot.slane %v3074_v17, 4 }
 0x1cb   :  { %v3062_v38 = vmax.f32 %v3060_v59, %v3061_v1  ;;  %v3083_v54 = vmax.f32 %v3081_v56, %v3082_v20  ;;  %v3089_v32 = vrot.slane %v3088_v5, 4  ;;  %v3096_v16 = vrot.slane %v3095_v58, 4 }
 0x1cc   :  { %v3102_v34 = vsel %vm2422_vm3, %v2590_v10, -inf  ;;  %v8243_v55 = vmax.f32 %v3001_v51, %v3002_v42  ;;  %v3070_v25 = vrot.slane %v3069_v35, 2  ;;  %v3076_v4 = vmax.f32 %v3074_v17, %v3075_v52 }
 0x1cd   :  { %v3063_v6 = vrot.slane %v3062_v38, 2  ;;  %v3084_v8 = vrot.slane %v3083_v54, 2  ;;  %v3090_v57 = vmax.f32 %v3088_v5, %v3089_v32  ;;  %v8245_v26 = vmax.f32 %v3095_v58, %v3096_v16 }
 0x1ce   :  { %v3103_v23 = vrot.slane %v3102_v34, 4  ;;  %v3843_v59 = vsel %vm3455_vm5, %v7845_v14, %v8201_v33  ;;  %v3071_v56 = vmax.f32 %v3069_v35, %v3070_v25  ;;  %v3077_v2 = vrot.slane %v3076_v4, 2  ;;  %v8264_v35 = vpop.f32.mrb[84].mxu0 }
 0x1cf   :  { %v3064_v49 = vmax.f32 %v3062_v38, %v3063_v6  ;;  %v3085_v1 = vmax.f32 %v3083_v54, %v3084_v8  ;;  %v3091_v3 = vrot.slane %v3090_v57, 2  ;;  %v3844_v22 = vsel %vm3457_vm6, %v7847_v44, %v3843_v59  ;;  %v6763_v16 = vpop.f32.mrb[85].mxu0 }
 0x1d0   :  { %v8251_v42 = vmax.f32 %v3102_v34, %v3103_v23  ;;  %v3072_v17 = vrot.slane %v3071_v56, 1  ;;  %v3078_v10 = vmax.f32 %v3076_v4, %v3077_v2  ;;  %v3845_v33 = vsel %vm3459_vm7, %v7935_v15, %v3844_v22 }
 0x1d1   :  { %v3065_v20 = vrot.slane %v3064_v49, 1  ;;  %v3086_v5 = vrot.slane %v3085_v1, 1  ;;  %v8255_v58 = vmax.f32 %v3090_v57, %v3091_v3  ;;  %v4067_v8 = vsel %vm3455_vm5, %v8243_v55, %v8206_v18  ;;  %v8279_v57 = vpop.f32.mrb[86].mxu0 }
 0x1d2   :  { %v1210_v38 = vadd.f32 %v7770_v43, %v7712_v0  ;;  %v8266_v54 = vmax.f32 %v3071_v56, %v3072_v17  ;;  %v3079_v32 = vrot.slane %v3078_v10, 1  ;;  %v3846_v34 = vsel %vm3461_vm8, %v7996_v60, %v3845_v33 }
 0x1d3   :  { %v3066_v52 = vmax.f32 %v3064_v49, %v3065_v20  ;;  %v8268_v4 = vmax.f32 %v3085_v1, %v3086_v5  ;;  %v1213_v25 = vadd.f32 %v7770_v43, %v7722_v21  ;;  %v9776_v18 = vrot.slane %v8120_v39, 1  ;;  %v6764_v21 = vpop.f32.mrb[87].mxu0 }
 0x1d4   :  { %v1323_v6 = vmax.f32 %v1210_v38, 0.0  ;;  %v8281_v23 = vmax.f32 %v3078_v10, %v3079_v32  ;;  %v3847_v49 = vsel %vm3463_vm9, %v8003_v47, %v3846_v34  ;;  %v9777_v56 = vrot.slane %v8106_v63, 2 }
 0x1d5   :  { %v8277_v0 = vmax.f32 %v8120_v39, %v9776_v18  ;;  %v3481_v59 = vsel %vm3453_vm4, %v3066_v52, %v7774_v28  ;;  %v3848_v39 = vsel %vm3465_vm10, %v8243_v55, %v3847_v49  ;;  %v1324_v20 = vmax.f32 %v1213_v25, 0.0 }
 0x1d6   :  { %v3029_v2 = vmax.f32 %v8106_v63, %v9777_v56  ;;  %v8292_v1 = vsel %vm3455_vm5, %v8266_v54, %v3481_v59  ;;  %v1869_v3 = vcombine.high %v1323_v6, %v1323_v6  ;;  %v1876_v22 = vrot.slane %v1323_v6, %v7077_v12  ;;  %3875 = vrot.lane.b32.xlu0 %v3848_v39, %s6996_s0 }
 0x1d7   :  { %9778 = vst [vmem:[#allocation41_spill] sm:$0xff] %v8292_v1  ;;  %v3035_v10 = vrot.slane %v8111_v37, 2  ;;  %v9779_v63 = vmax.f32 %v8022_v53, %v8088_v13  ;;  %v1886_v16 = vcombine.high %v1324_v20, %v1324_v20  ;;  %v8306_v34 = vrot.slane %v1324_v20, %v7077_v12 }
 0x1d8   :  { %v3030_v17 = vrot.slane %v3029_v2, 1  ;;  %v1883_v33 = vrot.slane %v1869_v3, %v7077_v12  ;;  %v1884_v38 = vcombine.high %v1876_v22, %v1876_v22  ;;  %v2591_v52 = vsel %vm2422_vm3, %v1876_v22, -inf }
 0x1d9   :  { %v3039_v5 = vsel %vm2422_vm3, %v9779_v63, -inf  ;;  %v3036_v25 = vmax.f32 %v8111_v37, %v3035_v10  ;;  %v3993_v13 = vsel %vm3453_vm4, %v7996_v60, %v7935_v15  ;;  %v1900_v49 = vrot.slane %v1886_v16, %v7077_v12 }
 0x1da   :  { %v3040_v32 = vrot.slane %v3039_v5, 4  ;;  %v8308_v6 = vmax.f32 %v3029_v2, %v3030_v17  ;;  %v1885_v18 = vcombine.high %v1883_v33, %v1883_v33  ;;  %v2597_v59 = vsel %vm2422_vm3, %v1883_v33, -inf }
 0x1db   :  { %v8320_v21 = vsel %vm2422_vm3, %v8306_v34, -inf  ;;  %v3037_v2 = vrot.slane %v3036_v25, 1  ;;  %v3994_v37 = vsel %vm3455_vm5, %v8003_v47, %v3993_v13  ;;  %v4068_v3 = vsel %vm3457_vm6, %v8014_v27, %v4067_v8 }
 0x1dc   :  { %v3041_v53 = vmax.f32 %v3039_v5, %v3040_v32  ;;  %v1218_v22 = vadd.f32 %v7770_v43, %v7740_v50  ;;  %v1902_v20 = vcombine.high %v1900_v49, %v1900_v49  ;;  %v8329_v17 = vsel %vm2422_vm3, %v1900_v49, -inf }
 0x1dd   :  { %v8331_v10 = vmax.f32 %v3036_v25, %v3037_v2  ;;  %v3995_v63 = vsel %vm3457_vm6, %v8243_v55, %v3994_v37  ;;  %v4069_v32 = vsel %vm3459_vm7, %v8308_v6, %v4068_v3  ;;  %v2594_v25 = vsel %vm2422_vm3, %v1884_v38, -inf }
 0x1de   :  { %v3042_v39 = vrot.slane %v3041_v53, 2  ;;  %v3996_v33 = vsel %vm3459_vm7, %v8277_v0, %v3995_v63  ;;  %v1325_v8 = vmax.f32 %v1218_v22, 0.0  ;;  %v2592_v16 = vsel %vm2422_vm3, %v1902_v20, -inf }
 0x1df   :  { %v3997_v50 = vsel %vm3461_vm8, %v8308_v6, %v3996_v33  ;;  %v4070_v43 = vsel %vm3461_vm8, %v8331_v10, %v4069_v32  ;;  %v2593_v13 = vmax.f32 %v2591_v52, %v2592_v16  ;;  %v2600_v3 = vsel %vm2422_vm3, %v1885_v18, -inf }
 0x1e0   :  { %v3043_v5 = vmax.f32 %v3041_v53, %v3042_v39  ;;  %v3998_v53 = vsel %vm3463_vm9, %v8331_v10, %v3997_v50  ;;  %v1903_v2 = vcombine.high %v1325_v8, %v1325_v8  ;;  %v8347_v39 = vpop.f32.mrb[88].mxu0  ;;  %v1910_v37 = vrot.slane %v1325_v8, %v7077_v12 }
 0x1e1   :  { %v9780_v22 = vrot.slane %v8067_v62, 2  ;;  %v3922_v38 = vsel %vm3453_vm4, %v7935_v15, %v8172_v48  ;;  %v6767_v52 = vpop.f32.mrb[89].mxu0  ;;  %v3109_v63 = vsel %vm2422_vm3, %v2593_v13, -inf }
 0x1e2   :  { %v3044_v49 = vrot.slane %v3043_v5, 1  ;;  %v1917_v32 = vrot.slane %v1903_v2, %v7077_v12  ;;  %v3923_v8 = vsel %vm3455_vm5, %v7996_v60, %v3922_v38  ;;  %v3110_v16 = vrot.slane %v3109_v63, 4 }
 0x1e3   :  { %v3015_v20 = vmax.f32 %v8067_v62, %v9780_v22  ;;  %v1918_v18 = vcombine.high %v1910_v37, %v1910_v37  ;;  %v2595_v50 = vsel %vm2422_vm3, %v1910_v37, -inf }
 0x1e4   :  { %v8358_v33 = vmax.f32 %v3043_v5, %v3044_v49  ;;  %v1919_v52 = vcombine.high %v1917_v32, %v1917_v32  ;;  %v2596_v13 = vmax.f32 %v2594_v25, %v2595_v50  ;;  %v3111_v5 = vmax.f32 %v3109_v63, %v3110_v16 }
 0x1e5   :  { %v3016_v51 = vrot.slane %v3015_v20, 1  ;;  %v2598_v2 = vsel %vm2422_vm3, %v1918_v18, -inf  ;;  %v2601_v38 = vsel %vm2422_vm3, %v1917_v32, -inf  ;;  %v3924_v32 = vsel %vm3457_vm6, %v8003_v47, %v3923_v8 }
 0x1e6   :  { %v3999_v62 = vsel %vm3465_vm10, %v8358_v33, %v3998_v53  ;;  %v4071_v22 = vsel %vm3463_vm9, %v8358_v33, %v4070_v43  ;;  %v2599_v37 = vmax.f32 %v2597_v59, %v2598_v2  ;;  %v2602_v56 = vmax.f32 %v2600_v3, %v2601_v38  ;;  %v8384_v59 = vld [vmem:[%s9691_s2] ss:$0 sm:$0xff] }
 0x1e7   :  { %4026 = vrot.lane.b32.xlu0 %v3999_v62, %s6997_s1  ;;  %v4072_v49 = vsel %vm3465_vm10, %v8187_v45, %v4071_v22  ;;  %v2604_v53 = vsel %vm2422_vm3, %v1919_v52, -inf  ;;  %v3116_v43 = vsel %vm2422_vm3, %v2596_v13, -inf  ;;  %v3112_v1 = vrot.slane %v3111_v5, 2 }
 0x1e8   :  { %4104 = vst.msk [vmem:[#allocation2 + $0x40] sm:$0xff] %vm3510_vm11, %v4072_v49  ;;  %v2605_v25 = vmax.f32 %v8320_v21, %v2604_v53  ;;  %v3117_v63 = vrot.slane %v3116_v43, 4  ;;  %v3017_v16 = vmax.f32 %v3015_v20, %v3016_v51  ;;  %v3123_v50 = vsel %vm2422_vm3, %v2599_v37, -inf }
 0x1e9   :  { %v3130_v62 = vsel %vm2422_vm3, %v2602_v56, -inf  ;;  %v1221_v3 = vadd.f32 %v8384_v59, %v7795_v31  ;;  %v3113_v18 = vmax.f32 %v3111_v5, %v3112_v1  ;;  %v3124_v21 = vrot.slane %v3123_v50, 4 }
 0x1ea   :  { %v3118_v22 = vmax.f32 %v3116_v43, %v3117_v63  ;;  %v3131_v52 = vrot.slane %v3130_v62, 4  ;;  %v3137_v51 = vsel %vm2422_vm3, %v2605_v25, -inf  ;;  %v3925_v20 = vsel %vm3459_vm7, %v3017_v16, %v3924_v32 }
 0x1eb   :  { %v1326_v56 = vmax.f32 %v1221_v3, 0.0  ;;  %v9781_v8 = vcombine.high %v8306_v34, %v8306_v34  ;;  %v3114_v49 = vrot.slane %v3113_v18, 1  ;;  %v3125_v38 = vmax.f32 %v3123_v50, %v3124_v21  ;;  %v8404_v3 = vpop.f32.mrb[90].mxu0 }
 0x1ec   :  { %v3119_v2 = vrot.slane %v3118_v22, 2  ;;  %v3132_v37 = vmax.f32 %v3130_v62, %v3131_v52  ;;  %v3138_v53 = vrot.slane %v3137_v51, 4  ;;  %v3926_v31 = vsel %vm3461_vm8, %v8277_v0, %v3925_v20 }
 0x1ed   :  { %v2606_v13 = vsel %vm2422_vm3, %v9781_v8, -inf  ;;  %v1920_v1 = vcombine.high %v1326_v56, %v1326_v56  ;;  %v1927_v5 = vrot.slane %v1326_v56, %v7077_v12  ;;  %v8397_v43 = vmax.f32 %v3113_v18, %v3114_v49 }
 0x1ee   :  { %v8399_v25 = vmax.f32 %v3118_v22, %v3119_v2  ;;  %v3126_v63 = vrot.slane %v3125_v38, 2  ;;  %v3133_v16 = vrot.slane %v3132_v37, 2  ;;  %v3139_v34 = vmax.f32 %v3137_v51, %v3138_v53  ;;  %v6768_v22 = vpop.f32.mrb[91].mxu0 }
 0x1ef   :  { %v3927_v32 = vsel %vm3463_vm9, %v8308_v6, %v3926_v31  ;;  %v1934_v50 = vrot.slane %v1920_v1, %v7077_v12  ;;  %v1935_v62 = vcombine.high %v1927_v5, %v1927_v5  ;;  %v2607_v56 = vsel %vm2422_vm3, %v1927_v5, -inf  ;;  %v8412_v8 = vpop.f32.mrb[92].mxu0 }
 0x1f0   :  { %v3127_v21 = vmax.f32 %v3125_v38, %v3126_v63  ;;  %v3134_v52 = vmax.f32 %v3132_v37, %v3133_v16  ;;  %v3928_v18 = vsel %vm3465_vm10, %v8331_v10, %v3927_v32  ;;  %v3140_v20 = vrot.slane %v3139_v34, 2  ;;  %v6771_v37 = vpop.f32.mrb[93].mxu0 }
 0x1f1   :  { %3953 = vrot.lane.b32.xlu0 %v3928_v18, %s6991_s11  ;;  %v1936_v51 = vcombine.high %v1934_v50, %v1934_v50  ;;  %v2610_v6 = vsel %vm2422_vm3, %v1935_v62, -inf  ;;  %v2608_v53 = vmax.f32 %v2606_v13, %v2607_v56  ;;  %v2612_v10 = vsel %vm2422_vm3, %v1934_v50, -inf  ;;  %v8426_v62 = vpop.f32.mrb[94].mxu0 }
 0x1f2   :  { %v3128_v49 = vrot.slane %v3127_v21, 1  ;;  %v3135_v2 = vrot.slane %v3134_v52, 1  ;;  %v2611_v38 = vmax.f32 %v8329_v17, %v2610_v6  ;;  %v3141_v31 = vmax.f32 %v3139_v34, %v3140_v20  ;;  %9782 = vst [vmem:[#allocation42_spill] sm:$0xff] %v8426_v62  ;;  %v6772_v22 = vpop.f32.mrb[95].mxu0 }
 0x1f3   :  { %v1226_v1 = vadd.f32 %v8384_v59, %v7836_v61  ;;  %v1229_v63 = vadd.f32 %v8384_v59, %v7850_v40  ;;  %v3144_v32 = vsel %vm2422_vm3, %v2608_v53, -inf  ;;  %v2615_v61 = vsel %vm2422_vm3, %v1936_v51, -inf }
 0x1f4   :  { %v8420_v5 = vmax.f32 %v3127_v21, %v3128_v49  ;;  %v8422_v16 = vmax.f32 %v3134_v52, %v3135_v2  ;;  %v3151_v13 = vsel %vm2422_vm3, %v2611_v38, -inf  ;;  %v3142_v17 = vrot.slane %v3141_v31, 1 }
 0x1f5   :  { %v3145_v34 = vrot.slane %v3144_v32, 4  ;;  %v3152_v18 = vrot.slane %v3151_v13, 4  ;;  %v1327_v50 = vmax.f32 %v1226_v1, 0.0  ;;  %v1328_v20 = vmax.f32 %v1229_v63, 0.0 }
 0x1f6   :  { %v1234_v40 = vadd.f32 %v8384_v59, %v7898_v41  ;;  %v1237_v21 = vadd.f32 %v8384_v59, %v7915_v29  ;;  %v8433_v52 = vmax.f32 %v3141_v31, %v3142_v17 }
 0x1f7   :  { %v3146_v56 = vmax.f32 %v3144_v32, %v3145_v34  ;;  %v8435_v6 = vmax.f32 %v3151_v13, %v3152_v18  ;;  %v1937_v49 = vcombine.high %v1327_v50, %v1327_v50  ;;  %v1944_v2 = vrot.slane %v1327_v50, %v7077_v12 }
 0x1f8   :  { %v1954_v53 = vcombine.high %v1328_v20, %v1328_v20  ;;  %v1961_v38 = vrot.slane %v1328_v20, %v7077_v12  ;;  %v1329_v37 = vmax.f32 %v1234_v40, 0.0  ;;  %v1330_v63 = vmax.f32 %v1237_v21, 0.0 }
 0x1f9   :  { %v3147_v1 = vrot.slane %v3146_v56, 2  ;;  %v1951_v41 = vrot.slane %v1937_v49, %v7077_v12  ;;  %v1952_v22 = vcombine.high %v1944_v2, %v1944_v2  ;;  %v2618_v29 = vsel %vm2422_vm3, %v1944_v2, -inf }
 0x1fa   :  { %v1968_v31 = vrot.slane %v1954_v53, %v7077_v12  ;;  %v1969_v32 = vcombine.high %v1961_v38, %v1961_v38  ;;  %v8445_v18 = vsel %vm2422_vm3, %v1961_v38, -inf  ;;  %v1971_v49 = vcombine.high %v1329_v37, %v1329_v37 }
 0x1fb   :  { %v3148_v13 = vmax.f32 %v3146_v56, %v3147_v1  ;;  %v1953_v17 = vcombine.high %v1951_v41, %v1951_v41  ;;  %v2624_v34 = vsel %vm2422_vm3, %v1951_v41, -inf  ;;  %v1978_v2 = vrot.slane %v1329_v37, %v7077_v12  ;;  %v8454_v41 = vpop.f32.mrb[96].mxu0 }
 0x1fc   :  { %v1970_v50 = vcombine.high %v1968_v31, %v1968_v31  ;;  %v2613_v20 = vsel %vm2422_vm3, %v1969_v32, -inf  ;;  %v2616_v40 = vsel %vm2422_vm3, %v1968_v31, -inf  ;;  %v1985_v56 = vrot.slane %v1971_v49, %v7077_v12  ;;  %9783 = vst [vmem:[#allocation43_spill] sm:$0xff] %v8454_v41 }
 0x1fd   :  { %v3149_v21 = vrot.slane %v3148_v13, 1  ;;  %v2614_v51 = vmax.f32 %v2612_v10, %v2613_v20  ;;  %v2617_v0 = vmax.f32 %v2615_v61, %v2616_v40  ;;  %v2621_v1 = vsel %vm2422_vm3, %v1952_v22, -inf  ;;  %v6775_v61 = vpop.f32.mrb[97].mxu0 }
 0x1fe   :  { %v2619_v53 = vsel %vm2422_vm3, %v1970_v50, -inf  ;;  %v2627_v38 = vsel %vm2422_vm3, %v1953_v17, -inf  ;;  %v1986_v40 = vcombine.high %v1978_v2, %v1978_v2  ;;  %v1987_v50 = vcombine.high %v1985_v56, %v1985_v56  ;;  %v1292_v15 = vpop.f32.mrb[98].mxu0 }
 0x1ff   :  { %v8456_v60 = vmax.f32 %v3148_v13, %v3149_v21  ;;  %v2620_v32 = vmax.f32 %v2618_v29, %v2619_v53  ;;  %v3158_v31 = vsel %vm2422_vm3, %v2614_v51, -inf  ;;  %v3165_v10 = vsel %vm2422_vm3, %v2617_v0, -inf  ;;  %v6776_v13 = vpop.f32.mrb[99].mxu0 }
 0x200   :  { %v3159_v20 = vrot.slane %v3158_v31, 4  ;;  %v3166_v37 = vrot.slane %v3165_v10, 4  ;;  %v2622_v22 = vsel %vm2422_vm3, %v1978_v2, -inf  ;;  %v2628_v17 = vsel %vm2422_vm3, %v1985_v56, -inf }
 0x201   :  { %v3172_v49 = vsel %vm2422_vm3, %v2620_v32, -inf  ;;  %v1988_v48 = vcombine.high %v1330_v63, %v1330_v63  ;;  %v2623_v53 = vmax.f32 %v2621_v1, %v2622_v22  ;;  %v2625_v0 = vsel %vm2422_vm3, %v1986_v40, -inf }
 0x202   :  { %v8463_v21 = vmax.f32 %v3158_v31, %v3159_v20  ;;  %v3167_v29 = vmax.f32 %v3165_v10, %v3166_v37  ;;  %v3173_v51 = vrot.slane %v3172_v49, 4  ;;  %v2629_v61 = vmax.f32 %v2627_v38, %v2628_v17 }
 0x203   :  { %v8467_v28 = vsel %vm2422_vm3, %v1987_v50, -inf  ;;  %v8470_v15 = vrot.slane %v1330_v63, %v7077_v12  ;;  %v2626_v41 = vmax.f32 %v2624_v34, %v2625_v0  ;;  %v3179_v31 = vsel %vm2422_vm3, %v2623_v53, -inf }
 0x204   :  { %v3168_v32 = vrot.slane %v3167_v29, 2  ;;  %v3174_v2 = vmax.f32 %v3172_v49, %v3173_v51  ;;  %v3193_v10 = vsel %vm2422_vm3, %v2629_v61, -inf  ;;  %v2002_v1 = vrot.slane %v1988_v48, %v7077_v12 }
 0x205   :  { %v2003_v38 = vcombine.high %v8470_v15, %v8470_v15  ;;  %v3180_v40 = vrot.slane %v3179_v31, 4  ;;  %v3186_v63 = vsel %vm2422_vm3, %v2626_v41, -inf  ;;  %v3194_v49 = vrot.slane %v3193_v10, 4 }
 0x206   :  { %v3169_v20 = vmax.f32 %v3167_v29, %v3168_v32  ;;  %v3175_v37 = vrot.slane %v3174_v2, 2  ;;  %v3187_v50 = vrot.slane %v3186_v63, 4  ;;  %v2004_v34 = vcombine.high %v2002_v1, %v2002_v1 }
 0x207   :  { %v8482_v22 = vsel %vm2422_vm3, %v8470_v15, -inf  ;;  %v3181_v51 = vmax.f32 %v3179_v31, %v3180_v40  ;;  %v8485_v48 = vsel %vm2422_vm3, %v2002_v1, -inf  ;;  %v3195_v0 = vmax.f32 %v3193_v10, %v3194_v49 }
 0x208   :  { %v3170_v17 = vrot.slane %v3169_v20, 1  ;;  %v3176_v13 = vmax.f32 %v3174_v2, %v3175_v37  ;;  %v3188_v53 = vmax.f32 %v3186_v63, %v3187_v50  ;;  %v1242_v29 = vadd.f32 %v8384_v59, %v7945_v11 }
 0x209   :  { %v3093_v41 = vrot.slane %v8255_v58, 1  ;;  %v3182_v56 = vrot.slane %v3181_v51, 2  ;;  %v9784_v15 = vrot.slane %v8245_v26, 2  ;;  %v3196_v31 = vrot.slane %v3195_v0, 2 }
 0x20a   :  { %v8490_v61 = vmax.f32 %v3169_v20, %v3170_v17  ;;  %v3177_v32 = vrot.slane %v3176_v13, 1  ;;  %v3189_v2 = vrot.slane %v3188_v53, 2  ;;  %v1331_v37 = vmax.f32 %v1242_v29, 0.0 }
 0x20b   :  { %v3099_v62 = vmax.f32 %v8245_v26, %v9784_v15  ;;  %v8496_v1 = vmax.f32 %v8255_v58, %v3093_v41  ;;  %v3183_v40 = vmax.f32 %v3181_v51, %v3182_v56  ;;  %v9785_v63 = vrot.slane %v8399_v25, 1 }
 0x20c   :  { %v8498_v10 = vmax.f32 %v3176_v13, %v3177_v32  ;;  %v3190_v50 = vmax.f32 %v3188_v53, %v3189_v2  ;;  %v3197_v49 = vmax.f32 %v3195_v0, %v3196_v31  ;;  %v2005_v17 = vcombine.high %v1331_v37, %v1331_v37  ;;  %v6816_v13 = vld [vmem:[%s9692_s3] sm:$0xff]  }
 0x20d   :  { %v3100_v11 = vrot.slane %v3099_v62, 1  ;;  %v8503_v20 = vmax.f32 %v8399_v25, %v9785_v63  ;;  %v8506_v26 = vrot.slane %v1331_v37, %v7077_v12  ;;  %v3184_v15 = vrot.slane %v3183_v40, 1  ;;  %v6815_v25 = vld [vmem:[%s9692_s3 + $0x40] sm:$0xff]  }
 0x20e   :  { %v3549_v58 = vsel %vm3453_vm4, %v8266_v54, %v7845_v14  ;;  %v3191_v51 = vrot.slane %v3190_v50, 1  ;;  %v3198_v53 = vrot.slane %v3197_v49, 1  ;;  %v2019_v54 = vrot.slane %v2005_v17, %v7077_v12  ;;  %6488 = vmatprep.subr.bf16.mxu1 %v6815_v25 }
 0x20f   :  { %9786 = vst [vmem:[#allocation44_spill] sm:$0xff] %v8503_v20  ;;  %v3101_v29 = vmax.f32 %v3099_v62, %v3100_v11  ;;  %v8514_v56 = vsel %vm3453_vm4, %v8503_v20, %v8243_v55  ;;  %v6817_v62 = vld [vmem:[%s9692_s3 + $0x48] sm:$0xff]   ;;  %v2020_v55 = vcombine.high %v8506_v26, %v8506_v26  ;;  %v8528_v0 = vmax.f32 %v3183_v40, %v3184_v15 }
 0x210   :  { %v8532_v41 = vsel %vm2422_vm3, %v8506_v26, -inf  ;;  %v3550_v32 = vsel %vm3455_vm5, %v8281_v23, %v3549_v58  ;;  %v1245_v2 = vadd.f32 %v8384_v59, %v7981_v7  ;;  %v8538_v31 = vmax.f32 %v3190_v50, %v3191_v51  ;;  %6489 = vmatpush3.bf16.msra.mxu1 %v6816_v13  ;;  %v6818_v40 = vld [vmem:[%s9692_s3 + $0x8] sm:$0xff]  }
 0x211   :  { %v8540_v37 = vmax.f32 %v3197_v49, %v3198_v53  ;;  %v2021_v11 = vcombine.high %v2019_v54, %v2019_v54  ;;  %v8543_v63 = vsel %vm2422_vm3, %v2019_v54, -inf  ;;  %v3551_v17 = vsel %vm3457_vm6, %v8268_v4, %v3550_v32  ;;  %6490 = vmatprep.subr.bf16.mxu1 %v6817_v62  ;;  %v6819_v49 = vld [vmem:[%s9692_s3 + $0x50] sm:$0xff]  }
 0x212   :  { %v1332_v26 = vmax.f32 %v1245_v2, 0.0  ;;  %v2636_v7 = vsel %vm2422_vm3, %v2003_v38, -inf  ;;  %v2642_v50 = vsel %vm2422_vm3, %v2004_v34, -inf  ;;  %v3552_v58 = vsel %vm3459_vm7, %v8496_v1, %v3551_v17 }
 0x213   :  { %9787 = vst [vmem:[#allocation45_spill] sm:$0xff] %v8540_v37  ;;  %v2634_v15 = vsel %vm2422_vm3, %v2021_v11, -inf  ;;  %v3105_v25 = vrot.slane %v8251_v42, 2  ;;  %v3632_v13 = vsel %vm3453_vm4, %v8281_v23, %v7847_v44  ;;  %v3553_v34 = vsel %vm3461_vm8, %v3101_v29, %v3552_v58  ;;  %v6820_v44 = vld [vmem:[%s9692_s3 + $0x10] sm:$0xff]  }
 0x214   :  { %v2635_v38 = vmax.f32 %v8482_v22, %v2634_v15  ;;  %v2022_v62 = vcombine.high %v1332_v26, %v1332_v26  ;;  %v2029_v51 = vrot.slane %v1332_v26, %v7077_v12  ;;  %v3554_v53 = vsel %vm3463_vm9, %v8503_v20, %v3553_v34  ;;  %6491 = vmatpush3.bf16.msra.mxu1 %v6818_v40  ;;  %v6821_v26 = vld [vmem:[%s9692_s3 + $0x58] sm:$0xff]  }
 0x215   :  { %v3106_v54 = vmax.f32 %v8251_v42, %v3105_v25  ;;  %v3633_v32 = vsel %vm3455_vm5, %v8268_v4, %v3632_v13  ;;  %v1250_v2 = vadd.f32 %v8384_v59, %v8075_v19  ;;  %v3555_v11 = vsel %vm3465_vm10, %v8420_v5, %v3554_v53  ;;  %6492 = vmatprep.subr.bf16.mxu1 %v6819_v49 }
 0x216   :  { %v8576_v22 = vsel %vm2422_vm3, %v2635_v38, -inf  ;;  %v2036_v17 = vrot.slane %v2022_v62, %v7077_v12  ;;  %v2037_v42 = vcombine.high %v2029_v51, %v2029_v51  ;;  %3577 = vrot.lane.b32.xlu1 %v3555_v11, %s6996_s0  ;;  %v2637_v40 = vsel %vm2422_vm3, %v2029_v51, -inf  ;;  %v6822_v51 = vld [vmem:[%s9692_s3 + $0x18] sm:$0xff]  }
 0x217   :  { %v3107_v15 = vrot.slane %v3106_v54, 1  ;;  %v3634_v58 = vsel %vm3457_vm6, %v8496_v1, %v3633_v32  ;;  %v2638_v13 = vmax.f32 %v2636_v7, %v2637_v40  ;;  %v1333_v7 = vmax.f32 %v1250_v2, 0.0 }
 0x218   :  { %v2038_v25 = vcombine.high %v2036_v17, %v2036_v17  ;;  %v2640_v38 = vsel %vm2422_vm3, %v2037_v42, -inf  ;;  %v2643_v49 = vsel %vm2422_vm3, %v2036_v17, -inf  ;;  %v3635_v19 = vsel %vm3459_vm7, %v3101_v29, %v3634_v58  ;;  %6493 = vmatpush3.bf16.msra.mxu1 %v6820_v44 }
 0x219   :  { %v2641_v34 = vmax.f32 %v8485_v48, %v2640_v38  ;;  %v2644_v62 = vmax.f32 %v2642_v50, %v2643_v49  ;;  %v3108_v53 = vmax.f32 %v3106_v54, %v3107_v15  ;;  %v3214_v32 = vsel %vm2422_vm3, %v2638_v13, -inf  ;;  %6494 = vmatprep.subr.bf16.mxu1 %v6821_v26  ;;  %v6823_v48 = vld [vmem:[%s9692_s3 + $0x60] sm:$0xff]  }
 0x21a   :  { %v2646_v11 = vsel %vm2422_vm3, %v2038_v25, -inf  ;;  %v2648_v42 = vsel %vm2422_vm3, %v2020_v55, -inf  ;;  %v3215_v29 = vrot.slane %v3214_v32, 4  ;;  %v2039_v58 = vcombine.high %v1333_v7, %v1333_v7 }
 0x21b   :  { %v2647_v50 = vmax.f32 %v8532_v41, %v2646_v11  ;;  %v3221_v54 = vsel %vm2422_vm3, %v2641_v34, -inf  ;;  %v3228_v44 = vsel %vm2422_vm3, %v2644_v62, -inf  ;;  %v3636_v15 = vsel %vm3461_vm8, %v3108_v53, %v3635_v19  ;;  %v6824_v41 = vld [vmem:[%s9692_s3 + $0x20] sm:$0xff]   ;;  %v6825_v34 = vld [vmem:[%s9692_s3 + $0x68] sm:$0xff]  }
 0x21c   :  { %v3222_v17 = vrot.slane %v3221_v54, 4  ;;  %v3229_v40 = vrot.slane %v3228_v44, 4  ;;  %v3216_v2 = vmax.f32 %v3214_v32, %v3215_v29  ;;  %v3637_v26 = vsel %vm3463_vm9, %v8420_v5, %v3636_v15  ;;  %6495 = vmatpush3.bf16.msra.mxu1 %v6822_v51 }
 0x21d   :  { %v3235_v55 = vsel %vm2422_vm3, %v2647_v50, -inf  ;;  %v2046_v25 = vrot.slane %v1333_v7, %v7077_v12  ;;  %v3638_v19 = vsel %vm3465_vm10, %v8422_v16, %v3637_v26  ;;  %6496 = vmatprep.subr.bf16.mxu1 %v6823_v48  ;;  %v8620_v53 = vrot.slane %v2039_v58, %v7077_v12 }
 0x21e   :  { %v3223_v13 = vmax.f32 %v3221_v54, %v3222_v17  ;;  %v3230_v38 = vmax.f32 %v3228_v44, %v3229_v40  ;;  %v3236_v49 = vrot.slane %v3235_v55, 4  ;;  %v3217_v62 = vrot.slane %v3216_v2, 2  ;;  %3660 = vrot.lane.b32.xlu1 %v3638_v19, %s6991_s11 }
 0x21f   :  { %v2054_v51 = vcombine.high %v2046_v25, %v2046_v25  ;;  %v2649_v11 = vsel %vm2422_vm3, %v2046_v25, -inf  ;;  %v2055_v48 = vcombine.high %v8620_v53, %v8620_v53  ;;  %v8628_v17 = vsel %vm2422_vm3, %v8620_v53, -inf }
 0x220   :  { %v3224_v32 = vrot.slane %v3223_v13, 2  ;;  %v3231_v7 = vrot.slane %v3230_v38, 2  ;;  %v3237_v50 = vmax.f32 %v3235_v55, %v3236_v49  ;;  %v2650_v29 = vmax.f32 %v2648_v42, %v2649_v11  ;;  %6497 = vmatpush3.bf16.msra.mxu1 %v6824_v41  ;;  %v6826_v49 = vld [vmem:[%s9692_s3 + $0x28] sm:$0xff]   ;;  %v6827_v41 = vld [vmem:[%s9692_s3 + $0x70] sm:$0xff]  }
 0x221   :  { %v3218_v54 = vmax.f32 %v3216_v2, %v3217_v62  ;;  %v2652_v44 = vsel %vm2422_vm3, %v2054_v51, -inf  ;;  %6498 = vmatprep.subr.bf16.mxu1 %v6825_v34  ;;  %v1253_v2 = vadd.f32 %v8384_v59, %v8104_v9  ;;  %v3161_v55 = vrot.slane %v8463_v21, 2 }
 0x222   :  { %v3225_v40 = vmax.f32 %v3223_v13, %v3224_v32  ;;  %v3232_v15 = vmax.f32 %v3230_v38, %v3231_v7  ;;  %v3238_v58 = vrot.slane %v3237_v50, 2  ;;  %v2653_v26 = vmax.f32 %v8543_v63, %v2652_v44 }
 0x223   :  { %v3219_v25 = vrot.slane %v3218_v54, 1  ;;  %v3242_v42 = vsel %vm2422_vm3, %v2650_v29, -inf  ;;  %v1334_v9 = vmax.f32 %v1253_v2, 0.0  ;;  %v3162_v53 = vmax.f32 %v8463_v21, %v3161_v55  ;;  %v6829_v21 = vld [vmem:[%s9692_s3 + $0x78] sm:$0xff]  }
 0x224   :  { %v3226_v13 = vrot.slane %v3225_v40, 1  ;;  %v3233_v38 = vrot.slane %v3232_v15, 1  ;;  %v3239_v63 = vmax.f32 %v3237_v50, %v3238_v58  ;;  %v3243_v19 = vrot.slane %v3242_v42, 4  ;;  %6499 = vmatpush3.bf16.msra.mxu1 %v6826_v49  ;;  %v6828_v58 = vld [vmem:[%s9692_s3 + $0x30] sm:$0xff]  }
 0x225   :  { %v8641_v34 = vmax.f32 %v3218_v54, %v3219_v25  ;;  %v8644_v62 = vsel %vm2422_vm3, %v2653_v26, -inf  ;;  %6500 = vmatprep.subr.bf16.mxu1 %v6827_v41  ;;  %v2056_v50 = vcombine.high %v1334_v9, %v1334_v9  ;;  %v2063_v54 = vrot.slane %v1334_v9, %v7077_v12  ;;  %v6830_v41 = vld [vmem:[%s9692_s3 + $0x38] sm:$0xff]  }
 0x226   :  { %v8647_v51 = vmax.f32 %v3225_v40, %v3226_v13  ;;  %v8649_v11 = vmax.f32 %v3232_v15, %v3233_v38  ;;  %v3240_v32 = vrot.slane %v3239_v63, 1  ;;  %v3244_v7 = vmax.f32 %v3242_v42, %v3243_v19 }
 0x227   :  { %v3163_v44 = vrot.slane %v3162_v53, 1  ;;  %v3488_v26 = vsel %vm3453_vm4, %v8422_v16, %v8420_v5  ;;  %v3715_v25 = vsel %vm3453_vm4, %v8397_v43, %v8003_v47  ;;  %v8668_v42 = vrot.slane %v2056_v50, %v7077_v12 }
 0x228   :  { %v8659_v40 = vmax.f32 %v3239_v63, %v3240_v32  ;;  %v3245_v15 = vrot.slane %v3244_v7, 2  ;;  %v2071_v2 = vcombine.high %v2063_v54, %v2063_v54  ;;  %v8671_v55 = vsel %vm2422_vm3, %v2063_v54, -inf  ;;  %6501 = vmatpush3.bf16.msra.mxu1 %v6828_v58 }
 0x229   :  { %v3164_v49 = vmax.f32 %v3162_v53, %v3163_v44  ;;  %v3489_v38 = vsel %vm3455_vm5, %v8433_v52, %v3488_v26  ;;  %v3716_v63 = vsel %vm3455_vm5, %v8503_v20, %v3715_v25  ;;  %v1258_v19 = vadd.f32 %v8384_v59, %v8115_v24  ;;  %6502 = vmatprep.subr.bf16.mxu1 %v6829_v21 }
 0x22a   :  { %v3246_v13 = vmax.f32 %v3244_v7, %v3245_v15  ;;  %v2072_v9 = vcombine.high %v8668_v42, %v8668_v42  ;;  %v8686_v53 = vsel %vm2422_vm3, %v8668_v42, -inf  ;;  %v3717_v7 = vsel %vm3457_vm6, %v8420_v5, %v3716_v63  ;;  %v9790_v63 = vld [vmem:[#allocation12_spill] sm:$0xff] }
 0x22b   :  { %v3490_v32 = vsel %vm3457_vm6, %v3164_v49, %v3489_v38  ;;  %v3718_v54 = vsel %vm3459_vm7, %v8422_v16, %v3717_v7  ;;  %v8695_v24 = vsel %vm3453_vm4, %v3164_v49, %v8358_v33  ;;  %v1335_v21 = vmax.f32 %v1258_v19, 0.0 }
 0x22c   :  { %v3247_v50 = vrot.slane %v3246_v13, 1  ;;  %v8699_v44 = vsel %vm3459_vm7, %v8490_v61, %v3490_v32  ;;  %v3719_v58 = vsel %vm3461_vm8, %v8433_v52, %v3718_v54  ;;  %v2657_v15 = vsel %vm2422_vm3, %v2055_v48, -inf  ;;  %6503 = vmatpush3.bf16.msra.mxu1 %v6830_v41  ;;  %v9791_v41 = vld [vmem:[#allocation13_spill] sm:$0xff] }
 0x22d   :  { %v9788_v26 = vrot.slane %v8435_v6, 2  ;;  %v3720_v33 = vsel %vm3463_vm9, %v3164_v49, %v3719_v58  ;;  %v3849_v38 = vsel %vm3453_vm4, %v8420_v5, %v8014_v27  ;;  %v3458_v32 = vsel %vm3457_vm6, %v9790_v63, %v7409_v46 }
 0x22e   :  { %v8707_v42 = vmax.f32 %v3246_v13, %v3247_v50  ;;  %v3721_v48 = vsel %vm3465_vm10, %v8490_v61, %v3720_v33  ;;  %v2073_v19 = vcombine.high %v1335_v21, %v1335_v21  ;;  %v2080_v7 = vrot.slane %v1335_v21, %v7077_v12 }
 0x22f   :  { %v3155_v25 = vmax.f32 %v8435_v6, %v9788_v26  ;;  %3743 = vrot.lane.b32.xlu1 %v3721_v48, %s6997_s1  ;;  %v3850_v49 = vsel %vm3455_vm5, %v8422_v16, %v3849_v38  ;;  %v3460_v13 = vsel %vm3459_vm7, %v9791_v41, %v3458_v32  ;;  %v1261_v27 = vadd.f32 %v8384_v59, %v8215_v30  ;;  %v9792_v26 = vld [vmem:[#allocation14_spill] sm:$0xff] }
 0x230   :  { %9789 = vst [vmem:[#allocation46_spill] sm:$0xff] %v8707_v42  ;;  %v2087_v46 = vrot.slane %v2073_v19, %v7077_v12  ;;  %v2088_v50 = vcombine.high %v2080_v7, %v2080_v7  ;;  %v8728_v54 = vsel %vm2422_vm3, %v2080_v7, -inf  ;;  %v3851_v21 = vsel %vm3457_vm6, %v8433_v52, %v3850_v49  ;;  %v9793_v49 = vld [vmem:[#allocation23_spill] sm:$0xff] }
 0x231   :  { %v3156_v6 = vrot.slane %v3155_v25, 1  ;;  %v3462_v33 = vsel %vm3461_vm8, %v9792_v26, %v3460_v13  ;;  %v1336_v38 = vmax.f32 %v1261_v27, 0.0  ;;  %v2663_v63 = vsel %vm2422_vm3, %v2071_v2, -inf  ;;  %v3572_v13 = vpop.permute.xlu1 %3571 }
 0x232   :  { %v2089_v32 = vcombine.high %v2087_v46, %v2087_v46  ;;  %v2655_v30 = vsel %vm2422_vm3, %v2088_v50, -inf  ;;  %v2658_v48 = vsel %vm2422_vm3, %v2087_v46, -inf  ;;  %v3852_v19 = vsel %vm3459_vm7, %v8456_v60, %v3851_v21  ;;  %v9794_v50 = vld [vmem:[#allocation16_spill] sm:$0xff] }
 0x233   :  { %v8730_v58 = vmax.f32 %v3155_v25, %v3156_v6  ;;  %v2656_v25 = vmax.f32 %v8628_v17, %v2655_v30  ;;  %v2659_v7 = vmax.f32 %v2657_v15, %v2658_v48  ;;  %v3464_v41 = vsel %vm3463_vm9, %v9793_v49, %v3462_v33  ;;  %v3655_v33 = vpop.permute.xlu0 %3654 }
 0x234   :  { %v2661_v2 = vsel %vm2422_vm3, %v2089_v32, -inf  ;;  %v3466_v46 = vsel %vm3465_vm10, %v9794_v50, %v3464_v41  ;;  %v2090_v26 = vcombine.high %v1336_v38, %v1336_v38 }
 0x235   :  { %v3853_v6 = vsel %vm3461_vm8, %v8730_v58, %v3852_v19  ;;  %v2662_v21 = vmax.f32 %v8671_v55, %v2661_v2  ;;  %v3256_v17 = vsel %vm2422_vm3, %v2656_v25, -inf  ;;  %v3263_v15 = vsel %vm2422_vm3, %v2659_v7, -inf  ;;  %3511 = vst.msk [vmem:[#allocation2] sm:$0xff] %vm3510_vm11, %v3466_v46 }
 0x236   :  { %v3854_v27 = vsel %vm3463_vm9, %v8498_v10, %v3853_v6  ;;  %v3257_v32 = vrot.slane %v3256_v17, 4  ;;  %v3264_v48 = vrot.slane %v3263_v15, 4  ;;  %3593 = vst.msk [vmem:[#allocation2] sm:$0xff] %vm3592_vm12, %v3572_v13  ;;  %v2097_v19 = vrot.slane %v1336_v38, %v7077_v12 }
 0x237   :  { %v3855_v30 = vsel %vm3465_vm10, %v8528_v0, %v3854_v27  ;;  %v2104_v55 = vrot.slane %v2090_v26, %v7077_v12  ;;  %v3270_v25 = vsel %vm2422_vm3, %v2662_v21, -inf  ;;  %v2669_v7 = vsel %vm2422_vm3, %v2072_v9, -inf  ;;  %3676 = vst.msk [vmem:[#allocation2] sm:$0xff] %vm3675_vm13, %v3655_v33 }
 0x238   :  { %3877 = vrot.lane.b32.xlu1 %v3855_v30, %s6996_s0  ;;  %v3556_v6 = vsel %vm3453_vm4, %v8433_v52, %v8422_v16  ;;  %v3258_v49 = vmax.f32 %v3256_v17, %v3257_v32  ;;  %v3265_v41 = vmax.f32 %v3263_v15, %v3264_v48  ;;  %v3271_v2 = vrot.slane %v3270_v25, 4 }
 0x239   :  { %v2105_v27 = vcombine.high %v2097_v19, %v2097_v19  ;;  %v2106_v13 = vcombine.high %v2104_v55, %v2104_v55  ;;  %v2664_v38 = vsel %vm2422_vm3, %v2097_v19, -inf  ;;  %v2670_v50 = vsel %vm2422_vm3, %v2104_v55, -inf }
 0x23a   :  { %v3557_v46 = vsel %vm3455_vm5, %v8456_v60, %v3556_v6  ;;  %v3259_v9 = vrot.slane %v3258_v49, 2  ;;  %v3266_v26 = vrot.slane %v3265_v41, 2  ;;  %v3272_v21 = vmax.f32 %v3270_v25, %v3271_v2 }
 0x23b   :  { %v2665_v30 = vmax.f32 %v2663_v63, %v2664_v38  ;;  %v2667_v29 = vsel %vm2422_vm3, %v2105_v27, -inf  ;;  %v2671_v17 = vmax.f32 %v2669_v7, %v2670_v50  ;;  %v2673_v15 = vsel %vm2422_vm3, %v2106_v13, -inf }
 0x23c   :  { %v3558_v33 = vsel %vm3457_vm6, %v8490_v61, %v3557_v46  ;;  %v8775_v32 = vmax.f32 %v3258_v49, %v3259_v9  ;;  %v3267_v48 = vmax.f32 %v3265_v41, %v3266_v26  ;;  %v3273_v19 = vrot.slane %v3272_v21, 2 }
 0x23d   :  { %v2668_v55 = vmax.f32 %v8686_v53, %v2667_v29  ;;  %v2674_v6 = vmax.f32 %v8728_v54, %v2673_v15  ;;  %v3277_v20 = vsel %vm2422_vm3, %v2665_v30, -inf  ;;  %v3291_v63 = vsel %vm2422_vm3, %v2671_v17, -inf }
 0x23e   :  { %v3559_v25 = vsel %vm3459_vm7, %v8498_v10, %v3558_v33  ;;  %v3268_v2 = vrot.slane %v3267_v48, 1  ;;  %v3274_v27 = vmax.f32 %v3272_v21, %v3273_v19  ;;  %v3278_v13 = vrot.slane %v3277_v20, 4 }
 0x23f   :  { %v3284_v49 = vsel %vm2422_vm3, %v2668_v55, -inf  ;;  %v3292_v41 = vrot.slane %v3291_v63, 4  ;;  %v3298_v38 = vsel %vm2422_vm3, %v2674_v6, -inf  ;;  %v3560_v29 = vsel %vm3461_vm8, %v8528_v0, %v3559_v25 }
 0x240   :  { %v8788_v53 = vmax.f32 %v3267_v48, %v3268_v2  ;;  %v3275_v54 = vrot.slane %v3274_v27, 1  ;;  %v3279_v50 = vmax.f32 %v3277_v20, %v3278_v13  ;;  %v3285_v46 = vrot.slane %v3284_v49, 4 }
 0x241   :  { %v3293_v9 = vmax.f32 %v3291_v63, %v3292_v41  ;;  %v3299_v26 = vrot.slane %v3298_v38, 4  ;;  %v3561_v30 = vsel %vm3463_vm9, %v8538_v31, %v3560_v29  ;;  %v9795_v21 = vmax.f32 %v8445_v18, %v8467_v28 }
 0x242   :  { %v8796_v15 = vmax.f32 %v3274_v27, %v3275_v54  ;;  %v3280_v33 = vrot.slane %v3279_v50, 2  ;;  %v3286_v19 = vmax.f32 %v3284_v49, %v3285_v46  ;;  %v3562_v48 = vsel %vm3465_vm10, %v8540_v37, %v3561_v30 }
 0x243   :  { %v3200_v17 = vsel %vm2422_vm3, %v9795_v21, -inf  ;;  %v3294_v55 = vrot.slane %v3293_v9, 2  ;;  %v8800_v20 = vmax.f32 %v3298_v38, %v3299_v26  ;;  %3579 = vrot.lane.b32.xlu0 %v3562_v48, %s6996_s0  ;;  %v3639_v63 = vsel %vm3453_vm4, %v8456_v60, %v8433_v52 }
 0x244   :  { %v3201_v6 = vrot.slane %v3200_v17, 4  ;;  %v3281_v28 = vmax.f32 %v3279_v50, %v3280_v33  ;;  %v3287_v18 = vrot.slane %v3286_v19, 2  ;;  %v3640_v25 = vsel %vm3455_vm5, %v8730_v58, %v3639_v63  ;;  %v8819_v50 = vpop.permute.xlu0 %3871 }
 0x245   :  { %v3856_v2 = vsel %vm3453_vm4, %v8540_v37, %v8538_v31  ;;  %v3295_v27 = vmax.f32 %v3293_v9, %v3294_v55  ;;  %v3641_v41 = vsel %vm3457_vm6, %v8498_v10, %v3640_v25  ;;  %v4073_v58 = vsel %vm3453_vm4, %v8498_v10, %v8196_v36  ;;  %v9796_v25 = vld [vmem:[#allocation24_spill] sm:$0xff] }
 0x246   :  { %v3202_v49 = vmax.f32 %v3200_v17, %v3201_v6  ;;  %v3282_v38 = vrot.slane %v3281_v28, 1  ;;  %v3288_v29 = vmax.f32 %v3286_v19, %v3287_v18  ;;  %v3642_v54 = vsel %vm3459_vm7, %v8528_v0, %v3641_v41  ;;  %v9797_v41 = vld [vmem:[#allocation15_spill] sm:$0xff] }
 0x247   :  { %v3296_v46 = vrot.slane %v3295_v27, 1  ;;  %v3643_v9 = vsel %vm3461_vm8, %v8538_v31, %v3642_v54  ;;  %v4074_v30 = vsel %vm3455_vm5, %v8528_v0, %v4073_v58  ;;  %v1266_v6 = vadd.f32 %v8384_v59, %v8264_v35  ;;  %v9798_v58 = vld [vmem:[#allocation17_spill] sm:$0xff] }
 0x248   :  { %v3203_v26 = vrot.slane %v3202_v49, 2  ;;  %v8825_v21 = vmax.f32 %v3281_v28, %v3282_v38  ;;  %v3289_v17 = vrot.slane %v3288_v29, 1  ;;  %v3644_v33 = vsel %vm3463_vm9, %v8540_v37, %v3643_v9 }
 0x249   :  { %v4075_v19 = vsel %vm3457_vm6, %v8538_v31, %v4074_v30  ;;  %v8831_v36 = vmax.f32 %v3295_v27, %v3296_v46  ;;  %v1269_v28 = vadd.f32 %v8384_v59, %v8279_v57  ;;  %v4000_v18 = vsel %vm3453_vm4, %v8490_v61, %v8187_v45  ;;  %v9799_v46 = vld [vmem:[#allocation18_spill] sm:$0xff]  ;;  %v3738_v30 = vpop.permute.xlu0 %3737 }
 0x24a   :  { %v3204_v48 = vmax.f32 %v3202_v49, %v3203_v26  ;;  %v4076_v55 = vsel %vm3459_vm7, %v8540_v37, %v4075_v19  ;;  %v8837_v63 = vmax.f32 %v3288_v29, %v3289_v17  ;;  %v3770_v27 = vsel %vm3455_vm5, %v9797_v41, %v9796_v25  ;;  %3759 = vst.msk [vmem:[#allocation2] sm:$0xff] %vm3758_vm14, %v3738_v30 }
 0x24b   :  { %v1337_v38 = vmax.f32 %v1266_v6, 0.0  ;;  %v4001_v54 = vsel %vm3455_vm5, %v8498_v10, %v4000_v18  ;;  %v3771_v35 = vsel %vm3457_vm6, %v9798_v58, %v3770_v27  ;;  %v1338_v29 = vmax.f32 %v1269_v28, 0.0  ;;  %v9801_v27 = vld [vmem:[#allocation19_spill] sm:$0xff] }
 0x24c   :  { %v3205_v49 = vrot.slane %v3204_v48, 1  ;;  %v4002_v57 = vsel %vm3457_vm6, %v8528_v0, %v4001_v54  ;;  %v3772_v26 = vsel %vm3459_vm7, %v9799_v46, %v3771_v35  ;;  %v9800_v45 = vrot.slane %v8576_v22, 4 }
 0x24d   :  { %v2107_v19 = vcombine.high %v1337_v38, %v1337_v38  ;;  %v2114_v6 = vrot.slane %v1337_v38, %v7077_v12  ;;  %v4003_v18 = vsel %vm3459_vm7, %v8538_v31, %v4002_v57  ;;  %v2124_v25 = vcombine.high %v1338_v29, %v1338_v29  ;;  %v3950_v46 = vpop.permute.xlu0 %3949 }
 0x24e   :  { %v3209_v9 = vmax.f32 %v8576_v22, %v9800_v45  ;;  %v3206_v17 = vmax.f32 %v3204_v48, %v3205_v49  ;;  %v2131_v28 = vrot.slane %v1338_v29, %v7077_v12  ;;  %v4004_v41 = vsel %vm3461_vm8, %v8540_v37, %v4003_v18 }
 0x24f   :  { %v3773_v54 = vsel %vm3461_vm8, %v9801_v27, %v3772_v26  ;;  %v2121_v49 = vrot.slane %v2107_v19, %v7077_v12  ;;  %v2122_v35 = vcombine.high %v2114_v6, %v2114_v6  ;;  %v2675_v29 = vsel %vm2422_vm3, %v2114_v6, -inf }
 0x250   :  { %v3645_v58 = vsel %vm3465_vm10, %v3206_v17, %v3644_v33  ;;  %v3857_v22 = vsel %vm3455_vm5, %v3206_v17, %v3856_v2  ;;  %v4077_v48 = vsel %vm3461_vm8, %v3206_v17, %v4076_v55  ;;  %v2138_v57 = vrot.slane %v2124_v25, %v7077_v12  ;;  %v9802_v25 = vld [vmem:[#allocation20_spill] sm:$0xff] }
 0x251   :  { %3662 = vrot.lane.b32.xlu0 %v3645_v58, %s6991_s11  ;;  %v4078_v38 = vsel %vm3463_vm9, %v8647_v51, %v4077_v48  ;;  %v2123_v26 = vcombine.high %v2121_v49, %v2121_v49  ;;  %v8878_v2 = vsel %vm2422_vm3, %v2121_v49, -inf  ;;  %v2139_v55 = vcombine.high %v2131_v28, %v2131_v28  ;;  %v9803_v49 = vld [vmem:[#allocation21_spill] sm:$0xff] }
 0x252   :  { %v4079_v33 = vsel %vm3465_vm10, %v8649_v11, %v4078_v38  ;;  %v2140_v45 = vcombine.high %v2138_v57, %v2138_v57  ;;  %v8882_v17 = vsel %vm2422_vm3, %v2131_v28, -inf  ;;  %v8885_v19 = vsel %vm2422_vm3, %v2138_v57, -inf }
 0x253   :  { %4105 = vst.msk [vmem:[#allocation2 + $0x58] sm:$0xff] %vm3510_vm11, %v4079_v33  ;;  %v4005_v6 = vsel %vm3463_vm9, %v8641_v34, %v4004_v41  ;;  %v3774_v27 = vsel %vm3463_vm9, %v9802_v25, %v3773_v54  ;;  %v3210_v58 = vrot.slane %v3209_v9, 2  ;;  %v3930_v48 = vsel %vm3455_vm5, %v8490_v61, %v8695_v24 }
 0x254   :  { %v4006_v18 = vsel %vm3465_vm10, %v8647_v51, %v4005_v6  ;;  %v2676_v28 = vsel %vm2422_vm3, %v2140_v45, -inf  ;;  %v3775_v38 = vsel %vm3465_vm10, %v9803_v49, %v3774_v27  ;;  %v3931_v41 = vsel %vm3457_vm6, %v8498_v10, %v3930_v48 }
 0x255   :  { %4028 = vrot.lane.b32.xlu1 %v4006_v18, %s6997_s1  ;;  %v3722_v57 = vsel %vm3453_vm4, %v8528_v0, %v8498_v10  ;;  %v2677_v54 = vmax.f32 %v2675_v29, %v2676_v28  ;;  %3819 = vst.msk [vmem:[#allocation2 + $0x8] sm:$0xff] %vm3510_vm11, %v3775_v38  ;;  %v3211_v33 = vmax.f32 %v3209_v9, %v3210_v58  ;;  %v2678_v29 = vsel %vm2422_vm3, %v2122_v35, -inf  ;;  %v4023_v9 = vpop.permute.xlu0 %4022 }
 0x256   :  { %v3932_v24 = vsel %vm3459_vm7, %v8528_v0, %v3931_v41  ;;  %v3723_v45 = vsel %vm3455_vm5, %v8538_v31, %v3722_v57  ;;  %3892 = vst.msk [vmem:[#allocation2 + $0x8] sm:$0xff] %vm3592_vm12, %v8819_v50  ;;  %v1274_v18 = vadd.f32 %v8384_v59, %v8347_v39  ;;  %v2684_v27 = vsel %vm2422_vm3, %v2123_v26, -inf }
 0x257   :  { %v3933_v6 = vsel %vm3461_vm8, %v8538_v31, %v3932_v24  ;;  %v3305_v58 = vsel %vm2422_vm3, %v2677_v54, -inf  ;;  %v3212_v48 = vrot.slane %v3211_v33, 1  ;;  %v1277_v28 = vadd.f32 %v8384_v59, %v8404_v3  ;;  %3970 = vst.msk [vmem:[#allocation2 + $0x8] sm:$0xff] %vm3675_vm13, %v3950_v46 }
 0x258   :  { %v2690_v38 = vsel %vm2422_vm3, %v2139_v55, -inf  ;;  %v3306_v50 = vrot.slane %v3305_v58, 4  ;;  %v1339_v41 = vmax.f32 %v1274_v18, 0.0  ;;  %v9804_v39 = vrot.slane %v8644_v62, 4  ;;  %4043 = vst.msk [vmem:[#allocation2 + $0x8] sm:$0xff] %vm3758_vm14, %v4023_v9 }
 0x259   :  { %v3213_v57 = vmax.f32 %v3211_v33, %v3212_v48  ;;  %v1340_v26 = vmax.f32 %v1277_v28, 0.0  ;;  %v3858_v54 = vsel %vm3457_vm6, %v8647_v51, %v3857_v22  ;;  %v8932_v59 = vsel %vm3453_vm4, %v8707_v42, %v8659_v40 }
 0x25a   :  { %v3251_v35 = vmax.f32 %v8644_v62, %v9804_v39  ;;  %v8935_v3 = vmax.f32 %v3305_v58, %v3306_v50  ;;  %v2141_v46 = vcombine.high %v1339_v41, %v1339_v41  ;;  %v2148_v55 = vrot.slane %v1339_v41, %v7077_v12 }
 0x25b   :  { %v3495_v33 = vsel %vm3453_vm4, %v8641_v34, %v3213_v57  ;;  %v3934_v30 = vsel %vm3463_vm9, %v3213_v57, %v3933_v6  ;;  %v3724_v22 = vsel %vm3457_vm6, %v3213_v57, %v3723_v45  ;;  %v2158_v24 = vcombine.high %v1340_v26, %v1340_v26 }
 0x25c   :  { %v3252_v62 = vrot.slane %v3251_v35, 2  ;;  %v3935_v18 = vsel %vm3465_vm10, %v8641_v34, %v3934_v30  ;;  %v3496_v9 = vsel %vm3455_vm5, %v8647_v51, %v3495_v33  ;;  %v3725_v58 = vsel %vm3459_vm7, %v8641_v34, %v3724_v22 }
 0x25d   :  { %v2155_v48 = vrot.slane %v2141_v46, %v7077_v12  ;;  %3955 = vrot.lane.b32.xlu1 %v3935_v18, %s6991_s11  ;;  %v8952_v28 = vsel %vm3457_vm6, %v8649_v11, %v3496_v9  ;;  %v3726_v45 = vsel %vm3461_vm8, %v8647_v51, %v3725_v58  ;;  %v2156_v6 = vcombine.high %v2148_v55, %v2148_v55 }
 0x25e   :  { %9805 = vst [vmem:[#allocation12_spill] sm:$0xff] %v8952_v28  ;;  %v2679_v50 = vsel %vm2422_vm3, %v2148_v55, -inf  ;;  %v3727_v41 = vsel %vm3463_vm9, %v8649_v11, %v3726_v45  ;;  %v2165_v18 = vrot.slane %v1340_v26, %v7077_v12 }
 0x25f   :  { %v2157_v39 = vcombine.high %v2155_v48, %v2155_v48  ;;  %v2680_v57 = vmax.f32 %v2678_v29, %v2679_v50  ;;  %v2685_v33 = vsel %vm2422_vm3, %v2155_v48, -inf  ;;  %v3728_v46 = vsel %vm3465_vm10, %v8659_v40, %v3727_v41 }
 0x260   :  { %v2682_v30 = vsel %vm2422_vm3, %v2156_v6, -inf  ;;  %v2686_v22 = vmax.f32 %v2684_v27, %v2685_v33  ;;  %3745 = vrot.lane.b32.xlu0 %v3728_v46, %s6997_s1  ;;  %v2172_v29 = vrot.slane %v2158_v24, %v7077_v12  ;;  %v2173_v41 = vcombine.high %v2165_v18, %v2165_v18 }
 0x261   :  { %v2683_v9 = vmax.f32 %v8878_v2, %v2682_v30  ;;  %v2688_v55 = vsel %vm2422_vm3, %v2157_v39, -inf  ;;  %v3312_v58 = vsel %vm2422_vm3, %v2680_v57, -inf  ;;  %v2691_v33 = vsel %vm2422_vm3, %v2165_v18, -inf }
 0x262   :  { %v2689_v48 = vmax.f32 %v8882_v17, %v2688_v55  ;;  %v3313_v45 = vrot.slane %v3312_v58, 4  ;;  %v3326_v50 = vsel %vm2422_vm3, %v2686_v22, -inf  ;;  %v2174_v26 = vcombine.high %v2172_v29, %v2172_v29 }
 0x263   :  { %v3319_v27 = vsel %vm2422_vm3, %v2683_v9, -inf  ;;  %v3327_v6 = vrot.slane %v3326_v50, 4  ;;  %v2692_v30 = vmax.f32 %v2690_v38, %v2691_v33  ;;  %v2694_v24 = vsel %vm2422_vm3, %v2173_v41, -inf }
 0x264   :  { %v3314_v46 = vmax.f32 %v3312_v58, %v3313_v45  ;;  %v3320_v2 = vrot.slane %v3319_v27, 4  ;;  %v3333_v39 = vsel %vm2422_vm3, %v2689_v48, -inf  ;;  %v8976_v17 = vsel %vm2422_vm3, %v2172_v29, -inf }
 0x265   :  { %v3328_v57 = vmax.f32 %v3326_v50, %v3327_v6  ;;  %v3334_v13 = vrot.slane %v3333_v39, 4  ;;  %v2695_v9 = vmax.f32 %v8885_v19, %v2694_v24  ;;  %v3340_v7 = vsel %vm2422_vm3, %v2692_v30, -inf  ;;  %v3574_v6 = vpop.permute.xlu1 %3573  ;;  %v9806_v24 = vld [vmem:[#allocation42_spill] sm:$0xff] }
 0x266   :  { %v3315_v22 = vrot.slane %v3314_v46, 2  ;;  %v3321_v55 = vmax.f32 %v3319_v27, %v3320_v2  ;;  %v3341_v58 = vrot.slane %v3340_v7, 4  ;;  %v3253_v45 = vmax.f32 %v3251_v35, %v3252_v62 }
 0x267   :  { %v3329_v28 = vrot.slane %v3328_v57, 2  ;;  %v3335_v18 = vmax.f32 %v3333_v39, %v3334_v13  ;;  %v8983_v48 = vsel %vm2422_vm3, %v2695_v9, -inf  ;;  %v3859_v29 = vsel %vm3459_vm7, %v8649_v11, %v3858_v54 }
 0x268   :  { %v8980_v37 = vmax.f32 %v3314_v46, %v3315_v22  ;;  %v3322_v38 = vrot.slane %v3321_v55, 2  ;;  %v3342_v27 = vmax.f32 %v3340_v7, %v3341_v58  ;;  %v3254_v2 = vrot.slane %v3253_v45, 1  ;;  %v6941_v7 = vld [vmem:[%s9691_s2] ss:$0 sm:$0xff] }
 0x269   :  { %v3330_v50 = vmax.f32 %v3328_v57, %v3329_v28  ;;  %v3336_v41 = vrot.slane %v3335_v18, 2  ;;  %v3860_v35 = vsel %vm3461_vm8, %v8659_v40, %v3859_v29  ;;  %v1282_v57 = vadd.f32 %v6941_v7, %v8412_v8 }
 0x26a   :  { %v3317_v33 = vrot.slane %v8980_v37, 1  ;;  %v3323_v13 = vmax.f32 %v3321_v55, %v3322_v38  ;;  %v3343_v39 = vrot.slane %v3342_v27, 2  ;;  %v3861_v30 = vsel %vm3463_vm9, %v8707_v42, %v3860_v35 }
 0x26b   :  { %v3331_v62 = vrot.slane %v3330_v50, 1  ;;  %v3337_v46 = vmax.f32 %v3335_v18, %v3336_v41  ;;  %v8993_v28 = vmax.f32 %v3253_v45, %v3254_v2  ;;  %v1285_v22 = vadd.f32 %v6941_v7, %v9806_v24  ;;  %v9807_v2 = vld [vmem:[#allocation31_spill] sm:$0xff] }
 0x26c   :  { %v3324_v54 = vrot.slane %v3323_v13, 1  ;;  %v9002_v58 = vmax.f32 %v3342_v27, %v3343_v39  ;;  %v2699_v18 = vsel %vm2422_vm3, %v2174_v26, -inf  ;;  %v1341_v41 = vmax.f32 %v1282_v57, 0.0  ;;  %v9808_v57 = vld [vmem:[#allocation22_spill] sm:$0xff] }
 0x26d   :  { %v9000_v55 = vmax.f32 %v3330_v50, %v3331_v62  ;;  %v3338_v9 = vrot.slane %v3337_v46, 1  ;;  %v3862_v45 = vsel %vm3465_vm10, %v8993_v28, %v3861_v30  ;;  %v4081_v29 = vsel %vm3455_vm5, %v8993_v28, %v8932_v59 }
 0x26e   :  { %v9005_v38 = vmax.f32 %v3323_v13, %v3324_v54  ;;  %3879 = vrot.lane.b32.xlu0 %v3862_v45, %s6996_s0  ;;  %v4082_v50 = vsel %vm3457_vm6, %v8796_v15, %v4081_v29  ;;  %v1342_v27 = vmax.f32 %v1285_v22, 0.0  ;;  %v3470_v26 = vsel %vm3459_vm7, %v9802_v25, %v9807_v2  ;;  %v3657_v13 = vpop.permute.xlu1 %3656  ;;  %v9809_v45 = vld [vmem:[#allocation36_spill] sm:$0xff] }
 0x26f   :  { %v9012_v8 = vmax.f32 %v3337_v46, %v3338_v9  ;;  %v4083_v35 = vsel %vm3459_vm7, %v8825_v21, %v4082_v50  ;;  %v2175_v62 = vcombine.high %v1341_v41, %v1341_v41  ;;  %v2182_v59 = vrot.slane %v1341_v41, %v7077_v12 }
 0x270   :  { %v3471_v46 = vsel %vm3461_vm8, %v9803_v49, %v3470_v26  ;;  %v9027_v39 = vsel %vm3461_vm8, %v8837_v63, %v4083_v35  ;;  %v2192_v30 = vcombine.high %v1342_v27, %v1342_v27  ;;  %v2199_v54 = vrot.slane %v1342_v27, %v7077_v12 }
 0x271   :  { %v3472_v25 = vsel %vm3463_vm9, %v9808_v57, %v3471_v46  ;;  %v2189_v24 = vrot.slane %v2175_v62, %v7077_v12  ;;  %v2190_v22 = vcombine.high %v2182_v59, %v2182_v59  ;;  %v9034_v9 = vsel %vm2422_vm3, %v2182_v59, -inf }
 0x272   :  { %v3473_v29 = vsel %vm3465_vm10, %v9809_v45, %v3472_v25  ;;  %v2206_v49 = vrot.slane %v2192_v30, %v7077_v12  ;;  %v2207_v41 = vcombine.high %v2199_v54, %v2199_v54  ;;  %v9040_v50 = vsel %vm2422_vm3, %v2199_v54, -inf  ;;  %v3740_v2 = vpop.permute.xlu1 %3739 }
 0x273   :  { %3512 = vst.msk [vmem:[#allocation2 + $0x18] sm:$0xff] %vm3510_vm11, %v3473_v29  ;;  %v3563_v27 = vsel %vm3453_vm4, %v8647_v51, %v8641_v34  ;;  %v2191_v26 = vcombine.high %v2189_v24, %v2189_v24  ;;  %v9047_v35 = vsel %vm2422_vm3, %v2189_v24, -inf  ;;  %v9810_v59 = vrot.slane %v8775_v32, 1 }
 0x274   :  { %3594 = vst.msk [vmem:[#allocation2 + $0x18] sm:$0xff] %vm3592_vm12, %v3574_v6  ;;  %v3564_v62 = vsel %vm3455_vm5, %v8649_v11, %v3563_v27  ;;  %v2208_v30 = vcombine.high %v2206_v49, %v2206_v49  ;;  %v2697_v54 = vsel %vm2422_vm3, %v2207_v41, -inf  ;;  %v2700_v25 = vsel %vm2422_vm3, %v2206_v49, -inf }
 0x275   :  { %v9055_v46 = vmax.f32 %v8775_v32, %v9810_v59  ;;  %v3565_v45 = vsel %vm3457_vm6, %v8659_v40, %v3564_v62  ;;  %3677 = vst.msk [vmem:[#allocation2 + $0x18] sm:$0xff] %vm3675_vm13, %v3657_v13  ;;  %v2698_v6 = vmax.f32 %v8976_v17, %v2697_v54  ;;  %v2701_v24 = vmax.f32 %v2699_v18, %v2700_v25  ;;  %v9811_v17 = vld [vmem:[#allocation43_spill] sm:$0xff] }
 0x276   :  { %v3566_v29 = vsel %vm3459_vm7, %v8707_v42, %v3565_v45  ;;  %v3646_v32 = vsel %vm3453_vm4, %v8649_v11, %v8647_v51  ;;  %3760 = vst.msk [vmem:[#allocation2 + $0x18] sm:$0xff] %vm3758_vm14, %v3740_v2  ;;  %v9070_v41 = vsel %vm2422_vm3, %v2208_v30, -inf  ;;  %v1290_v18 = vadd.f32 %v6941_v7, %v9811_v17 }
 0x277   :  { %v3567_v49 = vsel %vm3461_vm8, %v8788_v53, %v3566_v29  ;;  %v3647_v13 = vsel %vm3455_vm5, %v8659_v40, %v3646_v32  ;;  %v3354_v62 = vsel %vm2422_vm3, %v2698_v6, -inf  ;;  %v3361_v59 = vsel %vm2422_vm3, %v2701_v24, -inf }
 0x278   :  { %v3568_v2 = vsel %vm3463_vm9, %v8796_v15, %v3567_v49  ;;  %v3355_v30 = vrot.slane %v3354_v62, 4  ;;  %v3362_v54 = vrot.slane %v3361_v59, 4  ;;  %v3936_v45 = vsel %vm3457_vm6, %v9055_v46, %v3647_v13 }
 0x279   :  { %v3569_v25 = vsel %vm3465_vm10, %v8825_v21, %v3568_v2  ;;  %v3937_v7 = vsel %vm3459_vm7, %v8788_v53, %v3936_v45  ;;  %v1343_v29 = vmax.f32 %v1290_v18, 0.0  ;;  %v2705_v6 = vsel %vm2422_vm3, %v2190_v22, -inf }
 0x27a   :  { %3581 = vrot.lane.b32.xlu1 %v3569_v25, %s6996_s0  ;;  %v2711_v24 = vsel %vm2422_vm3, %v2191_v26, -inf  ;;  %v9092_v32 = vmax.f32 %v3354_v62, %v3355_v30  ;;  %v9094_v49 = vmax.f32 %v3361_v59, %v3362_v54  ;;  %v3938_v17 = vsel %vm3461_vm8, %v8796_v15, %v3937_v7  ;;  %v9118_v7 = vpop.permute.xlu0 %3873 }
 0x27b   :  { %v3648_v2 = vsel %vm3457_vm6, %v8707_v42, %v3647_v13  ;;  %v3939_v25 = vsel %vm3463_vm9, %v8825_v21, %v3938_v17  ;;  %v2209_v27 = vcombine.high %v1343_v29, %v1343_v29  ;;  %v2216_v18 = vrot.slane %v1343_v29, %v7077_v12 }
 0x27c   :  { %v3649_v22 = vsel %vm3459_vm7, %v8993_v28, %v3648_v2  ;;  %v3940_v62 = vsel %vm3465_vm10, %v8837_v63, %v3939_v25  ;;  %v4007_v13 = vsel %vm3453_vm4, %v8659_v40, %v8649_v11  ;;  %v3308_v25 = vrot.slane %v8935_v3, 2 }
 0x27d   :  { %v3650_v59 = vsel %vm3461_vm8, %v8796_v15, %v3649_v22  ;;  %3957 = vrot.lane.b32.xlu0 %v3940_v62, %s6991_s11  ;;  %v2223_v30 = vrot.slane %v2209_v27, %v7077_v12  ;;  %v2224_v54 = vcombine.high %v2216_v18, %v2216_v18  ;;  %v2706_v45 = vsel %vm2422_vm3, %v2216_v18, -inf }
 0x27e   :  { %v3651_v28 = vsel %vm3463_vm9, %v8825_v21, %v3650_v59  ;;  %v2707_v29 = vmax.f32 %v2705_v6, %v2706_v45  ;;  %v4008_v2 = vsel %vm3455_vm5, %v8707_v42, %v4007_v13 }
 0x27f   :  { %v3652_v17 = vsel %vm3465_vm10, %v8837_v63, %v3651_v28  ;;  %v2225_v22 = vcombine.high %v2223_v30, %v2223_v30  ;;  %v9126_v27 = vsel %vm2422_vm3, %v2224_v54, -inf  ;;  %v2712_v18 = vsel %vm2422_vm3, %v2223_v30, -inf }
 0x280   :  { %3664 = vrot.lane.b32.xlu1 %v3652_v17, %s6991_s11  ;;  %v4009_v62 = vsel %vm3457_vm6, %v8788_v53, %v4008_v2  ;;  %v2713_v59 = vmax.f32 %v2711_v24, %v2712_v18  ;;  %v3375_v45 = vsel %vm2422_vm3, %v2707_v29, -inf  ;;  %v3309_v17 = vmax.f32 %v8935_v3, %v3308_v25  ;;  %v9814_v18 = vld [vmem:[#allocation27_spill] sm:$0xff] }
 0x281   :  { %v4010_v13 = vsel %vm3459_vm7, %v8796_v15, %v4009_v62  ;;  %v2715_v28 = vsel %vm2422_vm3, %v2225_v22, -inf  ;;  %v3376_v54 = vrot.slane %v3375_v45, 4  ;;  %v9150_v29 = vmax.f32 %v8980_v37, %v3317_v33  ;;  %v9812_v37 = vld [vmem:[#allocation25_spill] sm:$0xff] }
 0x282   :  { %v4011_v30 = vsel %vm3461_vm8, %v8825_v21, %v4010_v13  ;;  %v2716_v26 = vmax.f32 %v9040_v50, %v2715_v28  ;;  %v9143_v2 = vsel %vm2422_vm3, %v2713_v59, -inf  ;;  %v3310_v25 = vrot.slane %v3309_v17, 1  ;;  %v3576_v50 = vpop.permute.xlu0 %3575 }
 0x283   :  { %v4012_v24 = vsel %vm3463_vm9, %v8837_v63, %v4011_v30  ;;  %v9152_v22 = vmax.f32 %v3375_v45, %v3376_v54  ;;  %v3729_v59 = vsel %vm3453_vm4, %v8788_v53, %v9055_v46  ;;  %v3776_v33 = vsel %vm3453_vm4, %v9812_v37, %v9808_v57  ;;  %v9813_v30 = vld [vmem:[#allocation26_spill] sm:$0xff]  ;;  %v9816_v37 = vld [vmem:[#allocation28_spill] sm:$0xff] }
 0x284   :  { %v4013_v3 = vsel %vm3465_vm10, %v8831_v36, %v4012_v24  ;;  %v3396_v62 = vsel %vm2422_vm3, %v2716_v26, -inf  ;;  %v3345_v45 = vrot.slane %v9002_v58, 1  ;;  %v3311_v28 = vmax.f32 %v3309_v17, %v3310_v25  ;;  %v3952_v24 = vpop.permute.xlu1 %3951 }
 0x285   :  { %4030 = vrot.lane.b32.xlu0 %v4013_v3, %s6997_s1  ;;  %v3397_v13 = vrot.slane %v3396_v62, 4  ;;  %v3730_v54 = vsel %vm3455_vm5, %v8796_v15, %v3729_v59  ;;  %v3777_v26 = vsel %vm3455_vm5, %v9813_v30, %v3776_v33  ;;  %v9815_v57 = vrot.slane %v8983_v48, 4  ;;  %v9817_v30 = vld [vmem:[#allocation29_spill] sm:$0xff] }
 0x286   :  { %v3731_v3 = vsel %vm3457_vm6, %v8825_v21, %v3730_v54  ;;  %v3778_v6 = vsel %vm3457_vm6, %v9814_v18, %v3777_v26  ;;  %v9175_v19 = vmax.f32 %v9002_v58, %v3345_v45  ;;  %v4087_v54 = vsel %vm3453_vm4, %v9000_v55, %v9005_v38  ;;  %v9818_v26 = vld [vmem:[#allocation30_spill] sm:$0xff] }
 0x287   :  { %v3349_v17 = vmax.f32 %v8983_v48, %v9815_v57  ;;  %v3398_v25 = vmax.f32 %v3396_v62, %v3397_v13  ;;  %v3732_v59 = vsel %vm3459_vm7, %v8837_v63, %v3731_v3  ;;  %v3779_v33 = vsel %vm3459_vm7, %v9816_v37, %v3778_v6  ;;  %v3659_v57 = vpop.permute.xlu0 %3658  ;;  %v9819_v37 = vld [vmem:[#allocation32_spill] sm:$0xff] }
 0x288   :  { %v3733_v18 = vsel %vm3461_vm8, %v3311_v28, %v3732_v59  ;;  %v3780_v58 = vsel %vm3461_vm8, %v9817_v30, %v3779_v33  ;;  %v4088_v48 = vsel %vm3455_vm5, %v9012_v8, %v4087_v54  ;;  %v9820_v54 = vrot.slane %v8800_v20, 2 }
 0x289   :  { %v3350_v45 = vrot.slane %v3349_v17, 2  ;;  %v3399_v62 = vrot.slane %v3398_v25, 2  ;;  %v3734_v13 = vsel %vm3463_vm9, %v9150_v29, %v3733_v18  ;;  %v3781_v6 = vsel %vm3463_vm9, %v9818_v26, %v3780_v58  ;;  %v9823_v26 = vld [vmem:[#allocation34_spill] sm:$0xff] }
 0x28a   :  { %v4089_v3 = vsel %vm3457_vm6, %v9175_v19, %v4088_v48  ;;  %v3735_v59 = vsel %vm3465_vm10, %v9005_v38, %v3734_v13  ;;  %v3782_v33 = vsel %vm3465_vm10, %v9819_v37, %v3781_v6  ;;  %v3302_v12 = vmax.f32 %v8800_v20, %v9820_v54  ;;  %v9821_v48 = vld [vmem:[#allocation39_spill] sm:$0xff]  ;;  %v4025_v13 = vpop.permute.xlu1 %4024 }
 0x28b   :  { %v3351_v30 = vmax.f32 %v3349_v17, %v3350_v45  ;;  %v9205_v42 = vmax.f32 %v3398_v25, %v3399_v62  ;;  %3747 = vrot.lane.b32.xlu1 %v3735_v59, %s6997_s1  ;;  %3820 = vst.msk [vmem:[#allocation2 + $0x20] sm:$0xff] %vm3510_vm11, %v3782_v33  ;;  %v3863_v18 = vsel %vm3453_vm4, %v8825_v21, %v8796_v15  ;;  %v9822_v17 = vld [vmem:[#allocation33_spill] sm:$0xff]  ;;  %v9824_v37 = vrot.slane %v9092_v32, 2  ;;  %v3742_v54 = vpop.permute.xlu0 %3741 }
 0x28c   :  { %v4085_v58 = vsel %vm3463_vm9, %v8831_v36, %v9027_v39  ;;  %v3479_v45 = vsel %vm3463_vm9, %v9822_v17, %v9821_v48  ;;  %3893 = vst.msk [vmem:[#allocation2 + $0x20] sm:$0xff] %vm3592_vm12, %v9118_v7  ;;  %v3303_v25 = vrot.slane %v3302_v12, 1  ;;  %v3864_v62 = vsel %vm3455_vm5, %v8837_v63, %v3863_v18 }
 0x28d   :  { %v3352_v20 = vrot.slane %v3351_v30, 1  ;;  %v3480_v6 = vsel %vm3465_vm10, %v9823_v26, %v3479_v45  ;;  %v3401_v59 = vrot.slane %v9205_v42, 1  ;;  %v3865_v39 = vsel %vm3457_vm6, %v8831_v36, %v3864_v62  ;;  %3971 = vst.msk [vmem:[#allocation2 + $0x20] sm:$0xff] %vm3675_vm13, %v3952_v24 }
 0x28e   :  { %3513 = vst.msk [vmem:[#allocation2 + $0x30] sm:$0xff] %vm3510_vm11, %v3480_v6  ;;  %v3358_v7 = vmax.f32 %v9092_v32, %v9824_v37  ;;  %v3364_v33 = vrot.slane %v9094_v49, 2  ;;  %v3304_v48 = vmax.f32 %v3302_v12, %v3303_v25  ;;  %v9825_v45 = vmax.f32 %v9034_v9, %v9070_v41  ;;  %v9248_v9 = vld [vmem:[%s9692_s3 + $0x80] sm:$0xff]  }
 0x28f   :  { %v3353_v18 = vmax.f32 %v3351_v30, %v3352_v20  ;;  %3595 = vst.msk [vmem:[#allocation2 + $0x30] sm:$0xff] %vm3592_vm12, %v3576_v50  ;;  %v3941_v6 = vsel %vm3453_vm4, %v9150_v29, %v3311_v28  ;;  %6777 = vmatprep.subr.bf16.mxu1 %v9248_v9  ;;  %v3378_v25 = vrot.slane %v9152_v22, 2 }
 0x290   :  { %v3368_v62 = vsel %vm2422_vm3, %v9825_v45, -inf  ;;  %4044 = vst.msk [vmem:[#allocation2 + $0x20] sm:$0xff] %vm3758_vm14, %v4025_v13  ;;  %v3359_v32 = vrot.slane %v3358_v7, 1  ;;  %v3365_v24 = vmax.f32 %v9094_v49, %v3364_v33  ;;  %v3942_v12 = vsel %vm3455_vm5, %v9005_v38, %v3941_v6  ;;  %v3876_v45 = vpop.permute.xlu0 %3875 }
 0x291   :  { %3678 = vst.msk [vmem:[#allocation2 + $0x30] sm:$0xff] %vm3675_vm13, %v3659_v57  ;;  %v3369_v37 = vrot.slane %v3368_v62, 4  ;;  %v3870_v41 = vsel %vm3453_vm4, %v3353_v18, %v9175_v19  ;;  %v4090_v50 = vsel %vm3459_vm7, %v3353_v18, %v4089_v3  ;;  %v3866_v28 = vsel %vm3459_vm7, %v3304_v48, %v3865_v39 }
 0x292   :  { %v4086_v57 = vsel %vm3465_vm10, %v3304_v48, %v4085_v58  ;;  %3761 = vst.msk [vmem:[#allocation2 + $0x30] sm:$0xff] %vm3758_vm14, %v3742_v54  ;;  %3883 = vrot.lane.b32.xlu0 %v3870_v41, %s6996_s0  ;;  %v3867_v49 = vsel %vm3461_vm8, %v9005_v38, %v3866_v28  ;;  %v3360_v30 = vmax.f32 %v3358_v7, %v3359_v32  ;;  %v3366_v13 = vrot.slane %v3365_v24, 1 }
 0x293   :  { %4106 = vst.msk [vmem:[#allocation2 + $0x70] sm:$0xff] %vm3510_vm11, %v4086_v57  ;;  %v3370_v20 = vmax.f32 %v3368_v62, %v3369_v37  ;;  %v3868_v3 = vsel %vm3463_vm9, %v9000_v55, %v3867_v49  ;;  %v3943_v58 = vsel %vm3457_vm6, %v9000_v55, %v3942_v12  ;;  %v4014_v39 = vsel %vm3453_vm4, %v9005_v38, %v9150_v29 }
 0x294   :  { %v3869_v33 = vsel %vm3465_vm10, %v9012_v8, %v3868_v3  ;;  %v3367_v7 = vmax.f32 %v3365_v24, %v3366_v13  ;;  %v3944_v18 = vsel %vm3459_vm7, %v9012_v8, %v3943_v58  ;;  %v3379_v6 = vmax.f32 %v9152_v22, %v3378_v25  ;;  %v9827_v3 = vld [vmem:[#allocation35_spill] sm:$0xff] }
 0x295   :  { %v3371_v54 = vrot.slane %v3370_v20, 2  ;;  %3881 = vrot.lane.b32.xlu1 %v3869_v33, %s6996_s0  ;;  %v3945_v62 = vsel %vm3461_vm8, %v3360_v30, %v3944_v18  ;;  %v4015_v32 = vsel %vm3455_vm5, %v9000_v55, %v4014_v39  ;;  %v9826_v37 = vmax.f32 %v9047_v35, %v9126_v27  ;;  %v4112_v39 = vld [vmem:[#allocation2 + $0x18] sm:$0xff]  ;;  %v4027_v33 = vpop.permute.xlu0 %4026 }
 0x296   :  { %v3946_v41 = vsel %vm3463_vm9, %v3367_v7, %v3945_v62  ;;  %v4016_v28 = vsel %vm3457_vm6, %v9012_v8, %v4015_v32  ;;  %v3380_v49 = vrot.slane %v3379_v6, 1  ;;  %v3783_v22 = vsel %vm3453_vm4, %v9823_v26, %v9822_v17 }
 0x297   :  { %v3382_v12 = vsel %vm2422_vm3, %v9826_v37, -inf  ;;  %v3372_v24 = vmax.f32 %v3370_v20, %v3371_v54  ;;  %v4017_v30 = vsel %vm3459_vm7, %v9175_v19, %v4016_v28  ;;  %v9293_v35 = vsel %vm3453_vm4, %v8831_v36, %v8837_v63  ;;  %v4113_v25 = vld [vmem:[#allocation2 + $0x20] sm:$0xff] }
 0x298   :  { %v3383_v57 = vrot.slane %v3382_v12, 4  ;;  %v4018_v13 = vsel %vm3461_vm8, %v3367_v7, %v4017_v30  ;;  %v3784_v58 = vsel %vm3455_vm5, %v9827_v3, %v3783_v22  ;;  %v3381_v54 = vmax.f32 %v3379_v6, %v3380_v49  ;;  %v3578_v7 = vpop.permute.xlu1 %3577  ;;  %v9830_v49 = vld [vmem:[#allocation37_spill] sm:$0xff] }
 0x299   :  { %v3373_v27 = vrot.slane %v3372_v24, 1  ;;  %v3785_v18 = vsel %vm3457_vm6, %v7845_v14, %v3784_v58  ;;  %v9828_v17 = vrot.slane %v9143_v2, 4  ;;  %v3402_v62 = vmax.f32 %v9205_v42, %v3401_v59  ;;  %v4109_v14 = vld [vmem:[#allocation2] sm:$0xff] }
 0x29a   :  { %v3384_v20 = vmax.f32 %v3382_v12, %v3383_v57  ;;  %v9829_v12 = vld [vmem:[#allocation40_spill] sm:$0xff]  ;;  %v9310_v6 = vsel %vm3453_vm4, %v3304_v48, %v8831_v36  ;;  %v4110_v57 = vld [vmem:[#allocation2 + $0x8] sm:$0xff]  ;;  %v4130_v3 = vpack.c.bf16 %v4112_v39, %v4109_v14 }
 0x29b   :  { %v3391_v26 = vmax.f32 %v9143_v2, %v9828_v17  ;;  %v3374_v32 = vmax.f32 %v3372_v24, %v3373_v27  ;;  %v3786_v28 = vsel %vm3459_vm7, %v9829_v12, %v3785_v18  ;;  %v4131_v22 = vpack.c.bf16 %v4113_v25, %v4110_v57  ;;  %v9831_v18 = vld [vmem:[#allocation38_spill] sm:$0xff] }
 0x29c   :  { %v3385_v37 = vrot.slane %v3384_v20, 2  ;;  %v3787_v30 = vsel %vm3461_vm8, %v9830_v49, %v3786_v28  ;;  %v9833_v49 = vld [vmem:[#allocation44_spill] sm:$0xff] }
 0x29d   :  { %v3392_v2 = vrot.slane %v3391_v26, 2  ;;  %v3947_v42 = vsel %vm3465_vm10, %v3374_v32, %v3946_v41  ;;  %v4091_v59 = vsel %vm3461_vm8, %v3374_v32, %v4090_v50  ;;  %v4019_v24 = vsel %vm3463_vm9, %v3374_v32, %v4018_v13  ;;  %4337 = vmatprep.mubr.bf16.mxu1 %v4131_v22  ;;  %v3954_v41 = vpop.permute.xlu0 %3953  ;;  %v9832_v13 = vld [vmem:[#allocation41_spill] sm:$0xff]  ;;  %v3661_v32 = vpop.permute.xlu1 %3660 }
 0x29e   :  { %v3386_v27 = vmax.f32 %v3384_v20, %v3385_v37  ;;  %3959 = vrot.lane.b32.xlu1 %v3947_v42, %s6991_s11  ;;  %v4020_v48 = vsel %vm3465_vm10, %v3381_v54, %v4019_v24  ;;  %v4092_v58 = vsel %vm3463_vm9, %v3381_v54, %v4091_v59  ;;  %v3788_v17 = vsel %vm3463_vm9, %v9831_v18, %v3787_v30  ;;  %v9835_v42 = vld [vmem:[#allocation12_spill] sm:$0xff] }
 0x29f   :  { %v3393_v12 = vmax.f32 %v3391_v26, %v3392_v2  ;;  %v3789_v25 = vsel %vm3465_vm10, %v8003_v47, %v3788_v17  ;;  %v9327_v50 = vsel %vm3453_vm4, %v9012_v8, %v9000_v55  ;;  %v3483_v20 = vsel %vm3457_vm6, %v8281_v23, %v9832_v13  ;;  %4338 = vmatmul.mubr.bf16.vlgmr.msra.gmra.mrb[0].mxu1 %v4130_v3  ;;  %v9834_v3 = vld [vmem:[#allocation45_spill] sm:$0xff] }
 0x2a0   :  { %v3387_v28 = vrot.slane %v3386_v27, 1  ;;  %3821 = vst.msk [vmem:[#allocation2 + $0x38] sm:$0xff] %vm3510_vm11, %v3789_v25  ;;  %v3484_v26 = vsel %vm3459_vm7, %v8268_v4, %v3483_v20  ;;  %v3791_v47 = vsel %vm3455_vm5, %v8420_v5, %v8514_v56  ;;  %v3492_v37 = vsel %vm3461_vm8, %v8498_v10, %v8699_v44  ;;  %6778 = vmatpush3.bf16.msra.mxu1 %v9248_v9  ;;  %v6832_v5 = vld [vmem:[%s9692_s3 + $0x88] sm:$0xff]  }
 0x2a1   :  { %v3394_v39 = vrot.slane %v3393_v12, 1  ;;  %3894 = vst.msk [vmem:[#allocation2 + $0x38] sm:$0xff] %vm3592_vm12, %v3876_v45  ;;  %v3485_v23 = vsel %vm3461_vm8, %v8496_v1, %v3484_v26  ;;  %v3792_v14 = vsel %vm3457_vm6, %v8422_v16, %v3791_v47  ;;  %v3493_v4 = vsel %vm3463_vm9, %v8528_v0, %v3492_v37  ;;  %6779 = vmatprep.subr.bf16.mxu1 %v6832_v5 }
 0x2a2   :  { %v3388_v57 = vmax.f32 %v3386_v27, %v3387_v28  ;;  %4032 = vrot.lane.b32.xlu1 %v4020_v48, %s6997_s1  ;;  %3972 = vst.msk [vmem:[#allocation2 + $0x38] sm:$0xff] %vm3675_vm13, %v3954_v41  ;;  %v3486_v1 = vsel %vm3463_vm9, %v8397_v43, %v3485_v23  ;;  %v3793_v16 = vsel %vm3459_vm7, %v8433_v52, %v3792_v14 }
 0x2a3   :  { %v3395_v56 = vmax.f32 %v3393_v12, %v3394_v39  ;;  %v3494_v44 = vsel %vm3465_vm10, %v8538_v31, %v3493_v4  ;;  %4045 = vst.msk [vmem:[#allocation2 + $0x38] sm:$0xff] %vm3758_vm14, %v4027_v33  ;;  %v3487_v30 = vsel %vm3465_vm10, %v9833_v49, %v3486_v1  ;;  %v3794_v2 = vsel %vm3461_vm8, %v8456_v60, %v3793_v16  ;;  %v3744_v33 = vpop.permute.xlu1 %3743  ;;  %v4115_v12 = vld [vmem:[#allocation2 + $0x30] sm:$0xff] }
 0x2a4   :  { %v3948_v9 = vsel %vm3453_vm4, %v3388_v57, %v3381_v54  ;;  %v4093_v45 = vsel %vm3465_vm10, %v3388_v57, %v4092_v58  ;;  %3515 = vst.msk [vmem:[#allocation2 + $0x60] sm:$0xff] %vm3510_vm11, %v3494_v44  ;;  %3514 = vst.msk [vmem:[#allocation2 + $0x48] sm:$0xff] %vm3510_vm11, %v3487_v30  ;;  %v3795_v54 = vsel %vm3463_vm9, %v8490_v61, %v3794_v2  ;;  %6780 = vmatpush3.bf16.msra.mxu1 %v6832_v5  ;;  %v4114_v2 = vld [vmem:[#allocation2 + $0x28] sm:$0xff] }
 0x2a5   :  { %4107 = vst.msk [vmem:[#allocation2 + $0x88] sm:$0xff] %vm3510_vm11, %v4093_v45  ;;  %3961 = vrot.lane.b32.xlu0 %v3948_v9, %s6991_s11  ;;  %v4021_v43 = vsel %vm3453_vm4, %v3395_v56, %v3388_v57  ;;  %v4094_v52 = vsel %vm3453_vm4, %v3402_v62, %v3395_v56  ;;  %v3797_v60 = vsel %vm3453_vm4, %v8538_v31, %v8528_v0 }
 0x2a6   :  { %4108 = vst.msk [vmem:[#allocation2 + $0xa0] sm:$0x3] %vm2422_vm3, %v4094_v52  ;;  %v3796_v22 = vsel %vm3465_vm10, %v8498_v10, %v3795_v54  ;;  %v3798_v62 = vsel %vm3455_vm5, %v9834_v3, %v3797_v60  ;;  %v3498_v59 = vsel %vm3459_vm7, %v8659_v40, %v9835_v42  ;;  %3583 = vrot.lane.b32.xlu1 %v9293_v35, %s6996_s0  ;;  %v4120_v60 = vld [vmem:[#allocation2 + $0x58] sm:$0xff]  ;;  %v4117_v3 = vld [vmem:[#allocation2 + $0x40] sm:$0xff]  ;;  %v4123_v42 = vld [vmem:[#allocation2 + $0x70] sm:$0xff] }
 0x2a7   :  { %3596 = vst.msk [vmem:[#allocation2 + $0x48] sm:$0xff] %vm3592_vm12, %v3578_v7  ;;  %v3799_v61 = vsel %vm3457_vm6, %v8641_v34, %v3798_v62  ;;  %v3499_v10 = vsel %vm3461_vm8, %v9055_v46, %v3498_v59  ;;  %v3811_v0 = vsel %vm3453_vm4, %v9175_v19, %v9012_v8  ;;  %v3804_v31 = vsel %vm3453_vm4, %v8796_v15, %v8788_v53 }
 0x2a8   :  { %3679 = vst.msk [vmem:[#allocation2 + $0x48] sm:$0xff] %vm3675_vm13, %v3661_v32  ;;  %v3800_v35 = vsel %vm3459_vm7, %v8647_v51, %v3799_v61  ;;  %v3500_v7 = vsel %vm3463_vm9, %v8788_v53, %v3499_v10  ;;  %v3805_v34 = vsel %vm3455_vm5, %v8825_v21, %v3804_v31  ;;  %v3502_v51 = vsel %vm3453_vm4, %v8837_v63, %v8825_v21 }
 0x2a9   :  { %3822 = vst.msk [vmem:[#allocation2 + $0x50] sm:$0xff] %vm3510_vm11, %v3796_v22  ;;  %4034 = vrot.lane.b32.xlu0 %v4021_v43, %s6997_s1  ;;  %v3801_v19 = vsel %vm3461_vm8, %v8649_v11, %v3800_v35  ;;  %v3501_v8 = vsel %vm3465_vm10, %v8796_v15, %v3500_v7  ;;  %v3806_v46 = vsel %vm3457_vm6, %v8837_v63, %v3805_v34  ;;  %v9836_v15 = vld [vmem:[#allocation46_spill] sm:$0xff]  ;;  %vm4772_vm4 = vcmask 517120  }
 0x2aa   :  { %3762 = vst.msk [vmem:[#allocation2 + $0x48] sm:$0xff] %vm3758_vm14, %v3744_v33  ;;  %v3802_v53 = vsel %vm3463_vm9, %v8659_v40, %v3801_v19  ;;  %v3807_v24 = vsel %vm3459_vm7, %v8831_v36, %v3806_v46  ;;  %3666 = vrot.lane.b32.xlu1 %v9310_v6, %s6991_s11  ;;  %v3878_v11 = vpop.permute.xlu1 %3877  ;;  %v4116_v58 = vld [vmem:[#allocation2 + $0x38] sm:$0xff]  ;;  %v4111_v33 = vld [vmem:[#allocation2 + $0x10] sm:$0xff]  ;;  %v4135_v62 = vpack.c.bf16 %v4120_v60, %v4117_v3  ;;  %vm4785_vm5 = vcmask 1041920  }
 0x2ab   :  { %3825 = vst.msk [vmem:[#allocation2 + $0x98] sm:$0x3] %vm2422_vm3, %v3811_v0  ;;  %3517 = vst.msk [vmem:[#allocation2 + $0x90] sm:$0x3] %vm2422_vm3, %v3502_v51  ;;  %v3803_v27 = vsel %vm3465_vm10, %v9836_v15, %v3802_v53  ;;  %v3808_v21 = vsel %vm3461_vm8, %v9150_v29, %v3807_v24  ;;  %vm3765_vm3 = vcmask 1042176   ;;  %v4132_v54 = vpack.c.bf16 %v4114_v2, %v4111_v33  ;;  %v6833_v15 = vld [vmem:[#allocation4 + $0x240] sm:$0xff]  }
 0x2ac   :  { %3516 = vst.msk [vmem:[#allocation2 + $0x78] sm:$0xff] %vm3510_vm11, %v3501_v8  ;;  %3823 = vst.msk [vmem:[#allocation2 + $0x68] sm:$0xff] %vm3510_vm11, %v3803_v27  ;;  %v3809_v40 = vsel %vm3463_vm9, %v9005_v38, %v3808_v21  ;;  %v4126_v22 = vld [vmem:[#allocation2 + $0x88] sm:$0xff]  ;;  %6622 = vmatprep.subr.bf16.mxu0 %v6833_v15 }
 0x2ad   :  { %3895 = vst.msk [vmem:[#allocation2 + $0x50] sm:$0xff] %vm3592_vm12, %v3878_v11  ;;  %v3810_v36 = vsel %vm3465_vm10, %v9000_v55, %v3809_v40  ;;  %v4138_v59 = vpack.c.bf16 %v4126_v22, %v4123_v42  ;;  %v4129_v61 = vld [vmem:[#allocation2 + $0xa0] sm:$0x3]  ;;  %v6834_v27 = vld [vmem:[#allocation4 + $0x200] sm:$0xff]   ;;  %v6835_v21 = vld [vmem:[#allocation4 + $0x248] sm:$0xff]  }
 0x2ae   :  { %3824 = vst.msk [vmem:[#allocation2 + $0x80] sm:$0xff] %vm3510_vm11, %v3810_v36  ;;  %3749 = vrot.lane.b32.xlu1 %v9327_v50, %s6997_s1  ;;  %v4141_v10 = vpack.c.bf16 %v4129_v61, %v4129_v61  ;;  %v6838_v40 = vld [vmem:[#allocation4 + $0x40] sm:$0xff]   ;;  %6623 = vmatpush3.bf16.msra.mxu0 %v6834_v27 }
 0x2af   :  { %v6840_v36 = vld [vmem:[#allocation4] sm:$0xff]   ;;  %6534 = vmatprep.subr.bf16.mxu1 %v6838_v40  ;;  %6624 = vmatprep.subr.bf16.mxu0 %v6835_v21 }
 0x2b1   :  { %v4118_v55 = vld [vmem:[#allocation2 + $0x48] sm:$0xff] }
 0x2b2   :  { %v4133_v28 = vpack.c.bf16 %v4118_v55, %v4115_v12  ;;  %v6839_v55 = vld [vmem:[#allocation4 + $0x210] sm:$0xff]  }
 0x2b5   :  { %v3580_v63 = vpop.permute.xlu0 %3579 }
 0x2b6   :  { %3597 = vst.msk [vmem:[#allocation2 + $0x60] sm:$0xff] %vm3592_vm12, %v3580_v63  ;;  %v6841_v63 = vld [vmem:[#allocation4 + $0x48] sm:$0xff]  }
 0x2c3   :  { %v3663_v6 = vpop.permute.xlu0 %3662 }
 0x2c4   :  { %3680 = vst.msk [vmem:[#allocation2 + $0x60] sm:$0xff] %vm3675_vm13, %v3663_v6  ;;  %v6836_v6 = vld [vmem:[#allocation4 + $0x208] sm:$0xff]  }
 0x2c5   :  { %6625 = vmatpush3.bf16.msra.mxu0 %v6836_v6  ;;  %v6846_v6 = vld [vmem:[#allocation4 + $0x18] sm:$0xff]  }
 0x2c7   :  { %v4029_v29 = vpop.permute.xlu1 %4028 }
 0x2cf   :  { %v3956_v48 = vpop.permute.xlu1 %3955 }
 0x2d0   :  { %3973 = vst.msk [vmem:[#allocation2 + $0x50] sm:$0xff] %vm3675_vm13, %v3956_v48  ;;  %v6842_v48 = vld [vmem:[#allocation4 + $0x8] sm:$0xff]  }
 0x2d1   :  { %4046 = vst.msk [vmem:[#allocation2 + $0x50] sm:$0xff] %vm3758_vm14, %v4029_v29  ;;  %v6837_v29 = vld [vmem:[#allocation4 + $0x250] sm:$0xff]  }
 0x2d2   :  { %v3746_v38 = vpop.permute.xlu0 %3745  ;;  %6626 = vmatprep.subr.bf16.mxu0 %v6837_v29 }
 0x2d3   :  { %3763 = vst.msk [vmem:[#allocation2 + $0x60] sm:$0xff] %vm3758_vm14, %v3746_v38  ;;  %v6843_v38 = vld [vmem:[#allocation4 + $0x50] sm:$0xff]   ;;  %6627 = vmatpush3.bf16.msra.mxu0 %v6839_v55 }
 0x2d8   :  { %v4119_v18 = vld [vmem:[#allocation2 + $0x50] sm:$0xff] }
 0x2d9   :  { %v4134_v17 = vpack.c.bf16 %v4119_v18, %v4116_v58  ;;  %v6844_v58 = vld [vmem:[#allocation4 + $0x10] sm:$0xff]   ;;  %v6845_v18 = vld [vmem:[#allocation4 + $0x58] sm:$0xff]  }
 0x2da   :  { %v4121_v44 = vld [vmem:[#allocation2 + $0x60] sm:$0xff] }
 0x2db   :  { %4345 = vmatprep.mubr.bf16.mxu1 %v4134_v17 }
 0x2dc   :  { %4346 = vmatmul.mubr.bf16.gmra.mrb[4].mxu1 %v4133_v28 }
 0x2e0   :  { %v3880_v25 = vpop.permute.xlu0 %3879 }
 0x2e1   :  { %3896 = vst.msk [vmem:[#allocation2 + $0x68] sm:$0xff] %vm3592_vm12, %v3880_v25 }
 0x2ec   :  { %v3582_v50 = vpop.permute.xlu1 %3581 }
 0x2ed   :  { %3598 = vst.msk [vmem:[#allocation2 + $0x78] sm:$0xff] %vm3592_vm12, %v3582_v50 }
 0x2ef   :  { %v3958_v41 = vpop.permute.xlu0 %3957 }
 0x2f0   :  { %3974 = vst.msk [vmem:[#allocation2 + $0x68] sm:$0xff] %vm3675_vm13, %v3958_v41 }
 0x2f2   :  { %v3665_v13 = vpop.permute.xlu1 %3664 }
 0x2f3   :  { %3681 = vst.msk [vmem:[#allocation2 + $0x78] sm:$0xff] %vm3675_vm13, %v3665_v13 }
 0x2f7   :  { %v4031_v20 = vpop.permute.xlu0 %4030 }
 0x2f8   :  { %4047 = vst.msk [vmem:[#allocation2 + $0x68] sm:$0xff] %vm3758_vm14, %v4031_v20 }
 0x2fd   :  { %v3748_v39 = vpop.permute.xlu1 %3747 }
 0x2fe   :  { %3764 = vst.msk [vmem:[#allocation2 + $0x78] sm:$0xff] %vm3758_vm14, %v3748_v39  ;;  %v6998_v39 = vmov 1966171168  }
 0x2ff   :  { %v4122_v56 = vld [vmem:[#allocation2 + $0x68] sm:$0xff] }
 0x304   :  { %v3884_v26 = vpop.permute.xlu0 %3883 }
 0x305   :  { %3898 = vst.msk [vmem:[#allocation2 + $0x98] sm:$0x3] %vm3599_vm15, %v3884_v26  ;;  %v4124_v4 = vld [vmem:[#allocation2 + $0x78] sm:$0xff]  ;;  %v4449_v26 = vunpack.c.l.s4 %v6998_v39 }
 0x306   :  { %v4136_v9 = vpack.c.bf16 %v4124_v4, %v4121_v44 }
 0x307   :  { %v3882_v32 = vpop.permute.xlu1 %3881  ;;  %v4450_v4 = vunpack.c.0.s8 %v4449_v26 }
 0x308   :  { %3897 = vst.msk [vmem:[#allocation2 + $0x80] sm:$0xff] %vm3592_vm12, %v3882_v32 }
 0x310   :  { %v3960_v47 = vpop.permute.xlu1 %3959 }
 0x311   :  { %3975 = vst.msk [vmem:[#allocation2 + $0x80] sm:$0xff] %vm3675_vm13, %v3960_v47 }
 0x314   :  { %v4033_v37 = vpop.permute.xlu1 %4032 }
 0x315   :  { %4048 = vst.msk [vmem:[#allocation2 + $0x80] sm:$0xff] %vm3758_vm14, %v4033_v37 }
 0x317   :  { %v3962_v57 = vpop.permute.xlu0 %3961 }
 0x318   :  { %3976 = vst.msk [vmem:[#allocation2 + $0x98] sm:$0x3] %vm3682_vm2, %v3962_v57  ;;  %v3584_v23 = vpop.permute.xlu1 %3583  ;;  %v6999_v57 = vmov 1935823168  }
 0x319   :  { %3600 = vst.msk [vmem:[#allocation2 + $0x90] sm:$0x3] %vm3599_vm15, %v3584_v23  ;;  %v4765_v23 = vunpack.c.l.s4 %v6999_v57 }
 0x31b   :  { %v4035_v14 = vpop.permute.xlu0 %4034 }
 0x31c   :  { %4049 = vst.msk [vmem:[#allocation2 + $0x98] sm:$0x3] %vm3765_vm3, %v4035_v14  ;;  %v3667_v5 = vpop.permute.xlu1 %3666  ;;  %v4125_v1 = vld [vmem:[#allocation2 + $0x80] sm:$0xff] }
 0x31d   :  { %3683 = vst.msk [vmem:[#allocation2 + $0x90] sm:$0x3] %vm3682_vm2, %v3667_v5  ;;  %v4137_v16 = vpack.c.bf16 %v4125_v1, %v4122_v56  ;;  %v6328_v14 = vld [vmem:[%s9693_s4] ss:$0 sm:$0xff] }
 0x31f   :  { %4353 = vmatprep.mubr.bf16.mxu1 %v4137_v16  ;;  %v4766_v16 = vunpack.c.0.s8 %v4765_v23 }
 0x320   :  { %4354 = vmatmul.mubr.bf16.gmra.mrb[8].mxu1 %v4136_v9  ;;  %v3750_v45 = vpop.permute.xlu1 %3749  ;;  %v9837_v9 = vld [vmem:[#allocation10_spill] sm:$0xff] }
 0x321   :  { %3766 = vst.msk [vmem:[#allocation2 + $0x90] sm:$0x3] %vm3765_vm3, %v3750_v45  ;;  %v9462_v45 = vsub.s32 %v4450_v4, %v9837_v9  ;;  %v9465_v3 = vsub.s32 %v4766_v16, %v9837_v9 }
 0x323   :  { %v4128_v49 = vld [vmem:[#allocation2 + $0x98] sm:$0x3] }
 0x324   :  { %v4140_v30 = vpack.c.bf16 %v4128_v49, %v4128_v49 }
 0x326   :  { %4361 = vmatprep.mubr.bf16.mxu1 %v4140_v30 }
 0x328   :  { %v4127_v43 = vld [vmem:[#allocation2 + $0x90] sm:$0x3] }
 0x329   :  { %v4139_v52 = vpack.c.bf16 %v4127_v43, %v4127_v43 }
 0x32b   :  { %4362 = vmatmul.mubr.bf16.gmra.mrb[12].mxu1 %v4139_v52 }
 0x32c   :  { %6781 = vmatprep.mubr.msk.bf16.mxu1 %vm3510_vm11, %v4132_v54 }
 0x333   :  { %6782 = vmatmul.mubr.msk.bf16.vlgmr.msra.gmra.mrb[16].mxu1 %vm3510_vm11, %v4135_v62 }
 0x334   :  { %6785 = vmatprep.mubr.msk.bf16.mxu1 %vm3510_vm11, %v4138_v59  ;;  %6535 = vmatpush3.bf16.msra.mxu1 %v6840_v36 }
 0x335   :  { %6536 = vmatprep.subr.bf16.mxu1 %v6841_v63 }
 0x338   :  { %6537 = vmatpush3.bf16.msra.mxu1 %v6842_v48 }
 0x339   :  { %6538 = vmatprep.subr.bf16.mxu1 %v6843_v38 }
 0x33b   :  { %6786 = vmatmul.mubr.msk.bf16.gmra.mrb[20].mxu1 %vm3510_vm11, %v4141_v10 }
 0x33c   :  { %6539 = vmatpush3.bf16.msra.mxu1 %v6844_v58 }
 0x33d   :  { %6540 = vmatprep.subr.bf16.mxu1 %v6845_v18 }
 0x340   :  { %6541 = vmatpush3.bf16.msra.mxu1 %v6846_v6 }
 0x372   :  { %v6504_v0 = vpop.f32.mrb[0].mxu1 }
 0x373   :  { %v6505_v31 = vpop.f32.mrb[1].mxu1 }
 0x374   :  { %v6506_v35 = vadd.f32 %v6505_v31, %v6504_v0  ;;  %v6507_v7 = vpop.f32.mrb[2].mxu1 }
 0x375   :  { %v6508_v34 = vpop.f32.mrb[3].mxu1 }
 0x376   :  { %v6509_v19 = vadd.f32 %v6508_v34, %v6507_v7  ;;  %v4340_v1 = vadd.f32 %v6506_v35, %v6328_v14 }
 0x378   :  { %v4343_v52 = vadd.f32 %v6509_v19, %v6328_v14 }
 0x3af   :  { %v6510_v8 = vpop.f32.mrb[4].mxu1 }
 0x3b0   :  { %v6511_v46 = vpop.f32.mrb[5].mxu1 }
 0x3b1   :  { %v6512_v51 = vadd.f32 %v6511_v46, %v6510_v8  ;;  %v6513_v53 = vpop.f32.mrb[6].mxu1 }
 0x3b2   :  { %v6514_v24 = vpop.f32.mrb[7].mxu1 }
 0x3b3   :  { %v6515_v11 = vadd.f32 %v6514_v24, %v6513_v53  ;;  %v4348_v5 = vadd.f32 %v6512_v51, %v6328_v14 }
 0x3b5   :  { %v4351_v30 = vadd.f32 %v6515_v11, %v6328_v14 }
 0x3f3   :  { %v6516_v17 = vpop.f32.mrb[8].mxu1 }
 0x3f4   :  { %v6517_v12 = vpop.f32.mrb[9].mxu1 }
 0x3f5   :  { %v6518_v28 = vadd.f32 %v6517_v12, %v6516_v17  ;;  %v6519_v25 = vpop.f32.mrb[10].mxu1 }
 0x3f6   :  { %v6520_v50 = vpop.f32.mrb[11].mxu1 }
 0x3f7   :  { %v6521_v41 = vadd.f32 %v6520_v50, %v6519_v25  ;;  %v4356_v10 = vadd.f32 %v6518_v28, %v6328_v14 }
 0x3f9   :  { %v4359_v7 = vadd.f32 %v6521_v41, %v6328_v14 }
 0x3fe   :  { %v6522_v13 = vpop.f32.mrb[12].mxu1 }
 0x3ff   :  { %v6523_v20 = vpop.f32.mrb[13].mxu1 }
 0x400   :  { %v6524_v32 = vadd.f32 %v6523_v20, %v6522_v13  ;;  %v6525_v47 = vpop.f32.mrb[14].mxu1 }
 0x401   :  { %v6526_v37 = vpop.f32.mrb[15].mxu1 }
 0x402   :  { %v4364_v46 = vadd.f32 %v6524_v32, %v6328_v14 }
 0x406   :  { %v6783_v56 = vpop.f32.mrb[16].mxu1 }
 0x407   :  { %v4412_v44 = vadd.f32 %v6783_v56, %v4348_v5  ;;  %v4403_v49 = vpop.f32.mrb[17].mxu1 }
 0x408   :  { %v4404_v2 = vadd.f32 %v4403_v49, %v4340_v1  ;;  %v6784_v43 = vpop.f32.mrb[18].mxu1 }
 0x409   :  { %v4435_v33 = vmax.f32 %v4412_v44, 0.0  ;;  %v4415_v54 = vadd.f32 %v6784_v43, %v4351_v30  ;;  %v4406_v60 = vpop.f32.mrb[19].mxu1  ;;  %v6847_v30 = vld [vmem:[#allocation4 + $0x60] sm:$0xff]  }
 0x40a   :  { %v4433_v22 = vmax.f32 %v4404_v2, 0.0  ;;  %v4407_v62 = vadd.f32 %v4406_v60, %v4343_v52  ;;  %6542 = vmatprep.subr.bf16.mxu1 %v6847_v30 }
 0x40b   :  { %v4545_v42 = vcombine.high %v4435_v33, %v4435_v33  ;;  %v9468_v59 = vrot.slane %v4435_v33, %v9462_v45  ;;  %v4436_v61 = vmax.f32 %v4415_v54, 0.0 }
 0x40c   :  { %v4447_v0 = vcombine.high %v4433_v22, %v4433_v22  ;;  %v4454_v31 = vrot.slane %v4433_v22, %v9462_v45  ;;  %v4434_v35 = vmax.f32 %v4407_v62, 0.0 }
 0x40d   :  { %v9472_v34 = vrot.slane %v4545_v42, %v9462_v45  ;;  %v4560_v19 = vcombine.high %v9468_v59, %v9468_v59  ;;  %v4594_v8 = vcombine.high %v4436_v61, %v4436_v61  ;;  %v9478_v51 = vrot.slane %v9468_v59, %v9462_v45 }
 0x40e   :  { %v9481_v53 = vrot.slane %v4447_v0, %v9462_v45  ;;  %v4462_v24 = vcombine.high %v4454_v31, %v4454_v31  ;;  %v4601_v11 = vrot.slane %v4436_v61, %v9462_v45  ;;  %v6787_v15 = vpop.f32.mrb[20].mxu1  ;;  %v4470_v21 = vrot.slane %v4454_v31, %v9462_v45 }
 0x40f   :  { %v4561_v27 = vcombine.high %v9472_v34, %v9472_v34  ;;  %v4608_v40 = vrot.slane %v4594_v8, %v9462_v45  ;;  %v4496_v36 = vcombine.high %v4434_v35, %v4434_v35  ;;  %v4419_v63 = vpop.f32.mrb[21].mxu1  ;;  %v9490_v29 = vrot.slane %v9472_v34, %v9462_v45 }
 0x410   :  { %v4463_v48 = vcombine.high %v9481_v53, %v9481_v53  ;;  %v9496_v38 = vrot.slane %v9481_v53, %v9462_v45  ;;  %v4609_v55 = vcombine.high %v4601_v11, %v4601_v11  ;;  %v6788_v58 = vpop.f32.mrb[22].mxu1  ;;  %v4503_v17 = vrot.slane %v4434_v35, %v9462_v45  ;;  %v6849_v53 = vld [vmem:[#allocation4 + $0x68] sm:$0xff]  }
 0x411   :  { %v4610_v18 = vcombine.high %v4608_v40, %v4608_v40  ;;  %v9500_v12 = vrot.slane %v4496_v36, %v9462_v45  ;;  %v4428_v28 = vadd.f32 %v6787_v15, %v4364_v46  ;;  %v4422_v25 = vpop.f32.mrb[23].mxu1  ;;  %v4617_v50 = vrot.slane %v4601_v11, %v9462_v45  ;;  %v6848_v46 = vld [vmem:[#allocation4 + $0x20] sm:$0xff]  }
 0x412   :  { %v4631_v41 = vrot.slane %v4609_v55, %v9462_v45  ;;  %v4420_v13 = vadd.f32 %v4419_v63, %v4356_v10  ;;  %v4423_v20 = vadd.f32 %v4422_v25, %v4359_v7  ;;  %v4511_v26 = vcombine.high %v4503_v17, %v4503_v17  ;;  %6543 = vmatpush3.bf16.msra.mxu1 %v6848_v46 }
 0x413   :  { %v9505_v39 = vrot.slane %v4610_v18, %v9462_v45  ;;  %v4512_v32 = vcombine.high %v9500_v12, %v9500_v12  ;;  %v4484_v47 = vrot.slane %v4462_v24, %v9462_v45  ;;  %v4519_v23 = vrot.slane %v4503_v17, %v9462_v45  ;;  %6544 = vmatprep.subr.bf16.mxu1 %v6849_v53 }
 0x414   :  { %v4763_v37 = vcombine.low %v4470_v21, %v4631_v41  ;;  %v6351_v57 = vcombine.high %v4470_v21, %v4631_v41  ;;  %v4439_v14 = vmax.f32 %v4428_v28, 0.0  ;;  %v4437_v56 = vmax.f32 %v4420_v13, 0.0  ;;  %v6851_v13 = vld [vmem:[#allocation4 + $0x70] sm:$0xff]  }
 0x415   :  { %v4809_v4 = vcombine.low %v9496_v38, %v9505_v39  ;;  %v6352_v5 = vcombine.high %v9496_v38, %v9505_v39  ;;  %v4438_v1 = vmax.f32 %v4423_v20, 0.0  ;;  %v4639_v49 = vcombine.high %v4617_v50, %v4617_v50  ;;  %v6852_v20 = vld [vmem:[#allocation4 + $0x258] sm:$0xff]   ;;  %v6862_v39 = vld [vmem:[#allocation4 + $0x268] sm:$0xff]  }
 0x416   :  { %v4770_v16 = vrot.slane %v4763_v37, %v9465_v3  ;;  %v4794_v44 = vrot.slane %v6351_v57, %v9465_v3  ;;  %v9518_v9 = vrot.slane %v4439_v14, %v9462_v45  ;;  %v4643_v2 = vcombine.high %v4437_v56, %v4437_v56  ;;  %6628 = vmatprep.subr.bf16.mxu0 %v6852_v20 }
 0x417   :  { %v4650_v43 = vrot.slane %v4437_v56, %v9462_v45  ;;  %v4692_v52 = vcombine.high %v4438_v1, %v4438_v1  ;;  %v4699_v33 = vrot.slane %v4438_v1, %v9462_v45  ;;  %v9524_v54 = vrot.slane %v9500_v12, %v9462_v45 }
 0x418   :  { %v4748_v60 = vcombine.high %v9518_v9, %v9518_v9  ;;  %4773 = vst.msk [vmem:[#allocation3] sm:$0x3] %vm4772_vm4, %v4770_v16  ;;  %4796 = vst.msk [vmem:[#allocation3 + $0x2] sm:$0x3] %vm4772_vm4, %v4794_v44  ;;  %v4774_v22 = vcombine.low %v4484_v47, %v4639_v49  ;;  %v4494_v62 = vcombine.high %v4484_v47, %v4484_v47 }
 0x419   :  { %v4657_v42 = vrot.slane %v4643_v2, %v9462_v45  ;;  %v4658_v61 = vcombine.high %v4650_v43, %v4650_v43  ;;  %v4666_v10 = vrot.slane %v4650_v43, %v9462_v45  ;;  %v9533_v0 = vrot.slane %v4692_v52, %v9462_v45 }
 0x41a   :  { %v4762_v31 = vrot.slane %v4748_v60, %v9462_v45  ;;  %v4707_v35 = vcombine.high %v4699_v33, %v4699_v33  ;;  %v9537_v7 = vrot.slane %v4699_v33, %v9462_v45  ;;  %v4781_v8 = vrot.slane %v4774_v22, %v9465_v3  ;;  %v6853_v33 = vld [vmem:[#allocation4 + $0x30] sm:$0xff]   ;;  %v6855_v60 = vld [vmem:[#allocation4 + $0x78] sm:$0xff]  }
 0x41b   :  { %v4659_v24 = vcombine.high %v4657_v42, %v4657_v42  ;;  %v4680_v11 = vrot.slane %v4658_v61, %v9462_v45  ;;  %v4708_v15 = vcombine.high %v9533_v0, %v9533_v0  ;;  %v4624_v21 = vrot.slane %v4608_v40, %v9462_v45 }
 0x41c   :  { %v5029_v36 = vcombine.low %v4617_v50, %v4762_v31  ;;  %v4729_v63 = vrot.slane %v4707_v35, %v9462_v45  ;;  %4782 = vrot.lane.b32.xlu0 %v4781_v8, %s6991_s11  ;;  %v4491_v6 = vrot.slane %v4463_v48, %v9462_v45  ;;  %v4533_v55 = vrot.slane %v4511_v26, %v9462_v45  ;;  %v6850_v48 = vld [vmem:[#allocation4 + $0x28] sm:$0xff]  }
 0x41d   :  { %v9549_v58 = vrot.slane %v4659_v24, %v9462_v45  ;;  %v4853_v18 = vcombine.low %v4519_v23, %v4680_v11  ;;  %v6353_v17 = vcombine.high %v4519_v23, %v4680_v11  ;;  %v9552_v28 = vrot.slane %v4708_v15, %v9462_v45  ;;  %6545 = vmatpush3.bf16.msra.mxu1 %v6850_v48  ;;  %v6856_v11 = vld [vmem:[#allocation4 + $0x38] sm:$0xff]  }
 0x41e   :  { %v5036_v40 = vrot.slane %v5029_v36, %v9465_v3  ;;  %v4941_v25 = vcombine.low %v9478_v51, %v4729_v63  ;;  %v6355_v50 = vcombine.high %v9478_v51, %v4729_v63  ;;  %v4797_v41 = vcombine.low %v4494_v62, %v4624_v21  ;;  %6546 = vmatprep.subr.bf16.mxu1 %v6851_v13  ;;  %v6857_v63 = vld [vmem:[#allocation4 + $0xc0] sm:$0xff]   ;;  %v6870_v48 = vld [vmem:[#allocation4 + $0x278] sm:$0xff]  }
 0x41f   :  { %v4860_v26 = vrot.slane %v4853_v18, %v9465_v3  ;;  %v4882_v47 = vrot.slane %v6353_v17, %v9465_v3  ;;  %v4897_v37 = vcombine.low %v9524_v54, %v9549_v58  ;;  %v6354_v57 = vcombine.high %v9524_v54, %v9549_v58  ;;  %v6854_v54 = vld [vmem:[#allocation4 + $0x218] sm:$0xff]   ;;  %v6860_v18 = vld [vmem:[#allocation4 + $0x220] sm:$0xff]  }
 0x420   :  { %5038 = vst.msk [vmem:[#allocation3 + $0x18] sm:$0x3] %vm4772_vm4, %v5036_v40  ;;  %v4948_v23 = vrot.slane %v4941_v25, %v9465_v3  ;;  %v4970_v51 = vrot.slane %v6355_v50, %v9465_v3  ;;  %v4985_v14 = vcombine.low %v9490_v29, %v9552_v28  ;;  %v6356_v56 = vcombine.high %v9490_v29, %v9552_v28  ;;  %v6864_v25 = vld [vmem:[#allocation4 + $0x228] sm:$0xff]   ;;  %v6866_v50 = vld [vmem:[#allocation4 + $0x270] sm:$0xff]  }
 0x421   :  { %4862 = vst.msk [vmem:[#allocation3 + $0x8] sm:$0x3] %vm4772_vm4, %v4860_v26  ;;  %4884 = vst.msk [vmem:[#allocation3 + $0xa] sm:$0x3] %vm4772_vm4, %v4882_v47  ;;  %v4804_v1 = vrot.slane %v4797_v41, %v9465_v3  ;;  %v4640_v16 = vcombine.high %v4624_v21, %v4624_v21  ;;  %v4495_v44 = vcombine.high %v4491_v6, %v4491_v6  ;;  %6629 = vmatpush3.bf16.msra.mxu0 %v6854_v54  ;;  %v6868_v41 = vld [vmem:[#allocation4 + $0x230] sm:$0xff]   ;;  %v6872_v26 = vld [vmem:[#allocation4 + $0x238] sm:$0xff]  }
 0x422   :  { %v4688_v49 = vcombine.high %v4666_v10, %v4666_v10  ;;  %4950 = vst.msk [vmem:[#allocation3 + $0x10] sm:$0x3] %vm4772_vm4, %v4948_v23  ;;  %4972 = vst.msk [vmem:[#allocation3 + $0x12] sm:$0x3] %vm4772_vm4, %v4970_v51  ;;  %v4543_v30 = vcombine.high %v4533_v55, %v4533_v55  ;;  %v4673_v2 = vrot.slane %v4657_v42, %v9462_v45  ;;  %6547 = vmatpush3.bf16.msra.mxu1 %v6853_v33  ;;  %v9838_v47 = vmov 0.0  }
 0x423   :  { %v4540_v43 = vrot.slane %v4512_v32, %v9462_v45  ;;  %v4582_v52 = vrot.slane %v4560_v19, %v9462_v45  ;;  %4805 = vrot.lane.b32.xlu1 %v4804_v1, %s6991_s11  ;;  %v4819_v22 = vcombine.low %v4491_v6, %v4640_v16  ;;  %v4841_v62 = vcombine.low %v4495_v44, %v4666_v10  ;;  %v6858_v6 = vld [vmem:[#allocation4 + $0x260] sm:$0xff]   ;;  %v9839_v44 = vld [vmem:[#allocation11_spill] sm:$0xff] }
 0x424   :  { %v4863_v61 = vcombine.low %v4533_v55, %v4688_v49  ;;  %v4737_v42 = vcombine.high %v9537_v7, %v9537_v7  ;;  %v4885_v31 = vcombine.low %v4543_v30, %v4673_v2  ;;  %v4689_v12 = vcombine.high %v4673_v2, %v4673_v2  ;;  %6548 = vmatprep.subr.bf16.mxu1 %v6855_v60  ;;  %v6859_v60 = vld [vmem:[#allocation4 + $0x80] sm:$0xff]  }
 0x425   :  { %v4544_v32 = vcombine.high %v4540_v43, %v4540_v43  ;;  %v4755_v59 = vrot.slane %v9518_v9, %v9462_v45  ;;  %v4826_v19 = vrot.slane %v4819_v22, %v9465_v3  ;;  %v4848_v35 = vrot.slane %v4841_v62, %v9465_v3  ;;  %6630 = vmatprep.subr.bf16.mxu0 %v6858_v6 }
 0x426   :  { %v4951_v8 = vcombine.low %v4582_v52, %v4737_v42  ;;  %v4907_v46 = vcombine.low %v4540_v43, %v4689_v12  ;;  %v4592_v53 = vcombine.high %v4582_v52, %v4582_v52  ;;  %v4722_v24 = vrot.slane %v9533_v0, %v9462_v45  ;;  %6549 = vmatpush3.bf16.msra.mxu1 %v6856_v11 }
 0x427   :  { %v4929_v10 = vcombine.low %v4544_v32, %v9537_v7  ;;  %4827 = vrot.lane.b32.xlu0 %v4826_v19, %s6991_s11  ;;  %4849 = vrot.lane.b32.xlu1 %v4848_v35, %s6991_s11  ;;  %v4870_v9 = vrot.slane %v4863_v61, %v9465_v3  ;;  %v4589_v15 = vrot.slane %v4561_v27, %v9462_v45  ;;  %v6861_v61 = vld [vmem:[#allocation4 + $0xc8] sm:$0xff]   ;;  %v6867_v19 = vld [vmem:[#allocation4 + $0x90] sm:$0xff]   ;;  %v6869_v35 = vld [vmem:[#allocation4 + $0xd8] sm:$0xff]  }
 0x428   :  { %v4816_v7 = vrot.slane %v4809_v4, %v9465_v3  ;;  %v4892_v0 = vrot.slane %v4885_v31, %v9465_v3  ;;  %v4973_v21 = vcombine.low %v4592_v53, %v4722_v24  ;;  %v4738_v36 = vcombine.high %v4722_v24, %v4722_v24  ;;  %6556 = vmatprep.subr.bf16.mxu1 %v6857_v63  ;;  %v6863_v32 = vld [vmem:[#allocation4 + $0x88] sm:$0xff]   ;;  %v6873_v53 = vld [vmem:[#allocation4 + $0xe0] sm:$0xff]   ;;  %v6879_v63 = vld [vmem:[#allocation4 + $0xf0] sm:$0xff]  }
 0x429   :  { %v4593_v55 = vcombine.high %v4589_v15, %v4589_v15  ;;  %v4838_v34 = vrot.slane %v6352_v5, %v9465_v3  ;;  %v4904_v45 = vrot.slane %v4897_v37, %v9465_v3  ;;  %v4926_v27 = vrot.slane %v6354_v57, %v9465_v3  ;;  %6631 = vmatpush3.bf16.msra.mxu0 %v6860_v18  ;;  %v6885_v18 = vld [vmem:[#allocation4 + $0x140] sm:$0xff]  }
 0x42a   :  { %4818 = vst.msk [vmem:[#allocation3 + $0x4] sm:$0x3] %vm4772_vm4, %v4816_v7  ;;  %v4995_v4 = vcombine.low %v4589_v15, %v4738_v36  ;;  %v4992_v58 = vrot.slane %v4985_v14, %v9465_v3  ;;  %v5014_v38 = vrot.slane %v6356_v56, %v9465_v3  ;;  %v4914_v5 = vrot.slane %v4907_v46, %v9465_v3  ;;  %v6871_v46 = vld [vmem:[#allocation4 + $0x98] sm:$0xff]   ;;  %v6875_v15 = vld [vmem:[#allocation4 + $0x300] sm:$0xff]   ;;  %v6878_v36 = vld [vmem:[#allocation4 + $0x308] sm:$0xff]  }
 0x42b   :  { %4871 = vrot.lane.b32.xlu0 %v4870_v9, %s6991_s11  ;;  %4893 = vrot.lane.b32.xlu1 %v4892_v0, %s6991_s11  ;;  %v5017_v17 = vcombine.low %v4593_v55, %v4755_v59  ;;  %4840 = vst.msk [vmem:[#allocation3 + $0x6] sm:$0x3] %vm4772_vm4, %v4838_v34  ;;  %4906 = vst.msk [vmem:[#allocation3 + $0xc] sm:$0x3] %vm4772_vm4, %v4904_v45  ;;  %v4936_v40 = vrot.slane %v4929_v10, %v9465_v3  ;;  %v6865_v59 = vld [vmem:[#allocation4 + $0xd0] sm:$0xff]   ;;  %v6874_v9 = vld [vmem:[#allocation4 + $0xa0] sm:$0xff]  }
 0x42c   :  { %4928 = vst.msk [vmem:[#allocation3 + $0xe] sm:$0x3] %vm4772_vm4, %v4926_v27  ;;  %4994 = vst.msk [vmem:[#allocation3 + $0x14] sm:$0x3] %vm4772_vm4, %v4992_v58  ;;  %6632 = vmatprep.subr.bf16.mxu0 %v6862_v39  ;;  %v4958_v29 = vrot.slane %v4951_v8, %v9465_v3  ;;  %v4980_v28 = vrot.slane %v4973_v21, %v9465_v3  ;;  %v5002_v13 = vrot.slane %v4995_v4, %v9465_v3  ;;  %v6876_v0 = vld [vmem:[#allocation4 + $0xe8] sm:$0xff]   ;;  %v6880_v55 = vld [vmem:[#allocation4 + $0xb0] sm:$0xff]  }
 0x42d   :  { %5016 = vst.msk [vmem:[#allocation3 + $0x16] sm:$0x3] %vm4772_vm4, %v5014_v38  ;;  %6633 = vmatpush3.bf16.msra.mxu0 %v6864_v25  ;;  %v5024_v20 = vrot.slane %v5017_v17, %v9465_v3  ;;  %v6877_v21 = vld [vmem:[#allocation4 + $0xa8] sm:$0xff]   ;;  %v6881_v34 = vld [vmem:[#allocation4 + $0x310] sm:$0xff]   ;;  %v6882_v45 = vld [vmem:[#allocation4 + $0xf8] sm:$0xff]  }
 0x42e   :  { %6634 = vmatprep.subr.bf16.mxu0 %v6866_v50  ;;  %v6883_v4 = vld [vmem:[#allocation4 + $0xb8] sm:$0xff]   ;;  %v6886_v39 = vld [vmem:[#allocation4 + $0x100] sm:$0xff]   ;;  %v6887_v25 = vld [vmem:[#allocation4 + $0x148] sm:$0xff]  }
 0x42f   :  { %4915 = vrot.lane.b32.xlu0 %v4914_v5, %s6991_s11  ;;  %4937 = vrot.lane.b32.xlu1 %v4936_v40, %s6991_s11  ;;  %v6884_v58 = vld [vmem:[#allocation4 + $0x318] sm:$0xff]  }
 0x430   :  { %v6357_v17 = vld.sshfl [vmem:[#allocation3 + $0x18] sm:$0x3 pattern:$0x76325410] }
 0x431   :  { %6635 = vmatpush3.bf16.msra.mxu0 %v6868_v41  ;;  %v5130_v40 = vpack.c.bf16 %v6357_v17, %v6357_v17  ;;  %v6890_v41 = vld [vmem:[#allocation4 + $0x110] sm:$0xff]  }
 0x432   :  { %6636 = vmatprep.subr.bf16.mxu0 %v6870_v48  ;;  %v6891_v48 = vld [vmem:[#allocation4 + $0x158] sm:$0xff]  }
 0x433   :  { %4959 = vrot.lane.b32.xlu0 %v4958_v29, %s6991_s11  ;;  %4981 = vrot.lane.b32.xlu1 %v4980_v28, %s6991_s11  ;;  %v6888_v29 = vld [vmem:[#allocation4 + $0x108] sm:$0xff]   ;;  %v6889_v28 = vld [vmem:[#allocation4 + $0x150] sm:$0xff]  }
 0x435   :  { %6637 = vmatpush3.bf16.msra.mxu0 %v6872_v26  ;;  %v6894_v26 = vld [vmem:[#allocation4 + $0x120] sm:$0xff]  }
 0x436   :  { %6789 = vmatprep.subr.bf16.mxu0 %v9838_v47 }
 0x437   :  { %5003 = vrot.lane.b32.xlu0 %v5002_v13, %s6991_s11  ;;  %5025 = vrot.lane.b32.xlu1 %v5024_v20, %s6991_s11  ;;  %v6892_v13 = vld [vmem:[#allocation4 + $0x118] sm:$0xff]   ;;  %v6893_v20 = vld [vmem:[#allocation4 + $0x160] sm:$0xff]  }
 0x48e   :  { %v4783_v37 = vpop.permute.xlu0 %4782 }
 0x48f   :  { %4786 = vst.msk [vmem:[#allocation3] sm:$0x3] %vm4785_vm5, %v4783_v37  ;;  %v6896_v37 = vld [vmem:[#allocation4 + $0x128] sm:$0xff]  }
 0x495   :  { %v4806_v57 = vpop.permute.xlu1 %4805 }
 0x496   :  { %4808 = vst.msk [vmem:[#allocation3 + $0x2] sm:$0x3] %vm4785_vm5, %v4806_v57  ;;  %v6897_v57 = vld [vmem:[#allocation4 + $0x170] sm:$0xff]  }
 0x499   :  { %v4828_v23 = vpop.permute.xlu0 %4827  ;;  %v4850_v51 = vpop.permute.xlu1 %4849 }
 0x49a   :  { %4830 = vst.msk [vmem:[#allocation3 + $0x4] sm:$0x3] %vm4785_vm5, %v4828_v23  ;;  %4852 = vst.msk [vmem:[#allocation3 + $0x6] sm:$0x3] %vm4785_vm5, %v4850_v51  ;;  %v6898_v51 = vld [vmem:[#allocation4 + $0x130] sm:$0xff]  }
 0x49d   :  { %v4872_v3 = vpop.permute.xlu0 %4871  ;;  %v4894_v14 = vpop.permute.xlu1 %4893 }
 0x49e   :  { %4874 = vst.msk [vmem:[#allocation3 + $0x8] sm:$0x3] %vm4785_vm5, %v4872_v3  ;;  %4896 = vst.msk [vmem:[#allocation3 + $0xa] sm:$0x3] %vm4785_vm5, %v4894_v14  ;;  %v6899_v3 = vld [vmem:[#allocation4 + $0x178] sm:$0xff]  }
 0x4a1   :  { %v4916_v56 = vpop.permute.xlu0 %4915  ;;  %v4938_v1 = vpop.permute.xlu1 %4937  ;;  %v5039_v16 = vld [vmem:[#allocation3] sm:$0xff] }
 0x4a2   :  { %4918 = vst.msk [vmem:[#allocation3 + $0xc] sm:$0x3] %vm4785_vm5, %v4916_v56  ;;  %4940 = vst.msk [vmem:[#allocation3 + $0xe] sm:$0x3] %vm4785_vm5, %v4938_v1  ;;  %v5054_v49 = vrot.slane %v5039_v16, %v9839_v44  ;;  %v5047_v30 = vcombine.high %v5039_v16, %v5039_v16  ;;  %v6900_v56 = vld [vmem:[#allocation4 + $0x138] sm:$0xff]   ;;  %v6901_v1 = vld [vmem:[#allocation4 + $0x1c0] sm:$0xff]  }
 0x4a4   :  { %v5062_v2 = vcombine.high %v5054_v49, %v5054_v49  ;;  %v9648_v43 = vrot.slane %v5047_v30, %v9839_v44  ;;  %v5118_v62 = vpack.c.bf16 %v5054_v49, %v5054_v49  ;;  %v6902_v49 = vld [vmem:[#allocation4 + $0x180] sm:$0xff]  }
 0x4a5   :  { %v4960_v52 = vpop.permute.xlu0 %4959  ;;  %v4982_v33 = vpop.permute.xlu1 %4981 }
 0x4a6   :  { %4962 = vst.msk [vmem:[#allocation3 + $0x10] sm:$0x3] %vm4785_vm5, %v4960_v52  ;;  %4984 = vst.msk [vmem:[#allocation3 + $0x12] sm:$0x3] %vm4785_vm5, %v4982_v33  ;;  %v5119_v54 = vpack.c.bf16 %v5062_v2, %v5062_v2  ;;  %v5063_v22 = vcombine.high %v9648_v43, %v9648_v43  ;;  %v5120_v5 = vpack.c.bf16 %v9648_v43, %v9648_v43  ;;  %v6904_v2 = vld [vmem:[#allocation4 + $0x1c8] sm:$0xff]   ;;  %v6906_v33 = vld [vmem:[#allocation4 + $0x1d0] sm:$0xff]  }
 0x4a7   :  { %v6905_v52 = vld [vmem:[#allocation4 + $0x188] sm:$0xff]  }
 0x4a8   :  { %5974 = vmatprep.mubr.bf16.mxu1 %v5119_v54  ;;  %v5121_v42 = vpack.c.bf16 %v5063_v22, %v5063_v22  ;;  %v6907_v54 = vld [vmem:[#allocation4 + $0x190] sm:$0xff]   ;;  %v6909_v22 = vld [vmem:[#allocation4 + $0x198] sm:$0xff]  }
 0x4a9   :  { %v5004_v31 = vpop.permute.xlu0 %5003  ;;  %5975 = vmatmul.mubr.bf16.vlgmr.msra.gmra.mrb[24].mxu1 %v5118_v62  ;;  %v5026_v12 = vpop.permute.xlu1 %5025  ;;  %v5040_v6 = vld [vmem:[#allocation3 + $0x8] sm:$0xff]  ;;  %v6910_v62 = vld [vmem:[#allocation4 + $0x1e0] sm:$0xff]  }
 0x4aa   :  { %5006 = vst.msk [vmem:[#allocation3 + $0x14] sm:$0x3] %vm4785_vm5, %v5004_v31  ;;  %6557 = vmatpush3.bf16.msra.mxu1 %v6859_v60  ;;  %5028 = vst.msk [vmem:[#allocation3 + $0x16] sm:$0x3] %vm4785_vm5, %v5026_v12  ;;  %6014 = vmatprep.mubr.bf16.mxu1 %v5121_v42  ;;  %v5071_v27 = vrot.slane %v5040_v6, %v9839_v44  ;;  %v5064_v23 = vcombine.high %v5040_v6, %v5040_v6  ;;  %v6908_v60 = vld [vmem:[#allocation4 + $0x1d8] sm:$0xff]   ;;  %v6912_v42 = vld [vmem:[#allocation4 + $0x1e8] sm:$0xff]  }
 0x4ab   :  { %6558 = vmatprep.subr.bf16.mxu1 %v6861_v61  ;;  %v6911_v61 = vld [vmem:[#allocation4 + $0x1a0] sm:$0xff]   ;;  %v6913_v31 = vld [vmem:[#allocation4 + $0x1a8] sm:$0xff]   ;;  %v6914_v12 = vld [vmem:[#allocation4 + $0x1f0] sm:$0xff]  }
 0x4ac   :  { %v5079_v38 = vcombine.high %v5071_v27, %v5071_v27  ;;  %v5078_v14 = vrot.slane %v5064_v23, %v9839_v44  ;;  %v5122_v30 = vpack.c.bf16 %v5071_v27, %v5071_v27  ;;  %v6929_v6 = vld [vmem:[#allocation4 + $0x2e8] sm:$0xff]   ;;  %v6933_v27 = vld [vmem:[#allocation4 + $0x2f8] sm:$0xff]  }
 0x4ae   :  { %6559 = vmatpush3.bf16.msra.mxu1 %v6863_v32  ;;  %v5123_v50 = vpack.c.bf16 %v5079_v38, %v5079_v38  ;;  %v5080_v16 = vcombine.high %v5078_v14, %v5078_v14 }
 0x4af   :  { %6560 = vmatprep.subr.bf16.mxu1 %v6865_v59  ;;  %v6915_v59 = vld [vmem:[#allocation4 + $0x1b0] sm:$0xff]  }
 0x4b0   :  { %v5125_v43 = vpack.c.bf16 %v5080_v16, %v5080_v16 }
 0x4b1   :  { %v9656_v8 = vld [vmem:[#allocation3 + $0x10] sm:$0xff] }
 0x4b2   :  { %6561 = vmatpush3.bf16.msra.mxu1 %v6867_v19  ;;  %v5088_v10 = vrot.slane %v9656_v8, %v9839_v44  ;;  %v5081_v32 = vcombine.high %v9656_v8, %v9656_v8  ;;  %v6916_v19 = vld [vmem:[#allocation4 + $0x1f8] sm:$0xff]   ;;  %v6922_v8 = vld [vmem:[#allocation4 + $0x288] sm:$0xff]  }
 0x4b3   :  { %6562 = vmatprep.subr.bf16.mxu1 %v6869_v35 }
 0x4b4   :  { %v5096_v24 = vcombine.high %v5088_v10, %v5088_v10  ;;  %v5126_v7 = vpack.c.bf16 %v5088_v10, %v5088_v10  ;;  %v5095_v35 = vrot.slane %v5081_v32, %v9839_v44  ;;  %v6918_v10 = vld [vmem:[#allocation4 + $0x2c0] sm:$0xff]   ;;  %v6925_v44 = vld [vmem:[#allocation4 + $0x2d8] sm:$0xff]  }
 0x4b6   :  { %6563 = vmatpush3.bf16.msra.mxu1 %v6871_v46  ;;  %v5127_v11 = vpack.c.bf16 %v5096_v24, %v5096_v24  ;;  %v6917_v46 = vld [vmem:[#allocation4 + $0x1b8] sm:$0xff]   ;;  %v6919_v24 = vld [vmem:[#allocation4 + $0x280] sm:$0xff]  }
 0x4b7   :  { %6564 = vmatprep.subr.bf16.mxu1 %v6873_v53  ;;  %v5097_v53 = vcombine.high %v5095_v35, %v5095_v35 }
 0x4b8   :  { %6134 = vmatprep.mubr.bf16.mxu0 %v5127_v11  ;;  %v5124_v11 = vpack.c.bf16 %v5078_v14, %v5078_v14 }
 0x4b9   :  { %6135 = vmatmul.mubr.bf16.vlgmr.msra.gmra.mrb[100].mxu0 %v5126_v7  ;;  %v6923_v7 = vld [vmem:[#allocation4 + $0x2d0] sm:$0xff]  }
 0x4ba   :  { %6565 = vmatpush3.bf16.msra.mxu1 %v6874_v9  ;;  %6790 = vmatpush3.bf16.msra.mxu0 %v6875_v15  ;;  %v6921_v9 = vld [vmem:[#allocation4 + $0x2c8] sm:$0xff]   ;;  %v5129_v15 = vpack.c.bf16 %v5097_v53, %v5097_v53 }
 0x4bb   :  { %6566 = vmatprep.subr.bf16.mxu1 %v6876_v0  ;;  %6791 = vmatprep.subr.bf16.mxu0 %v9838_v47  ;;  %v6924_v0 = vld [vmem:[#allocation4 + $0x290] sm:$0xff]  }
 0x4bc   :  { %6797 = vmatprep.mubr.msk.bf16.mxu0 %vm6994_vm0, %v9838_v47  ;;  %vm5938_vm0 = vcmask 523264  }
 0x4be   :  { %6567 = vmatpush3.bf16.msra.mxu1 %v6877_v21  ;;  %6792 = vmatpush3.bf16.msra.mxu0 %v6878_v36  ;;  %v6926_v21 = vld [vmem:[#allocation4 + $0x298] sm:$0xff]   ;;  %v6927_v36 = vld [vmem:[#allocation4 + $0x2e0] sm:$0xff]  }
 0x4bf   :  { %6568 = vmatprep.subr.bf16.mxu1 %v6879_v63  ;;  %6793 = vmatprep.subr.bf16.mxu0 %v9838_v47  ;;  %v6928_v63 = vld [vmem:[#allocation4 + $0x2a0] sm:$0xff]  }
 0x4c2   :  { %6569 = vmatpush3.bf16.msra.mxu1 %v6880_v55  ;;  %6794 = vmatpush3.bf16.msra.mxu0 %v6881_v34  ;;  %v6930_v55 = vld [vmem:[#allocation4 + $0x2a8] sm:$0xff]   ;;  %v6931_v34 = vld [vmem:[#allocation4 + $0x2f0] sm:$0xff]  }
 0x4c3   :  { %6570 = vmatprep.subr.bf16.mxu1 %v6882_v45  ;;  %6795 = vmatprep.subr.bf16.mxu0 %v9838_v47  ;;  %v6895_v47 = vld [vmem:[#allocation4 + $0x168] sm:$0xff]   ;;  %v6932_v45 = vld [vmem:[#allocation4 + $0x2b0] sm:$0xff]  }
 0x4c6   :  { %6571 = vmatpush3.bf16.msra.mxu1 %v6883_v4  ;;  %6796 = vmatpush3.bf16.msra.mxu0 %v6884_v58  ;;  %v6934_v4 = vld [vmem:[#allocation4 + $0x2b8] sm:$0xff]   ;;  %v5128_v58 = vpack.c.bf16 %v5095_v35, %v5095_v35 }
 0x4c7   :  { %6578 = vmatprep.subr.bf16.mxu1 %v6885_v18 }
 0x4c9   :  { %6015 = vmatmul.mubr.bf16.vlgmr.msra.gmra.mrb[28].mxu1 %v5120_v5  ;;  %6798 = vmatmul.mubr.msk.bf16.vlgmr.msra.gmra.mrb[104].mxu0 %vm5938_vm0, %v5130_v40 }
 0x4ca   :  { %6579 = vmatpush3.bf16.msra.mxu1 %v6886_v39  ;;  %6054 = vmatprep.mubr.bf16.mxu1 %v5123_v50 }
 0x4cb   :  { %6580 = vmatprep.subr.bf16.mxu1 %v6887_v25 }
 0x4ce   :  { %6581 = vmatpush3.bf16.msra.mxu1 %v6888_v29 }
 0x4cf   :  { %6582 = vmatprep.subr.bf16.mxu1 %v6889_v28 }
 0x4d2   :  { %6583 = vmatpush3.bf16.msra.mxu1 %v6890_v41  ;;  %v6358_v41 = vld [vmem:[%s9695_s6] ss:$0 sm:$0xff]  ;;  %s7000_s6 = smov [#allocation7]  }
 0x4d3   :  { %6584 = vmatprep.subr.bf16.mxu1 %v6891_v48  ;;  %s6240_s1 = sshll.u32 %s7000_s6, 4  ;;  %s6241_s1 = int_to_ptr.vmem [resolvable:$true] %s6240_s1 }
 0x4d4   :  { %s6964_s21 = scalar_lea.vmem %s6241_s1, 32  ;;  %p6969_p9 = scmp.lt.s32.totalorder %s6241_s1, %s6241_s1 }
 0x4d5   :  { %p6965_p8 = scmp.ne.s32.totalorder %s6241_s1, %s6964_s21  ;;  %p6970_p10 = scmp.lt.s32.totalorder %s6964_s21, %s6964_s21 }
 0x4d6   :  { %6585 = vmatpush3.bf16.msra.mxu1 %v6892_v13 }
 0x4d7   :  { %6586 = vmatprep.subr.bf16.mxu1 %v6893_v20  ;;  %p6971_p11 = por %p6970_p10, %p6969_p9 }
 0x4d9   :  { %p6972_p12 = pnand %p6971_p11, %p6965_p8 }
 0x4da   :  { %6587 = vmatpush3.bf16.msra.mxu1 %v6894_v26 }
 0x4db   :  { %6588 = vmatprep.subr.bf16.mxu1 %v6895_v47 }
 0x4de   :  { %6589 = vmatpush3.bf16.msra.mxu1 %v6896_v37 }
 0x4df   :  { %6590 = vmatprep.subr.bf16.mxu1 %v6897_v57 }
 0x4e2   :  { %6591 = vmatpush3.bf16.msra.mxu1 %v6898_v51 }
 0x4e3   :  { %6592 = vmatprep.subr.bf16.mxu1 %v6899_v3 }
 0x4e6   :  { %6593 = vmatpush3.bf16.msra.mxu1 %v6900_v56 }
 0x4e7   :  { %6600 = vmatprep.subr.bf16.mxu1 %v6901_v1 }
 0x4e9   :  { %6055 = vmatmul.mubr.bf16.vlgmr.msra.gmra.mrb[32].mxu1 %v5122_v30 }
 0x4ea   :  { %6601 = vmatpush3.bf16.msra.mxu1 %v6902_v49  ;;  %6094 = vmatprep.mubr.bf16.mxu1 %v5125_v43 }
 0x4eb   :  { %6602 = vmatprep.subr.bf16.mxu1 %v6904_v2 }
 0x4ee   :  { %6603 = vmatpush3.bf16.msra.mxu1 %v6905_v52 }
 0x4ef   :  { %6604 = vmatprep.subr.bf16.mxu1 %v6906_v33 }
 0x4f2   :  { %6605 = vmatpush3.bf16.msra.mxu1 %v6907_v54 }
 0x4f3   :  { %6606 = vmatprep.subr.bf16.mxu1 %v6908_v60 }
 0x4f6   :  { %6607 = vmatpush3.bf16.msra.mxu1 %v6909_v22 }
 0x4f7   :  { %6608 = vmatprep.subr.bf16.mxu1 %v6910_v62 }
 0x4fa   :  { %6609 = vmatpush3.bf16.msra.mxu1 %v6911_v61 }
 0x4fb   :  { %6610 = vmatprep.subr.bf16.mxu1 %v6912_v42 }
 0x4fe   :  { %6611 = vmatpush3.bf16.msra.mxu1 %v6913_v31 }
 0x4ff   :  { %6612 = vmatprep.subr.bf16.mxu1 %v6914_v12 }
 0x502   :  { %6613 = vmatpush3.bf16.msra.mxu1 %v6915_v59 }
 0x503   :  { %6614 = vmatprep.subr.bf16.mxu1 %v6916_v19 }
 0x506   :  { %6615 = vmatpush3.bf16.msra.mxu1 %v6917_v46 }
 0x507   :  { %6644 = vmatprep.subr.bf16.mxu1 %v6918_v10 }
 0x509   :  { %6095 = vmatmul.mubr.bf16.vlgmr.msra.gmra.mrb[36].mxu1 %v5124_v11 }
 0x50a   :  { %6645 = vmatpush3.bf16.msra.mxu1 %v6919_v24  ;;  %6174 = vmatprep.mubr.bf16.mxu1 %v5129_v15 }
 0x50b   :  { %6646 = vmatprep.subr.bf16.mxu1 %v6921_v9 }
 0x50e   :  { %6647 = vmatpush3.bf16.msra.mxu1 %v6922_v8 }
 0x50f   :  { %6648 = vmatprep.subr.bf16.mxu1 %v6923_v7 }
 0x512   :  { %6649 = vmatpush3.bf16.msra.mxu1 %v6924_v0 }
 0x513   :  { %6650 = vmatprep.subr.bf16.mxu1 %v6925_v44 }
 0x516   :  { %6651 = vmatpush3.bf16.msra.mxu1 %v6926_v21 }
 0x517   :  { %6652 = vmatprep.subr.bf16.mxu1 %v6927_v36 }
 0x51a   :  { %6653 = vmatpush3.bf16.msra.mxu1 %v6928_v63 }
 0x51b   :  { %6654 = vmatprep.subr.bf16.mxu1 %v6929_v6 }
 0x51e   :  { %6655 = vmatpush3.bf16.msra.mxu1 %v6930_v55 }
 0x51f   :  { %6656 = vmatprep.subr.bf16.mxu1 %v6931_v34 }
 0x522   :  { %6657 = vmatpush3.bf16.msra.mxu1 %v6932_v45 }
 0x523   :  { %6658 = vmatprep.subr.bf16.mxu1 %v6933_v27 }
 0x526   :  { %6659 = vmatpush3.bf16.msra.mxu1 %v6934_v4 }
 0x529   :  { %6175 = vmatmul.mubr.bf16.vlgmr.msra.gmra.mrb[40].mxu1 %v5128_v58 }
 0x57c   :  { %v6550_v18 = vpop.f32.mrb[24].mxu1 }
 0x57d   :  { %v6551_v17 = vpop.f32.mrb[25].mxu1 }
 0x57e   :  { %v6552_v38 = vadd.f32 %v6551_v17, %v6550_v18  ;;  %v6553_v39 = vpop.f32.mrb[26].mxu1 }
 0x57f   :  { %v6554_v5 = vpop.f32.mrb[27].mxu1 }
 0x580   :  { %v5977_v47 = vadd.f32 %v6552_v38, %v6358_v41 }
 0x58c   :  { %v6638_v40 = vpop.f32.mrb[100].mxu0 }
 0x58d   :  { %v6639_v25 = vpop.f32.mrb[101].mxu0 }
 0x58e   :  { %v6640_v50 = vadd.f32 %v6639_v25, %v6638_v40  ;;  %v6641_v29 = vpop.f32.mrb[102].mxu0 }
 0x58f   :  { %v6642_v28 = vpop.f32.mrb[103].mxu0 }
 0x59c   :  { %v6572_v48 = vpop.f32.mrb[28].mxu1  ;;  %v6216_v13 = vpop.f32.mrb[104].mxu0 }
 0x59d   :  { %v6573_v20 = vpop.f32.mrb[29].mxu1  ;;  %v6799_v26 = vpop.f32.mrb[105].mxu0 }
 0x59e   :  { %v6574_v37 = vadd.f32 %v6573_v20, %v6572_v48  ;;  %v6575_v57 = vpop.f32.mrb[30].mxu1  ;;  %v6219_v23 = vpop.f32.mrb[106].mxu0 }
 0x59f   :  { %v6576_v51 = vpop.f32.mrb[31].mxu1  ;;  %v6800_v3 = vpop.f32.mrb[107].mxu0 }
 0x5a0   :  { %v6017_v14 = vadd.f32 %v6574_v37, %v5977_v47 }
 0x5bc   :  { %v6594_v56 = vpop.f32.mrb[32].mxu1 }
 0x5bd   :  { %v6595_v1 = vpop.f32.mrb[33].mxu1 }
 0x5be   :  { %v6596_v16 = vadd.f32 %v6595_v1, %v6594_v56  ;;  %v6597_v49 = vpop.f32.mrb[34].mxu1 }
 0x5bf   :  { %v6598_v30 = vpop.f32.mrb[35].mxu1 }
 0x5c0   :  { %v6057_v2 = vadd.f32 %v6596_v16, %v6017_v14 }
 0x5dc   :  { %v6616_v43 = vpop.f32.mrb[36].mxu1 }
 0x5dd   :  { %v6617_v52 = vpop.f32.mrb[37].mxu1 }
 0x5de   :  { %v6618_v33 = vadd.f32 %v6617_v52, %v6616_v43  ;;  %v6619_v54 = vpop.f32.mrb[38].mxu1 }
 0x5df   :  { %v6620_v60 = vpop.f32.mrb[39].mxu1 }
 0x5e0   :  { %v6097_v22 = vadd.f32 %v6618_v33, %v6057_v2 }
 0x5e2   :  { %v6137_v62 = vadd.f32 %v6640_v50, %v6097_v22 }
 0x5fc   :  { %v6660_v61 = vpop.f32.mrb[40].mxu1 }
 0x5fd   :  { %v6661_v42 = vpop.f32.mrb[41].mxu1 }
 0x5fe   :  { %v6662_v31 = vadd.f32 %v6661_v42, %v6660_v61  ;;  %v6663_v12 = vpop.f32.mrb[42].mxu1 }
 0x5ff   :  { %v6664_v32 = vpop.f32.mrb[43].mxu1 }
 0x600   :  { %v6177_v59 = vadd.f32 %v6662_v31, %v6137_v62 }
 0x602   :  { %v6217_v19 = vadd.f32 %v6216_v13, %v6177_v59 }
 0x604   :  { %v6222_v35 = vsel %vm1059_vm1, %v6217_v19, -inf }
 0x605   :  { %6223 = vmax.xlane.f32.xlu0 %v6222_v35 }
 0x692   :  { %v6224_v46 = vpop.xlane.xlu0 %6223 }
 0x693   :  { %v6225_v10 = vsub.f32 %v6217_v19, %v6224_v46 }
 0x695   :  { %v6226_v53 = vmul.f32 1.442695, %v6225_v10 }
 0x697   :  { %6935 = vpow2.f32 %v6226_v53 }
 0x6a1   :  { %v6936_v24 = vpop.eup %6935 }
 0x6a2   :  { %v6228_v11 = vsel %vm1059_vm1, %v6936_v24, 0.0 }
 0x6a3   :  { %6229 = vadd.xlane.f32.xlu1 %v6228_v11 }
 0x730   :  { %v6230_v9 = vpop.xlane.xlu1 %6229 }
 0x731   :  { %6937 = vrcp.f32 %v6230_v9 }
 0x73b   :  { %v6938_v15 = vpop.eup %6937 }
 0x73c   :  { %v6232_v8 = vmul.f32 %v6938_v15, %v6936_v24 }
 0x73e   :  { %6233 = vst [vmem:[#allocation7] sm:$0x3] %v6232_v8 }
 0x73f   :  { %6975 = shalt.err (!%p6972_p12)
}
 0x740   :  { %s6976_s24 = scalar_lea.hbm %s9696_s7, 32 }
 0x741   :  { %p6977_p13 = scmp.ne.s32.totalorder %s9696_s7, %s6976_s24  ;;  %p6980_p0 = scmp.lt.u32.totalorder %s6976_s24, %s9696_s7 }
 0x743   :  { %p6982_p1 = pnand %p6980_p0, %p6977_p13 }
 0x745   :  { %6985 = shalt.err (!%p6982_p1)
}
 0x746   :  { %6243 = dma.vmem_to_hbm [thread:$0]  %s6241_s1, 32, %s9696_s7, [#allocation6]  }
 0x747   :  { %6988 = dma.done.wait [#allocation6], 32  }
 0x748   :  { %6989 = vsyncadd [#allocation6], 4294967264 }
 0x749   :  { %6247 = vsyncpa [#allocation5], 1 }
 0x74a   :  { %6248 = vsyncpa [#allocation6], 1 }

</bundles_post_ra>
